<compile_context>
chip_gen: v7x
topology: tpu7x:2x2x1
jax: 0.10.0
libtpu: 0.0.40
codegen_flags: <defaults>
</compile_context>

<pallas_src>
import jax
import jax.numpy as jnp
from jax.experimental import pallas as pl
from jax.experimental.pallas import tpu as pltpu

NPAD = 128                        # GEMM output channels padded to one lane group
VMEM_LIMIT = 32 * 1024 * 1024     # portable across v5e/v6e (128 MiB) and v7x (64 MiB)


def _round_up(x, m):
    return (x + m - 1) // m * m


# ---------------------------------------------------------------------------
# Pallas kernels
# ---------------------------------------------------------------------------
def _conv_gemm_bias_relu_pool_kernel(p_ref, w_ref, b_ref, o_ref):
    """Whole-image fused conv (im2col GEMM) + bias + ReLU + 2x2 max-pool.

    p_ref: (1, 4*MP, K) bf16 -- patch rows grouped into 4 contiguous blocks of
           MP rows, one per (r, c) position of the 2x2 pool window.
    w_ref: (K, 128) bf16 -- packed weight, output channels zero-padded.
    b_ref: (1, 128)  f32
    o_ref: (1, MP, 128) bf16 -- pooled activations, lane dense.
    """
    mp = o_ref.shape[1]
    z = jnp.dot(p_ref[0], w_ref[...], preferred_element_type=jnp.float32)  # (4*MP,128)
    a = jnp.maximum(z + b_ref[...], 0.0)                 # bias + ReLU, f32
    pooled = jnp.maximum(
        jnp.maximum(a[0:mp], a[mp:2 * mp]),
        jnp.maximum(a[2 * mp:3 * mp], a[3 * mp:4 * mp]),
    )                                                    # 2x2 max-pool, (MP, 128)
    o_ref[0] = pooled.astype(o_ref.dtype)


def _matmul_bias_kernel(a_ref, w_ref, b_ref, o_ref):
    acc = jnp.dot(a_ref[...], w_ref[...], preferred_element_type=jnp.float32)
    o_ref[...] = (acc + b_ref[...]).astype(o_ref.dtype)


# ---------------------------------------------------------------------------
# pallas_call wrappers
# ---------------------------------------------------------------------------
def _conv_relu_pool(patches, w, b, mp):
    """patches: (B, 4*mp, K) bf16; w: (K, 128) bf16; b: (1, 128) f32
    -> (B, mp, 128) bf16  (conv + bias + ReLU + MaxPool2d(2); pooled rows are
    flattened row-major over (pool_row, pool_col); trailing rows are padding)."""
    B, M4, K = patches.shape
    return pl.pallas_call(
        _conv_gemm_bias_relu_pool_kernel,
        out_shape=jax.ShapeDtypeStruct((B, mp, NPAD), jnp.bfloat16),
        grid=(B,),
        in_specs=[
            pl.BlockSpec((1, M4, K), lambda bi: (bi, 0, 0)),
            pl.BlockSpec((K, NPAD), lambda bi: (0, 0)),   # weight resident across grid
            pl.BlockSpec((1, NPAD), lambda bi: (0, 0)),
        ],
        out_specs=pl.BlockSpec((1, mp, NPAD), lambda bi: (bi, 0, 0)),
        compiler_params=pltpu.CompilerParams(
            dimension_semantics=("parallel",),
            vmem_limit_bytes=VMEM_LIMIT,
        ),
    )(patches, w, b)


def _linear(a, w, b):
    """a: (M, K) bf16; w: (K, 128) bf16; b: (1, 128) f32 -> (M, 128) f32."""
    M, K = a.shape
    tile_m = min(512, _round_up(M, 8))
    m_pad = _round_up(M, tile_m)
    if m_pad != M:
        a = jnp.pad(a, ((0, m_pad - M), (0, 0)))
    out = pl.pallas_call(
        _matmul_bias_kernel,
        out_shape=jax.ShapeDtypeStruct((m_pad, NPAD), jnp.float32),
        grid=(m_pad // tile_m,),
        in_specs=[
            pl.BlockSpec((tile_m, K), lambda i: (i, 0)),
            pl.BlockSpec((K, NPAD), lambda i: (0, 0)),
            pl.BlockSpec((1, NPAD), lambda i: (0, 0)),
        ],
        out_specs=pl.BlockSpec((tile_m, NPAD), lambda i: (i, 0)),
        compiler_params=pltpu.CompilerParams(
            dimension_semantics=("parallel",),
            vmem_limit_bytes=VMEM_LIMIT,
        ),
    )(a, w, b)
    return out[:M]


# ---------------------------------------------------------------------------
# XLA glue: im2col + pool-window grouping (channels-last, no kernel-side reshapes)
# ---------------------------------------------------------------------------
def _im2col_nhwc(x, kh, kw):
    """x: (B, H, W, C) -> (B, OH, OW, kh*kw*C), column order (kh, kw, c)."""
    B, H, W, C = x.shape
    OH, OW = H - kh + 1, W - kw + 1
    slabs = [x[:, i:i + OH, j:j + OW, :] for i in range(kh) for j in range(kw)]
    p = jnp.stack(slabs, axis=3)                     # (B, OH, OW, kh*kw, C)
    return p.reshape(B, OH, OW, kh * kw * C)


def _pool_grouped_patches(p):
    """(B, OH, OW, K) im2col patches -> ((B, 4*mp_pad, K), mp, mp_pad).

    Group g = 2*r + c holds the patches of conv positions (2*i + r, 2*j + c),
    flattened row-major over (i, j), zero-padded from mp = (OH//2)*(OW//2) rows
    to mp_pad = round_up(mp, 8) so every group starts on a tile-aligned row.
    Floor-pool semantics (odd trailing row/col dropped) fall out naturally."""
    B, OH, OW, K = p.shape
    oh2, ow2 = OH // 2, OW // 2
    mp = oh2 * ow2
    mp_pad = _round_up(mp, 8)
    groups = []
    for r in range(2):
        for c in range(2):
            g = p[:, r:2 * oh2:2, c:2 * ow2:2, :].reshape(B, mp, K)
            if mp_pad != mp:
                g = jnp.pad(g, ((0, 0), (0, mp_pad - mp), (0, 0)))
            groups.append(g)
    return jnp.concatenate(groups, axis=1), mp, mp_pad


# ---------------------------------------------------------------------------
# Parameters: PyTorch-layout init + one-time packing into kernel layout
# ---------------------------------------------------------------------------
def init_params(key):
    ks = jax.random.split(key, 6)
    s = 0.05
    return dict(
        w1=s * jax.random.normal(ks[0], (16, 1, 3, 3), jnp.float32),
        b1=s * jax.random.normal(ks[1], (16,), jnp.float32),
        w2=s * jax.random.normal(ks[2], (32, 16, 5, 5), jnp.float32),
        b2=s * jax.random.normal(ks[3], (32,), jnp.float32),
        wfc=s * jax.random.normal(ks[4], (10, 32 * 4 * 4), jnp.float32),
        bfc=s * jax.random.normal(ks[5], (10,), jnp.float32),
    )


def pack_params(p):
    """One-time repack of PyTorch (O, C, KH, KW) weights into (K, 128) bf16 GEMM
    orientation (column order (kh, kw, c), output channels zero-padded to 128)."""
    w1 = p["w1"].transpose(2, 3, 1, 0).reshape(9, 16)                # (kh*kw*1, 16)
    w1 = jnp.pad(w1, ((0, 0), (0, NPAD - 16))).astype(jnp.bfloat16)
    b1 = jnp.pad(p["b1"], (0, NPAD - 16)).reshape(1, NPAD).astype(jnp.float32)

    # conv2 contracts over the full zero-padded 128-channel group:
    # (kh, kw, c_pad128, o_pad128) -> (5*5*128, 128).
    w2 = p["w2"].transpose(2, 3, 1, 0)                               # (5, 5, 16, 32)
    w2 = jnp.pad(w2, ((0, 0), (0, 0), (0, NPAD - 16), (0, NPAD - 32)))
    w2 = w2.reshape(5 * 5 * NPAD, NPAD).astype(jnp.bfloat16)
    b2 = jnp.pad(p["b2"], (0, NPAD - 32)).reshape(1, NPAD).astype(jnp.float32)

    # fc1 consumes PyTorch's NCHW flatten (c, h, w); our activation flattens as
    # (h*4 + w, c_pad128) -- absorb the permutation and padding into the weight.
    wfc = p["wfc"].reshape(10, 32, 4, 4).transpose(2, 3, 1, 0)       # (h, w, c, o)
    wfc = jnp.pad(wfc, ((0, 0), (0, 0), (0, NPAD - 32), (0, NPAD - 10)))
    wfc = wfc.reshape(4 * 4 * NPAD, NPAD).astype(jnp.bfloat16)
    bfc = jnp.pad(p["bfc"], (0, NPAD - 10)).reshape(1, NPAD).astype(jnp.float32)
    return dict(w1=w1, b1=b1, w2=w2, b2=b2, wfc=wfc, bfc=bfc)


# ---------------------------------------------------------------------------
# Forward pass
# ---------------------------------------------------------------------------
def cnn_forward(packed, x):
    """x: (B, 1, 28, 28) NCHW f32 -> logits (B, 10) f32."""
    B = x.shape[0]
    xh = jnp.transpose(x, (0, 2, 3, 1)).astype(jnp.bfloat16)         # NHWC (B,28,28,1)

    p1 = _im2col_nhwc(xh, 3, 3)                                       # (B, 26, 26, 9)
    g1, mp1, mp1_pad = _pool_grouped_patches(p1)                      # (B, 704, 9)
    a1 = _conv_relu_pool(g1, packed["w1"], packed["b1"], mp1_pad)     # (B, 176, 128)
    # dropout1: identity (eval mode)

    a1_img = a1[:, :mp1, :].reshape(B, 13, 13, NPAD)                  # real pooled rows
    p2 = _im2col_nhwc(a1_img, 5, 5)                                   # (B, 9, 9, 3200)
    g2, mp2, mp2_pad = _pool_grouped_patches(p2)                      # (B, 64, 3200)
    a2 = _conv_relu_pool(g2, packed["w2"], packed["b2"], mp2_pad)     # (B, 16, 128)
    # dropout2: identity (eval mode)

    flat = a2.reshape(B, 4 * 4 * NPAD)                                # (B, 2048)
    logits = _linear(flat, packed["wfc"], packed["bfc"])              # (B, 128) f32
    return logits[:, :10]


if __name__ == "__main__":
    key = jax.random.PRNGKey(0)
    pkey, xkey = jax.random.split(key)
    packed = pack_params(init_params(pkey))
    # MNIST-sized input implied by fc1 = Linear(32*4*4, 10): (B, 1, 28, 28)
    x = jax.random.normal(xkey, (2, 1, 28, 28), jnp.float32)

    logits = jax.jit(cnn_forward)(packed, x)
    jax.block_until_ready(logits)
    assert logits.shape == (2, 10)
    print("KERNEL_OK")
</pallas_src>

<mosaic_0001>
module attributes {stable_mosaic.version = 11 : i64} {
  func.func @_conv_gemm_bias_relu_pool_kernel(%arg0: i32, %arg1: memref<1x704x9xbf16, #tpu.memory_space<vmem>>, %arg2: memref<9x128xbf16, #tpu.memory_space<vmem>>, %arg3: memref<1x128xf32, #tpu.memory_space<vmem>>, %arg4: memref<1x176x128xbf16, #tpu.memory_space<vmem>>) attributes {dimension_semantics = [#tpu.dimension_semantics<parallel>], iteration_bounds = array<i64: 2>, scalar_prefetch = 0 : i64, scratch_operands = 0 : i64, tpu.core_type = #tpu.core_type<tc>, window_params = [{transform_indices = @transform_0, window_bounds = array<i64: 1, 704, 9>}, {pipeline_mode = #tpu.pipeline_mode<synchronous>, transform_indices = @transform_1, window_bounds = array<i64: 9, 128>}, {pipeline_mode = #tpu.pipeline_mode<synchronous>, transform_indices = @transform_2, window_bounds = array<i64: 1, 128>}, {transform_indices = @transform_3, window_bounds = array<i64: 1, 176, 128>}]} {
    %c0 = arith.constant 0 : index
    %c0_0 = arith.constant 0 : index
    %c0_1 = arith.constant 0 : index
    %0 = vector.load %arg1[%c0, %c0_0, %c0_1] : memref<1x704x9xbf16, #tpu.memory_space<vmem>>, vector<1x704x9xbf16>
    %1 = vector.shape_cast %0 : vector<1x704x9xbf16> to vector<704x9xbf16>
    %c0_2 = arith.constant 0 : index
    %c0_3 = arith.constant 0 : index
    %2 = vector.load %arg2[%c0_2, %c0_3] : memref<9x128xbf16, #tpu.memory_space<vmem>>, vector<9x128xbf16>
    %cst = arith.constant dense<0.000000e+00> : vector<704x128xf32>
    %3 = tpu.matmul %1, %2, %cst {dimension_numbers = #tpu.dot_dimension_numbers<[1], [0], [0], [1], [0, 0, 1, 1], [], []>} : vector<704x9xbf16>, vector<9x128xbf16>, vector<704x128xf32> -> vector<704x128xf32>
    %c0_4 = arith.constant 0 : index
    %c0_5 = arith.constant 0 : index
    %4 = vector.load %arg3[%c0_4, %c0_5] : memref<1x128xf32, #tpu.memory_space<vmem>>, vector<1x128xf32>
    %5 = vector.broadcast %4 : vector<1x128xf32> to vector<704x128xf32>
    %6 = arith.addf %3, %5 : vector<704x128xf32>
    %cst_6 = arith.constant 0.000000e+00 : f32
    %7 = vector.broadcast %cst_6 : f32 to vector<704x128xf32>
    %8 = arith.maximumf %6, %7 : vector<704x128xf32>
    %9 = vector.extract_strided_slice %8 {offsets = [0, 0], sizes = [176, 128], strides = [1, 1]} : vector<704x128xf32> to vector<176x128xf32>
    %10 = vector.extract_strided_slice %8 {offsets = [176, 0], sizes = [176, 128], strides = [1, 1]} : vector<704x128xf32> to vector<176x128xf32>
    %11 = arith.maximumf %9, %10 : vector<176x128xf32>
    %12 = vector.extract_strided_slice %8 {offsets = [352, 0], sizes = [176, 128], strides = [1, 1]} : vector<704x128xf32> to vector<176x128xf32>
    %13 = vector.extract_strided_slice %8 {offsets = [528, 0], sizes = [176, 128], strides = [1, 1]} : vector<704x128xf32> to vector<176x128xf32>
    %14 = arith.maximumf %12, %13 : vector<176x128xf32>
    %15 = arith.maximumf %11, %14 : vector<176x128xf32>
    %16 = arith.truncf %15 : vector<176x128xf32> to vector<176x128xbf16>
    %c0_7 = arith.constant 0 : index
    %c0_8 = arith.constant 0 : index
    %c0_9 = arith.constant 0 : index
    %17 = vector.load %arg4[%c0_7, %c0_8, %c0_9] : memref<1x176x128xbf16, #tpu.memory_space<vmem>>, vector<1x176x128xbf16>
    %18 = vector.shape_cast %17 : vector<1x176x128xbf16> to vector<176x128xbf16>
    %19 = vector.shape_cast %16 : vector<176x128xbf16> to vector<1x176x128xbf16>
    tpu.vector_store %arg4[%c0_7, %c0_8, %c0_9], %19 {strides = array<i32>} : memref<1x176x128xbf16, #tpu.memory_space<vmem>>, vector<1x176x128xbf16>,
    return
  }
  func.func @transform_0(%arg0: i32) -> (i32, i32, i32) {
    %c0_i32 = arith.constant 0 : i32
    %c0_i32_0 = arith.constant 0 : i32
    %c0_i32_1 = arith.constant 0 : i32
    return %arg0, %c0_i32, %c0_i32_0 : i32, i32, i32
  }
  func.func @transform_1(%arg0: i32) -> (i32, i32) {
    %c0_i32 = arith.constant 0 : i32
    %c0_i32_0 = arith.constant 0 : i32
    %c0_i32_1 = arith.constant 0 : i32
    return %c0_i32, %c0_i32_0 : i32, i32
  }
  func.func @transform_2(%arg0: i32) -> (i32, i32) {
    %c0_i32 = arith.constant 0 : i32
    %c0_i32_0 = arith.constant 0 : i32
    %c0_i32_1 = arith.constant 0 : i32
    return %c0_i32, %c0_i32_0 : i32, i32
  }
  func.func @transform_3(%arg0: i32) -> (i32, i32, i32) {
    %c0_i32 = arith.constant 0 : i32
    %c0_i32_0 = arith.constant 0 : i32
    %c0_i32_1 = arith.constant 0 : i32
    return %arg0, %c0_i32, %c0_i32_0 : i32, i32, i32
  }
}

module attributes {stable_mosaic.version = 11 : i64} {
  func.func @_conv_gemm_bias_relu_pool_kernel(%arg0: i32, %arg1: memref<1x64x3200xbf16, #tpu.memory_space<vmem>>, %arg2: memref<3200x128xbf16, #tpu.memory_space<vmem>>, %arg3: memref<1x128xf32, #tpu.memory_space<vmem>>, %arg4: memref<1x16x128xbf16, #tpu.memory_space<vmem>>) attributes {dimension_semantics = [#tpu.dimension_semantics<parallel>], iteration_bounds = array<i64: 2>, scalar_prefetch = 0 : i64, scratch_operands = 0 : i64, tpu.core_type = #tpu.core_type<tc>, window_params = [{transform_indices = @transform_0, window_bounds = array<i64: 1, 64, 3200>}, {pipeline_mode = #tpu.pipeline_mode<synchronous>, transform_indices = @transform_1, window_bounds = array<i64: 3200, 128>}, {pipeline_mode = #tpu.pipeline_mode<synchronous>, transform_indices = @transform_2, window_bounds = array<i64: 1, 128>}, {transform_indices = @transform_3, window_bounds = array<i64: 1, 16, 128>}]} {
    %c0 = arith.constant 0 : index
    %c0_0 = arith.constant 0 : index
    %c0_1 = arith.constant 0 : index
    %0 = vector.load %arg1[%c0, %c0_0, %c0_1] : memref<1x64x3200xbf16, #tpu.memory_space<vmem>>, vector<1x64x3200xbf16>
    %1 = vector.shape_cast %0 : vector<1x64x3200xbf16> to vector<64x3200xbf16>
    %c0_2 = arith.constant 0 : index
    %c0_3 = arith.constant 0 : index
    %2 = vector.load %arg2[%c0_2, %c0_3] : memref<3200x128xbf16, #tpu.memory_space<vmem>>, vector<3200x128xbf16>
    %cst = arith.constant dense<0.000000e+00> : vector<64x128xf32>
    %3 = tpu.matmul %1, %2, %cst {dimension_numbers = #tpu.dot_dimension_numbers<[1], [0], [0], [1], [0, 0, 1, 1], [], []>} : vector<64x3200xbf16>, vector<3200x128xbf16>, vector<64x128xf32> -> vector<64x128xf32>
    %c0_4 = arith.constant 0 : index
    %c0_5 = arith.constant 0 : index
    %4 = vector.load %arg3[%c0_4, %c0_5] : memref<1x128xf32, #tpu.memory_space<vmem>>, vector<1x128xf32>
    %5 = vector.broadcast %4 : vector<1x128xf32> to vector<64x128xf32>
    %6 = arith.addf %3, %5 : vector<64x128xf32>
    %cst_6 = arith.constant 0.000000e+00 : f32
    %7 = vector.broadcast %cst_6 : f32 to vector<64x128xf32>
    %8 = arith.maximumf %6, %7 : vector<64x128xf32>
    %9 = vector.extract_strided_slice %8 {offsets = [0, 0], sizes = [16, 128], strides = [1, 1]} : vector<64x128xf32> to vector<16x128xf32>
    %10 = vector.extract_strided_slice %8 {offsets = [16, 0], sizes = [16, 128], strides = [1, 1]} : vector<64x128xf32> to vector<16x128xf32>
    %11 = arith.maximumf %9, %10 : vector<16x128xf32>
    %12 = vector.extract_strided_slice %8 {offsets = [32, 0], sizes = [16, 128], strides = [1, 1]} : vector<64x128xf32> to vector<16x128xf32>
    %13 = vector.extract_strided_slice %8 {offsets = [48, 0], sizes = [16, 128], strides = [1, 1]} : vector<64x128xf32> to vector<16x128xf32>
    %14 = arith.maximumf %12, %13 : vector<16x128xf32>
    %15 = arith.maximumf %11, %14 : vector<16x128xf32>
    %16 = arith.truncf %15 : vector<16x128xf32> to vector<16x128xbf16>
    %c0_7 = arith.constant 0 : index
    %c0_8 = arith.constant 0 : index
    %c0_9 = arith.constant 0 : index
    %17 = vector.load %arg4[%c0_7, %c0_8, %c0_9] : memref<1x16x128xbf16, #tpu.memory_space<vmem>>, vector<1x16x128xbf16>
    %18 = vector.shape_cast %17 : vector<1x16x128xbf16> to vector<16x128xbf16>
    %19 = vector.shape_cast %16 : vector<16x128xbf16> to vector<1x16x128xbf16>
    tpu.vector_store %arg4[%c0_7, %c0_8, %c0_9], %19 {strides = array<i32>} : memref<1x16x128xbf16, #tpu.memory_space<vmem>>, vector<1x16x128xbf16>,
    return
  }
  func.func @transform_0(%arg0: i32) -> (i32, i32, i32) {
    %c0_i32 = arith.constant 0 : i32
    %c0_i32_0 = arith.constant 0 : i32
    %c0_i32_1 = arith.constant 0 : i32
    return %arg0, %c0_i32, %c0_i32_0 : i32, i32, i32
  }
  func.func @transform_1(%arg0: i32) -> (i32, i32) {
    %c0_i32 = arith.constant 0 : i32
    %c0_i32_0 = arith.constant 0 : i32
    %c0_i32_1 = arith.constant 0 : i32
    return %c0_i32, %c0_i32_0 : i32, i32
  }
  func.func @transform_2(%arg0: i32) -> (i32, i32) {
    %c0_i32 = arith.constant 0 : i32
    %c0_i32_0 = arith.constant 0 : i32
    %c0_i32_1 = arith.constant 0 : i32
    return %c0_i32, %c0_i32_0 : i32, i32
  }
  func.func @transform_3(%arg0: i32) -> (i32, i32, i32) {
    %c0_i32 = arith.constant 0 : i32
    %c0_i32_0 = arith.constant 0 : i32
    %c0_i32_1 = arith.constant 0 : i32
    return %arg0, %c0_i32, %c0_i32_0 : i32, i32, i32
  }
}

module attributes {stable_mosaic.version = 11 : i64} {
  func.func @_matmul_bias_kernel(%arg0: i32, %arg1: memref<8x2048xbf16, #tpu.memory_space<vmem>>, %arg2: memref<2048x128xbf16, #tpu.memory_space<vmem>>, %arg3: memref<1x128xf32, #tpu.memory_space<vmem>>, %arg4: memref<8x128xf32, #tpu.memory_space<vmem>>) attributes {dimension_semantics = [#tpu.dimension_semantics<parallel>], iteration_bounds = array<i64: 1>, scalar_prefetch = 0 : i64, scratch_operands = 0 : i64, tpu.core_type = #tpu.core_type<tc>, window_params = [{transform_indices = @transform_0, window_bounds = array<i64: 8, 2048>}, {pipeline_mode = #tpu.pipeline_mode<synchronous>, transform_indices = @transform_1, window_bounds = array<i64: 2048, 128>}, {pipeline_mode = #tpu.pipeline_mode<synchronous>, transform_indices = @transform_2, window_bounds = array<i64: 1, 128>}, {transform_indices = @transform_3, window_bounds = array<i64: 8, 128>}]} {
    %c0 = arith.constant 0 : index
    %c0_0 = arith.constant 0 : index
    %0 = vector.load %arg1[%c0, %c0_0] : memref<8x2048xbf16, #tpu.memory_space<vmem>>, vector<8x2048xbf16>
    %c0_1 = arith.constant 0 : index
    %c0_2 = arith.constant 0 : index
    %1 = vector.load %arg2[%c0_1, %c0_2] : memref<2048x128xbf16, #tpu.memory_space<vmem>>, vector<2048x128xbf16>
    %cst = arith.constant dense<0.000000e+00> : vector<8x128xf32>
    %2 = tpu.matmul %0, %1, %cst {dimension_numbers = #tpu.dot_dimension_numbers<[1], [0], [0], [1], [0, 0, 1, 1], [], []>} : vector<8x2048xbf16>, vector<2048x128xbf16>, vector<8x128xf32> -> vector<8x128xf32>
    %c0_3 = arith.constant 0 : index
    %c0_4 = arith.constant 0 : index
    %3 = vector.load %arg3[%c0_3, %c0_4] : memref<1x128xf32, #tpu.memory_space<vmem>>, vector<1x128xf32>
    %4 = vector.broadcast %3 : vector<1x128xf32> to vector<8x128xf32>
    %5 = arith.addf %2, %4 : vector<8x128xf32>
    %c0_5 = arith.constant 0 : index
    %c0_6 = arith.constant 0 : index
    %6 = vector.load %arg4[%c0_5, %c0_6] : memref<8x128xf32, #tpu.memory_space<vmem>>, vector<8x128xf32>
    tpu.vector_store %arg4[%c0_5, %c0_6], %5 {strides = array<i32>} : memref<8x128xf32, #tpu.memory_space<vmem>>, vector<8x128xf32>,
    return
  }
  func.func @transform_0(%arg0: i32) -> (i32, i32) {
    %c0_i32 = arith.constant 0 : i32
    %c0_i32_0 = arith.constant 0 : i32
    return %arg0, %c0_i32 : i32, i32
  }
  func.func @transform_1(%arg0: i32) -> (i32, i32) {
    %c0_i32 = arith.constant 0 : i32
    %c0_i32_0 = arith.constant 0 : i32
    %c0_i32_1 = arith.constant 0 : i32
    return %c0_i32, %c0_i32_0 : i32, i32
  }
  func.func @transform_2(%arg0: i32) -> (i32, i32) {
    %c0_i32 = arith.constant 0 : i32
    %c0_i32_0 = arith.constant 0 : i32
    %c0_i32_1 = arith.constant 0 : i32
    return %c0_i32, %c0_i32_0 : i32, i32
  }
  func.func @transform_3(%arg0: i32) -> (i32, i32) {
    %c0_i32 = arith.constant 0 : i32
    %c0_i32_0 = arith.constant 0 : i32
    return %arg0, %c0_i32 : i32, i32
  }
}

</mosaic_0001>

<bundles_post_ra>
// kernel: cnn_forward.3
= control target key start
LH: loop header
LB: loop body
LE: loop exit
PB: predicated region body
PF: predicated region fallthrough
CT: control target
= control target key end

     0   :  { %s1768_s12 = smov 0   ;;  %s2242_s0 = inlined_call_operand.vmem [shape: bf16[2,704,9], index: 0, kind: input, shape index: {}]   ;;  %s2243_s1 = inlined_call_operand.vmem [shape: bf16[9,128], index: 1, kind: input, shape index: {}]   ;;  %s2244_s2 = inlined_call_operand.vmem [shape: f32[1,128], index: 2, kind: input, shape index: {}]   ;;  %s2245_s3 = inlined_call_operand.vmem [shape: bf16[2,176,128], index: 3, kind: output, shape index: {}]  }
   0x1 LB: > { %s1338_s13 = sadd.s32 4294967295, %s1745_s12   ;;  %p1342_p0 = scmp.ge.s32.totalorder %s1745_s12, 1  ;;  %s1745_s12 = sphi %s1768_s12, %s13_s12  }
   0x2   : > { %p137_p1 = scmp.lt.s32.totalorder %s1745_s12, 3 }
   0x4   : > { %p138_p2 = pnand %p1342_p0, %p137_p1 }
   0x5   : > { %v1694_v0 = vld [vmem:[%s2243_s1] sm:$0x1f] (!%p138_p2)   ;;  %vm627_vm0 = vcmask (!%p138_p2), 1043456   ;;  %vm628_vm1 = vcmask (!%p138_p2), 1044480   ;;  %p161_p3 = scmp.lt.s32.totalorder (!%p138_p2), %s1338_s13, 1  ;;  %v1747_v1 = vmov (!%p138_p2), 65535  }
   0x6   : > { %141 = sbr.rel (%p138_p2) target bundleno = 335 (0x14f), region = 32  ;;  %v629_v2 = vsel (!%p138_p2), %vm627_vm0, 4294967295, %v1747_v1  ;;  %vm494_vm2 = vcmask (!%p138_p2), 72704  }
   0x7   : > { %v630_v3 = vsel (!%p138_p2), %vm628_vm1, %v629_v2, 0 }
   0x8   : > { %v632_v4 = vand.u32 (!%p138_p2), %v1694_v0, %v630_v3 }
   0xa   : > { %1591 = vmatprep.subr.bf16.mxu0 (!%p138_p2), %v632_v4  ;;  %1681 = vmatprep.subr.bf16.mxu1 (!%p138_p2), %v632_v4 }
   0xb   : > { %1592 = vmatpush3.bf16.msra.mxu0 (!%p138_p2), %v632_v4  ;;  %1682 = vmatpush3.bf16.msra.mxu1 (!%p138_p2), %v632_v4 }
   0xd   : > { %s2277_s13 = smov (!%p161_p3, %s1338_s13), 1 }
   0xe   : > { %s1683_s16 = smul.u32 352, %s2277_s13 }
   0xf   : > { %s1684_s22 = smul.u32 88, %s2277_s13 }
  0x10   : > { %s1785_s19 = scalar_lea.vmem %s2242_s0, %s1683_s16 }
  0x11   : > { %v1695_v5 = vld [vmem:[%s1785_s19] sm:$0xff]   ;;  %v1696_v6 = vld [vmem:[%s1785_s19 + $0xb0] sm:$0xff]   ;;  %v1697_v7 = vld [vmem:[%s1785_s19 + $0x8] sm:$0xff]   ;;  %s2092_s25 = scalar_lea.vmem %s2245_s3, %s1684_s22 }
  0x12   : > { %1593 = vmatprep.mubr.msk.bf16.mxu0 %vm494_vm2, %v1695_v5  ;;  %1637 = vmatprep.mubr.msk.bf16.mxu1 %vm494_vm2, %v1696_v6  ;;  %v1698_v8 = vld [vmem:[%s1785_s19 + $0xb8] sm:$0xff]   ;;  %v1699_v9 = vld [vmem:[%s1785_s19 + $0x10] sm:$0xff]   ;;  %v1700_v10 = vld [vmem:[%s1785_s19 + $0xc0] sm:$0xff]  }
  0x13   : > { %1594 = vmatmul.mubr.msk.bf16.vlgmr.msra.gmra.mrb[0].mxu0 %vm494_vm2, %v1697_v7  ;;  %1638 = vmatmul.mubr.msk.bf16.vlgmr.msra.gmra.mrb[0].mxu1 %vm494_vm2, %v1698_v8  ;;  %v1701_v11 = vld [vmem:[%s1785_s19 + $0x18] sm:$0xff]   ;;  %v1702_v12 = vld [vmem:[%s1785_s19 + $0xc8] sm:$0xff]   ;;  %v1703_v13 = vld [vmem:[%s1785_s19 + $0x20] sm:$0xff]  }
  0x14   : > { %1597 = vmatprep.mubr.msk.bf16.mxu0 %vm494_vm2, %v1699_v9  ;;  %1641 = vmatprep.mubr.msk.bf16.mxu1 %vm494_vm2, %v1700_v10  ;;  %v1704_v14 = vld [vmem:[%s1785_s19 + $0xd0] sm:$0xff]   ;;  %v1705_v15 = vld [vmem:[%s1785_s19 + $0x28] sm:$0xff]   ;;  %v1706_v16 = vld [vmem:[%s1785_s19 + $0xd8] sm:$0xff]  }
  0x15   : > { %v1707_v17 = vld [vmem:[%s1785_s19 + $0x30] sm:$0xff]   ;;  %v1708_v18 = vld [vmem:[%s1785_s19 + $0xe0] sm:$0xff]   ;;  %v1709_v19 = vld [vmem:[%s1785_s19 + $0x38] sm:$0xff]  }
  0x16   : > { %v1710_v20 = vld [vmem:[%s1785_s19 + $0xe8] sm:$0xff]   ;;  %v1711_v21 = vld [vmem:[%s1785_s19 + $0x40] sm:$0xff]   ;;  %v1712_v22 = vld [vmem:[%s1785_s19 + $0xf0] sm:$0xff]  }
  0x17   : > { %v1713_v23 = vld [vmem:[%s1785_s19 + $0x48] sm:$0xff]   ;;  %v1714_v24 = vld [vmem:[%s1785_s19 + $0xf8] sm:$0xff]   ;;  %v1715_v25 = vld [vmem:[%s1785_s19 + $0x50] sm:$0xff]  }
  0x18   : > { %v1716_v26 = vld [vmem:[%s1785_s19 + $0x100] sm:$0xff]   ;;  %v1717_v27 = vld [vmem:[%s1785_s19 + $0x58] sm:$0xff]   ;;  %v1718_v28 = vld [vmem:[%s1785_s19 + $0x108] sm:$0xff]  }
  0x19   : > { %v1719_v29 = vld [vmem:[%s1785_s19 + $0x60] sm:$0xff]   ;;  %v1720_v30 = vld [vmem:[%s1785_s19 + $0x110] sm:$0xff]   ;;  %v1721_v31 = vld [vmem:[%s1785_s19 + $0x68] sm:$0xff]  }
  0x1a   : > { %v1722_v32 = vld [vmem:[%s1785_s19 + $0x118] sm:$0xff]   ;;  %v1723_v33 = vld [vmem:[%s1785_s19 + $0x70] sm:$0xff]   ;;  %v1724_v34 = vld [vmem:[%s1785_s19 + $0x120] sm:$0xff]  }
  0x1b   : > { %1598 = vmatmul.mubr.msk.bf16.gmra.mrb[4].mxu0 %vm494_vm2, %v1701_v11  ;;  %1642 = vmatmul.mubr.msk.bf16.gmra.mrb[4].mxu1 %vm494_vm2, %v1702_v12  ;;  %v1725_v35 = vld [vmem:[%s1785_s19 + $0x78] sm:$0xff]   ;;  %v1726_v36 = vld [vmem:[%s1785_s19 + $0x128] sm:$0xff]   ;;  %v1727_v37 = vld [vmem:[%s1785_s19 + $0x80] sm:$0xff]  }
  0x1c   : > { %1601 = vmatprep.mubr.msk.bf16.mxu0 %vm494_vm2, %v1703_v13  ;;  %1645 = vmatprep.mubr.msk.bf16.mxu1 %vm494_vm2, %v1704_v14  ;;  %v1728_v38 = vld [vmem:[%s1785_s19 + $0x130] sm:$0xff]   ;;  %v1729_v39 = vld [vmem:[%s1785_s19 + $0x88] sm:$0xff]   ;;  %v1730_v40 = vld [vmem:[%s1785_s19 + $0x138] sm:$0xff]  }
  0x1d   : > { %v1731_v41 = vld [vmem:[%s1785_s19 + $0x90] sm:$0xff]   ;;  %v1732_v42 = vld [vmem:[%s1785_s19 + $0x140] sm:$0xff]   ;;  %v1733_v43 = vld [vmem:[%s1785_s19 + $0x98] sm:$0xff]  }
  0x1e   : > { %v1734_v44 = vld [vmem:[%s1785_s19 + $0x148] sm:$0xff]   ;;  %v1735_v45 = vld [vmem:[%s1785_s19 + $0xa0] sm:$0xff]   ;;  %v1736_v46 = vld [vmem:[%s1785_s19 + $0x150] sm:$0xff]  }
  0x1f   : > { %v1737_v47 = vld [vmem:[%s1785_s19 + $0xa8] sm:$0xff]   ;;  %v1738_v48 = vld [vmem:[%s1785_s19 + $0x158] sm:$0xff]   ;;  %v1878_v9 = vld [vmem:[%s2244_s2] ss:$0 sm:$0xff] }
  0x23   : > { %1602 = vmatmul.mubr.msk.bf16.gmra.mrb[8].mxu0 %vm494_vm2, %v1705_v15  ;;  %1646 = vmatmul.mubr.msk.bf16.gmra.mrb[8].mxu1 %vm494_vm2, %v1706_v16 }
  0x24   : > { %1605 = vmatprep.mubr.msk.bf16.mxu0 %vm494_vm2, %v1707_v17  ;;  %1649 = vmatprep.mubr.msk.bf16.mxu1 %vm494_vm2, %v1708_v18 }
  0x2b   : > { %1606 = vmatmul.mubr.msk.bf16.gmra.mrb[12].mxu0 %vm494_vm2, %v1709_v19  ;;  %1650 = vmatmul.mubr.msk.bf16.gmra.mrb[12].mxu1 %vm494_vm2, %v1710_v20 }
  0x2c   : > { %1609 = vmatprep.mubr.msk.bf16.mxu0 %vm494_vm2, %v1711_v21  ;;  %1653 = vmatprep.mubr.msk.bf16.mxu1 %vm494_vm2, %v1712_v22 }
  0x33   : > { %1610 = vmatmul.mubr.msk.bf16.gmra.mrb[16].mxu0 %vm494_vm2, %v1713_v23  ;;  %1654 = vmatmul.mubr.msk.bf16.gmra.mrb[16].mxu1 %vm494_vm2, %v1714_v24 }
  0x34   : > { %1613 = vmatprep.mubr.msk.bf16.mxu0 %vm494_vm2, %v1715_v25  ;;  %1657 = vmatprep.mubr.msk.bf16.mxu1 %vm494_vm2, %v1716_v26 }
  0x3b   : > { %1614 = vmatmul.mubr.msk.bf16.gmra.mrb[20].mxu0 %vm494_vm2, %v1717_v27  ;;  %1658 = vmatmul.mubr.msk.bf16.gmra.mrb[20].mxu1 %vm494_vm2, %v1718_v28 }
  0x3c   : > { %1617 = vmatprep.mubr.msk.bf16.mxu0 %vm494_vm2, %v1719_v29  ;;  %1661 = vmatprep.mubr.msk.bf16.mxu1 %vm494_vm2, %v1720_v30 }
  0x43   : > { %1618 = vmatmul.mubr.msk.bf16.gmra.mrb[24].mxu0 %vm494_vm2, %v1721_v31  ;;  %1662 = vmatmul.mubr.msk.bf16.gmra.mrb[24].mxu1 %vm494_vm2, %v1722_v32 }
  0x44   : > { %1621 = vmatprep.mubr.msk.bf16.mxu0 %vm494_vm2, %v1723_v33  ;;  %1665 = vmatprep.mubr.msk.bf16.mxu1 %vm494_vm2, %v1724_v34 }
  0x4b   : > { %1622 = vmatmul.mubr.msk.bf16.gmra.mrb[28].mxu0 %vm494_vm2, %v1725_v35  ;;  %1666 = vmatmul.mubr.msk.bf16.gmra.mrb[28].mxu1 %vm494_vm2, %v1726_v36 }
  0x4c   : > { %1625 = vmatprep.mubr.msk.bf16.mxu0 %vm494_vm2, %v1727_v37  ;;  %1669 = vmatprep.mubr.msk.bf16.mxu1 %vm494_vm2, %v1728_v38 }
  0x53   : > { %1626 = vmatmul.mubr.msk.bf16.gmra.mrb[32].mxu0 %vm494_vm2, %v1729_v39  ;;  %1670 = vmatmul.mubr.msk.bf16.gmra.mrb[32].mxu1 %vm494_vm2, %v1730_v40 }
  0x54   : > { %1629 = vmatprep.mubr.msk.bf16.mxu0 %vm494_vm2, %v1731_v41  ;;  %1673 = vmatprep.mubr.msk.bf16.mxu1 %vm494_vm2, %v1732_v42 }
  0x5b   : > { %1630 = vmatmul.mubr.msk.bf16.gmra.mrb[36].mxu0 %vm494_vm2, %v1733_v43  ;;  %1674 = vmatmul.mubr.msk.bf16.gmra.mrb[36].mxu1 %vm494_vm2, %v1734_v44 }
  0x5c   : > { %1633 = vmatprep.mubr.msk.bf16.mxu0 %vm494_vm2, %v1735_v45  ;;  %1677 = vmatprep.mubr.msk.bf16.mxu1 %vm494_vm2, %v1736_v46 }
  0x63   : > { %1634 = vmatmul.mubr.msk.bf16.gmra.mrb[40].mxu0 %vm494_vm2, %v1737_v47  ;;  %1678 = vmatmul.mubr.msk.bf16.gmra.mrb[40].mxu1 %vm494_vm2, %v1738_v48 }
  0xe6   : > { %v1595_v49 = vpop.f32.mrb[0].mxu0  ;;  %v1639_v50 = vpop.f32.mrb[0].mxu1 }
  0xe7   : > { %v668_v51 = vpop.f32.mrb[1].mxu0  ;;  %v844_v52 = vpop.f32.mrb[1].mxu1  ;;  %v1883_v13 = vadd.f32 %v1595_v49, %v1878_v9  ;;  %v1888_v16 = vadd.f32 %v1639_v50, %v1878_v9 }
  0xe8   : > { %v1596_v53 = vpop.f32.mrb[2].mxu0  ;;  %v1640_v54 = vpop.f32.mrb[2].mxu1  ;;  %v1891_v17 = vadd.f32 %v1878_v9, %v668_v51  ;;  %v1894_v18 = vadd.f32 %v1878_v9, %v844_v52 }
  0xe9   : > { %v671_v55 = vpop.f32.mrb[3].mxu0  ;;  %v847_v56 = vpop.f32.mrb[3].mxu1  ;;  %v1897_v19 = vadd.f32 %v1596_v53, %v1878_v9  ;;  %v1904_v22 = vadd.f32 %v1640_v54, %v1878_v9 }
  0xea   : > { %v1907_v23 = vadd.f32 %v1878_v9, %v671_v55  ;;  %v1912_v25 = vadd.f32 %v1878_v9, %v847_v56  ;;  %v1019_v30 = vmax.f32 %v1891_v17, 0.0  ;;  %v1063_v31 = vmax.f32 %v1894_v18, 0.0 }
  0xec   : > { %v1020_v34 = vmax.f32 %v1907_v23, 0.0  ;;  %v1064_v38 = vmax.f32 %v1912_v25, 0.0 }
  0xee   : > { %v1599_v57 = vpop.f32.mrb[4].mxu0  ;;  %v1643_v58 = vpop.f32.mrb[4].mxu1 }
  0xef   : > { %v684_v59 = vpop.f32.mrb[5].mxu0  ;;  %v860_v60 = vpop.f32.mrb[5].mxu1  ;;  %v1915_v26 = vadd.f32 %v1599_v57, %v1878_v9  ;;  %v1919_v28 = vadd.f32 %v1643_v58, %v1878_v9 }
  0xf0   : > { %v1600_v61 = vpop.f32.mrb[6].mxu0  ;;  %v1644_v62 = vpop.f32.mrb[6].mxu1  ;;  %v1928_v35 = vadd.f32 %v1878_v9, %v684_v59  ;;  %v1931_v36 = vadd.f32 %v1878_v9, %v860_v60 }
  0xf1   : > { %v687_v63 = vpop.f32.mrb[7].mxu0  ;;  %v863_v0 = vpop.f32.mrb[7].mxu1  ;;  %v1936_v40 = vadd.f32 %v1600_v61, %v1878_v9  ;;  %v1939_v41 = vadd.f32 %v1644_v62, %v1878_v9 }
  0xf2   : > { %v1943_v45 = vadd.f32 %v1878_v9, %v687_v63  ;;  %v1946_v46 = vadd.f32 %v1878_v9, %v863_v0  ;;  %v1023_v56 = vmax.f32 %v1928_v35, 0.0 }
  0xf6   : > { %v1603_v1 = vpop.f32.mrb[8].mxu0  ;;  %v1647_v2 = vpop.f32.mrb[8].mxu1 }
  0xf7   : > { %v700_v3 = vpop.f32.mrb[9].mxu0  ;;  %v876_v4 = vpop.f32.mrb[9].mxu1  ;;  %v1949_v47 = vadd.f32 %v1603_v1, %v1878_v9  ;;  %v1956_v50 = vadd.f32 %v1647_v2, %v1878_v9 }
  0xf8   : > { %v1604_v5 = vpop.f32.mrb[10].mxu0  ;;  %v1648_v6 = vpop.f32.mrb[10].mxu1  ;;  %v1959_v51 = vadd.f32 %v1878_v9, %v700_v3  ;;  %v1962_v52 = vadd.f32 %v1878_v9, %v876_v4 }
  0xf9   : > { %v703_v7 = vpop.f32.mrb[11].mxu0  ;;  %v879_v8 = vpop.f32.mrb[11].mxu1  ;;  %v1965_v53 = vadd.f32 %v1604_v5, %v1878_v9  ;;  %v1974_v58 = vadd.f32 %v1648_v6, %v1878_v9 }
  0xfa   : > { %v1977_v59 = vadd.f32 %v1878_v9, %v703_v7  ;;  %v1984_v63 = vadd.f32 %v1878_v9, %v879_v8 }
  0xfe   : > { %v1607_v10 = vpop.f32.mrb[12].mxu0  ;;  %v1651_v11 = vpop.f32.mrb[12].mxu1 }
  0xff   : > { %v1880_v12 = vpop.f32.mrb[13].mxu0  ;;  %v892_v14 = vpop.f32.mrb[13].mxu1  ;;  %v1987_v0 = vadd.f32 %v1607_v10, %v1878_v9  ;;  %v1993_v4 = vadd.f32 %v1651_v11, %v1878_v9 }
 0x100   : > { %v1885_v15 = vpop.f32.mrb[14].mxu0  ;;  %v1899_v20 = vpop.f32.mrb[14].mxu1  ;;  %v2003_v61 = vadd.f32 %v1878_v9, %v1880_v12  ;;  %v2006_v3 = vadd.f32 %v1878_v9, %v892_v14 }
 0x101   : > { %v1901_v21 = vpop.f32.mrb[15].mxu0  ;;  %v1909_v24 = vpop.f32.mrb[15].mxu1  ;;  %v2012_v39 = vadd.f32 %v1885_v15, %v1878_v9  ;;  %v2020_v14 = vadd.f32 %v1899_v20, %v1878_v9 }
 0x102   : > { %v2024_v5 = vadd.f32 %v1878_v9, %v1901_v21 }
 0x106   : > { %v1611_v37 = vpop.f32.mrb[16].mxu0  ;;  %v1655_v42 = vpop.f32.mrb[16].mxu1 }
 0x107   : > { %v732_v43 = vpop.f32.mrb[17].mxu0  ;;  %v1951_v48 = vpop.f32.mrb[17].mxu1  ;;  %v2034_v6 = vadd.f32 %v1611_v37, %v1878_v9 }
 0x108   : > { %v1953_v49 = vpop.f32.mrb[18].mxu0  ;;  %v1967_v54 = vpop.f32.mrb[18].mxu1  ;;  %v2048_v37 = vadd.f32 %v1878_v9, %v732_v43  ;;  %v2064_v17 = vadd.f32 %v1878_v9, %v1951_v48 }
 0x109   : > { %v1969_v55 = vpop.f32.mrb[19].mxu0  ;;  %v1979_v60 = vpop.f32.mrb[19].mxu1  ;;  %v2076_v23 = vadd.f32 %v1967_v54, %v1878_v9 }
 0x10e   : > { %v1615_v11 = vpop.f32.mrb[20].mxu0  ;;  %v1659_v8 = vpop.f32.mrb[20].mxu1 }
 0x10f   : > { %v757_v10 = vadd.f32 %v1615_v11, %v1878_v9  ;;  %v2015_v62 = vpop.f32.mrb[21].mxu0  ;;  %v933_v44 = vadd.f32 %v1659_v8, %v1878_v9  ;;  %v2027_v7 = vpop.f32.mrb[21].mxu1  ;;  %v2031_v11 = vadd.f32 %v1878_v9, %v1909_v24  ;;  %v2045_v24 = vadd.f32 %v1655_v42, %v1878_v9 }
 0x110   : > { %v1616_v15 = vpop.f32.mrb[22].mxu0  ;;  %v1660_v33 = vpop.f32.mrb[22].mxu1 }
 0x111   : > { %v1041_v12 = vmax.f32 %v757_v10, 0.0  ;;  %v760_v20 = vadd.f32 %v1616_v15, %v1878_v9  ;;  %v2037_v32 = vpop.f32.mrb[23].mxu0  ;;  %v1085_v2 = vmax.f32 %v933_v44, 0.0  ;;  %v936_v1 = vadd.f32 %v1660_v33, %v1878_v9  ;;  %v2042_v29 = vpop.f32.mrb[23].mxu1 }
 0x113   : > { %v1107_v10 = vmax.f32 %v1019_v30, %v1041_v12  ;;  %v1042_v15 = vmax.f32 %v760_v20, 0.0  ;;  %v1129_v44 = vmax.f32 %v1063_v31, %v1085_v2  ;;  %v1086_v33 = vmax.f32 %v936_v1, 0.0 }
 0x114   : > { %v2068_v30 = vadd.f32 %v1953_v49, %v1878_v9  ;;  %v2081_v49 = vadd.f32 %v1878_v9, %v1969_v55 }
 0x115   : > { %v1108_v43 = vmax.f32 %v1020_v34, %v1042_v15  ;;  %v1151_v18 = vmax.f32 %v1107_v10, %v1129_v44  ;;  %v1130_v31 = vmax.f32 %v1064_v38, %v1086_v33  ;;  %v2087_v33 = vadd.f32 %v1878_v9, %v1979_v60 }
 0x116   : > { %v1619_v1 = vpop.f32.mrb[24].mxu0  ;;  %v1663_v48 = vpop.f32.mrb[24].mxu1 }
 0x117   : > { %v773_v34 = vadd.f32 %v1619_v1, %v1878_v9  ;;  %v764_v20 = vpop.f32.mrb[25].mxu0  ;;  %v1152_v10 = vmax.f32 %v1108_v43, %v1130_v31  ;;  %v949_v25 = vadd.f32 %v1663_v48, %v1878_v9  ;;  %v940_v15 = vpop.f32.mrb[25].mxu1 }
 0x118   : > { %v765_v38 = vadd.f32 %v1878_v9, %v764_v20  ;;  %v1620_v44 = vpop.f32.mrb[26].mxu0  ;;  %v941_v55 = vadd.f32 %v1878_v9, %v940_v15  ;;  %v1664_v31 = vpop.f32.mrb[26].mxu1 }
 0x119   : > { %v1045_v54 = vmax.f32 %v773_v34, 0.0  ;;  %v776_v43 = vadd.f32 %v1620_v44, %v1878_v9  ;;  %v767_v1 = vpop.f32.mrb[27].mxu0  ;;  %v1484_v48 = vpack.c.bf16 %v1152_v10, %v1151_v18  ;;  %v1089_v20 = vmax.f32 %v949_v25, 0.0  ;;  %v943_v60 = vpop.f32.mrb[27].mxu1 }
 0x11a   : > { %v1043_v2 = vmax.f32 %v765_v38, 0.0  ;;  %v952_v57 = vadd.f32 %v1664_v31, %v1878_v9  ;;  %v1087_v21 = vmax.f32 %v941_v55, 0.0  ;;  %v768_v42 = vadd.f32 %v1878_v9, %v767_v1 }
 0x11b   : > { %v1111_v8 = vmax.f32 %v1023_v56, %v1045_v54  ;;  %v1046_v12 = vmax.f32 %v776_v43, 0.0  ;;  %1485 = vst [vmem:[%s2092_s25] sm:$0xff] %v1484_v48   ;;  %v2246_v34 = vmax.f32 %v1931_v36, 0.0  ;;  %v2247_v44 = vmax.f32 %v1883_v13, 0.0 }
 0x11c   : > { %v1090_v18 = vmax.f32 %v952_v57, 0.0  ;;  %v944_v10 = vadd.f32 %v1878_v9, %v943_v60  ;;  %v1079_v25 = vmax.f32 %v2064_v17, 0.0  ;;  %v2248_v38 = vmax.f32 %v1888_v16, 0.0 }
 0x11d   : > { %v1133_v15 = vmax.f32 %v2246_v34, %v1089_v20  ;;  %v1109_v27 = vmax.f32 %v2247_v44, %v1043_v2  ;;  %v2249_v56 = vmax.f32 %v1943_v45, 0.0  ;;  %v1044_v55 = vmax.f32 %v768_v42, 0.0 }
 0x11e   : > { %v1131_v35 = vmax.f32 %v2248_v38, %v1087_v21  ;;  %v1036_v43 = vmax.f32 %v2081_v49, 0.0  ;;  %v2250_v36 = vmax.f32 %v1946_v46, 0.0  ;;  %v1088_v13 = vmax.f32 %v944_v10, 0.0  ;;  %v1623_v2 = vpop.f32.mrb[28].mxu0  ;;  %v1667_v21 = vpop.f32.mrb[28].mxu1 }
 0x11f   : > { %v1112_v54 = vmax.f32 %v2249_v56, %v1046_v12  ;;  %v1155_v31 = vmax.f32 %v1111_v8, %v1133_v15  ;;  %v1080_v57 = vmax.f32 %v2087_v33, 0.0  ;;  %v2251_v20 = vmax.f32 %v1897_v19, 0.0  ;;  %v780_v45 = vpop.f32.mrb[29].mxu0  ;;  %v956_v15 = vpop.f32.mrb[29].mxu1 }
 0x120   : > { %v1134_v1 = vmax.f32 %v2250_v36, %v1090_v18  ;;  %v1153_v48 = vmax.f32 %v1109_v27, %v1131_v35  ;;  %v789_v16 = vadd.f32 %v1623_v2, %v1878_v9  ;;  %v2252_v42 = vmax.f32 %v1904_v22, 0.0  ;;  %v1624_v44 = vpop.f32.mrb[30].mxu0  ;;  %v1668_v38 = vpop.f32.mrb[30].mxu1 }
 0x121   : > { %v1110_v60 = vmax.f32 %v2251_v20, %v1044_v55  ;;  %v965_v8 = vadd.f32 %v1667_v21, %v1878_v9  ;;  %v781_v46 = vadd.f32 %v1878_v9, %v780_v45  ;;  %v2124_v27 = vadd.f32 %v1878_v9, %v2015_v62  ;;  %v783_v35 = vpop.f32.mrb[31].mxu0  ;;  %v959_v36 = vpop.f32.mrb[31].mxu1 }
 0x122   : > { %v1156_v12 = vmax.f32 %v1112_v54, %v1134_v1  ;;  %v1132_v34 = vmax.f32 %v2252_v42, %v1088_v13  ;;  %v1049_v19 = vmax.f32 %v789_v16, 0.0  ;;  %v957_v18 = vadd.f32 %v1878_v9, %v956_v15 }
 0x123   : > { %v792_v10 = vadd.f32 %v1624_v44, %v1878_v9  ;;  %v1093_v54 = vmax.f32 %v965_v8, 0.0  ;;  %v1047_v55 = vmax.f32 %v781_v46, 0.0  ;;  %v2253_v1 = vmax.f32 %v1959_v51, 0.0 }
 0x124   : > { %v1494_v22 = vpack.c.bf16 %v1156_v12, %v1155_v31  ;;  %v1154_v56 = vmax.f32 %v1110_v60, %v1132_v34  ;;  %v1091_v2 = vmax.f32 %v957_v18, 0.0  ;;  %v968_v62 = vadd.f32 %v1668_v38, %v1878_v9 }
 0x125   : > { %v1115_v13 = vmax.f32 %v2253_v1, %v1049_v19  ;;  %v1050_v20 = vmax.f32 %v792_v10, 0.0  ;;  %v2254_v21 = vmax.f32 %v1962_v52, 0.0  ;;  %v2255_v42 = vmax.f32 %v1915_v26, 0.0 }
 0x126   : > { %1537 = vst [vmem:[%s2092_s25 + $0x10] sm:$0xff] %v1494_v22   ;;  %v1489_v16 = vpack.c.bf16 %v1154_v56, %v1153_v48  ;;  %v784_v60 = vadd.f32 %v1878_v9, %v783_v35  ;;  %v2256_v12 = vmax.f32 %v1919_v28, 0.0  ;;  %v2257_v51 = vmax.f32 %v1977_v59, 0.0  ;;  %v1627_v19 = vpop.f32.mrb[32].mxu0  ;;  %v1671_v35 = vpop.f32.mrb[32].mxu1 }
 0x127   : > { %v1137_v45 = vmax.f32 %v2254_v21, %v1093_v54  ;;  %v1113_v31 = vmax.f32 %v2255_v42, %v1047_v55  ;;  %v1094_v46 = vmax.f32 %v968_v62, 0.0  ;;  %v960_v15 = vadd.f32 %v1878_v9, %v959_v36  ;;  %v796_v22 = vpop.f32.mrb[33].mxu0  ;;  %v972_v1 = vpop.f32.mrb[33].mxu1 }
 0x128   : > { %v1135_v34 = vmax.f32 %v2256_v12, %v1091_v2  ;;  %v1116_v8 = vmax.f32 %v2257_v51, %v1050_v20  ;;  %v1039_v44 = vmax.f32 %v2124_v27, 0.0  ;;  %v2145_v52 = vadd.f32 %v1878_v9, %v2027_v7  ;;  %1536 = vst [vmem:[%s2092_s25 + $0x8] sm:$0xff] %v1489_v16   ;;  %v1672_v21 = vpop.f32.mrb[34].mxu1 }
 0x129   : > { %v1159_v26 = vmax.f32 %v1115_v13, %v1137_v45  ;;  %v1048_v48 = vmax.f32 %v784_v60, 0.0  ;;  %v2258_v28 = vmax.f32 %v1984_v63, 0.0  ;;  %v1092_v38 = vmax.f32 %v960_v15, 0.0  ;;  %v1628_v13 = vpop.f32.mrb[34].mxu0  ;;  %v975_v60 = vpop.f32.mrb[35].mxu1 }
 0x12a   : > { %v1157_v18 = vmax.f32 %v1113_v31, %v1135_v34  ;;  %v805_v59 = vadd.f32 %v1627_v19, %v1878_v9  ;;  %v2153_v56 = vadd.f32 %v1878_v9, %v2037_v32  ;;  %v2259_v7 = vmax.f32 %v1936_v40, 0.0  ;;  %v799_v32 = vpop.f32.mrb[35].mxu0 }
 0x12b   : > { %v1138_v10 = vmax.f32 %v2258_v28, %v1094_v46  ;;  %v981_v55 = vadd.f32 %v1671_v35, %v1878_v9  ;;  %v797_v36 = vadd.f32 %v1878_v9, %v796_v22  ;;  %v2260_v2 = vmax.f32 %v1939_v41, 0.0 }
 0x12c   : > { %v1114_v54 = vmax.f32 %v2259_v7, %v1048_v48  ;;  %v1053_v62 = vmax.f32 %v805_v59, 0.0  ;;  %v973_v16 = vadd.f32 %v1878_v9, %v972_v1  ;;  %v808_v40 = vadd.f32 %v1628_v13, %v1878_v9 }
 0x12d   : > { %v1160_v63 = vmax.f32 %v1116_v8, %v1138_v10  ;;  %v1136_v20 = vmax.f32 %v2260_v2, %v1092_v38  ;;  %v1097_v45 = vmax.f32 %v981_v55, 0.0  ;;  %v1051_v42 = vmax.f32 %v797_v36, 0.0 }
 0x12e   : > { %v984_v31 = vadd.f32 %v1672_v21, %v1878_v9  ;;  %v2261_v51 = vmax.f32 %v2003_v61, 0.0  ;;  %v1095_v41 = vmax.f32 %v973_v16, 0.0  ;;  %v2262_v46 = vmax.f32 %v2006_v3, 0.0  ;;  %v1631_v36 = vpop.f32.mrb[36].mxu0 }
 0x12f   : > { %v1504_v12 = vpack.c.bf16 %v1160_v63, %v1159_v26  ;;  %v1158_v34 = vmax.f32 %v1114_v54, %v1136_v20  ;;  %v2263_v48 = vmax.f32 %v1949_v47, 0.0  ;;  %v1054_v28 = vmax.f32 %v808_v40, 0.0  ;;  %v1675_v63 = vpop.f32.mrb[36].mxu1  ;;  %v812_v2 = vpop.f32.mrb[37].mxu0 }
 0x130   : > { %v1119_v8 = vmax.f32 %v2261_v51, %v1053_v62  ;;  %v1141_v15 = vmax.f32 %v2262_v46, %v1097_v45  ;;  %v1098_v10 = vmax.f32 %v984_v31, 0.0  ;;  %v2264_v59 = vmax.f32 %v1956_v50, 0.0  ;;  %v1632_v21 = vpop.f32.mrb[38].mxu0 }
 0x131   : > { %v1117_v19 = vmax.f32 %v2263_v48, %v1051_v42  ;;  %1539 = vst [vmem:[%s2092_s25 + $0x20] sm:$0xff] %v1504_v12   ;;  %v1499_v38 = vpack.c.bf16 %v1158_v34, %v1157_v18  ;;  %v800_v26 = vadd.f32 %v1878_v9, %v799_v32  ;;  %v976_v61 = vadd.f32 %v1878_v9, %v975_v60 }
 0x132   : > { %v1139_v35 = vmax.f32 %v2264_v59, %v1095_v41  ;;  %v1083_v22 = vmax.f32 %v2145_v52, 0.0  ;;  %v1163_v7 = vmax.f32 %v1119_v8, %v1141_v15  ;;  %v2265_v3 = vmax.f32 %v2024_v5, 0.0 }
 0x133   : > { %v2266_v47 = vmax.f32 %v2031_v11, 0.0  ;;  %1538 = vst [vmem:[%s2092_s25 + $0x18] sm:$0xff] %v1499_v38   ;;  %v1052_v18 = vmax.f32 %v800_v26, 0.0  ;;  %v1096_v13 = vmax.f32 %v976_v61, 0.0  ;;  %v821_v50 = vadd.f32 %v1631_v36, %v1878_v9  ;;  %v988_v11 = vpop.f32.mrb[37].mxu1 }
 0x134   : > { %v1120_v54 = vmax.f32 %v2265_v3, %v1054_v28  ;;  %v1161_v1 = vmax.f32 %v1117_v19, %v1139_v35  ;;  %v2184_v20 = vadd.f32 %v1878_v9, %v2042_v29  ;;  %v997_v5 = vadd.f32 %v1675_v63, %v1878_v9  ;;  %v1676_v12 = vpop.f32.mrb[38].mxu1  ;;  %v815_v29 = vpop.f32.mrb[39].mxu0 }
 0x135   : > { %v1142_v55 = vmax.f32 %v2266_v47, %v1098_v10  ;;  %v813_v16 = vadd.f32 %v1878_v9, %v812_v2  ;;  %v2267_v32 = vmax.f32 %v1965_v53, 0.0  ;;  %v2268_v42 = vmax.f32 %v1974_v58, 0.0  ;;  %v991_v46 = vpop.f32.mrb[39].mxu1 }
 0x136   : > { %v1057_v31 = vmax.f32 %v821_v50, 0.0  ;;  %v989_v60 = vadd.f32 %v1878_v9, %v988_v11  ;;  %v1101_v51 = vmax.f32 %v997_v5, 0.0  ;;  %v824_v41 = vadd.f32 %v1632_v21, %v1878_v9 }
 0x137   : > { %v1164_v62 = vmax.f32 %v1120_v54, %v1142_v55  ;;  %v1118_v45 = vmax.f32 %v2267_v32, %v1052_v18  ;;  %v1140_v40 = vmax.f32 %v2268_v42, %v1096_v13  ;;  %v1055_v8 = vmax.f32 %v813_v16, 0.0  ;;  %v1635_v55 = vpop.f32.mrb[40].mxu0  ;;  %v1679_v18 = vpop.f32.mrb[40].mxu1 }
 0x138   : > { %v2269_v48 = vmax.f32 %v2048_v37, 0.0  ;;  %v1099_v19 = vmax.f32 %v989_v60, 0.0  ;;  %v1000_v58 = vadd.f32 %v1676_v12, %v1878_v9  ;;  %v1145_v28 = vmax.f32 %v1079_v25, %v1101_v51  ;;  %v828_v13 = vpop.f32.mrb[41].mxu0  ;;  %v1004_v2 = vpop.f32.mrb[41].mxu1 }
 0x139   : > { %v1514_v34 = vpack.c.bf16 %v1164_v62, %v1163_v7  ;;  %v1162_v15 = vmax.f32 %v1118_v45, %v1140_v40  ;;  %v2270_v10 = vmax.f32 %v1987_v0, 0.0  ;;  %v1058_v59 = vmax.f32 %v824_v41, 0.0  ;;  %v1636_v62 = vpop.f32.mrb[42].mxu0  ;;  %v1680_v21 = vpop.f32.mrb[42].mxu1 }
 0x13a   : > { %v1123_v53 = vmax.f32 %v2269_v48, %v1057_v31  ;;  %v816_v35 = vadd.f32 %v1878_v9, %v815_v29  ;;  %v2271_v61 = vmax.f32 %v1993_v4, 0.0  ;;  %v1102_v37 = vmax.f32 %v1000_v58, 0.0  ;;  %v831_v32 = vpop.f32.mrb[43].mxu0  ;;  %v1007_v40 = vpop.f32.mrb[43].mxu1 }
 0x13b   : > { %1541 = vst [vmem:[%s2092_s25 + $0x30] sm:$0xff] %v1514_v34   ;;  %v1121_v38 = vmax.f32 %v2270_v10, %v1055_v8  ;;  %v1509_v26 = vpack.c.bf16 %v1162_v15, %v1161_v1  ;;  %v992_v3 = vadd.f32 %v1878_v9, %v991_v46  ;;  %v1040_v54 = vmax.f32 %v2153_v56, 0.0 }
 0x13c   : > { %v1143_v7 = vmax.f32 %v2271_v61, %v1099_v19  ;;  %v1167_v47 = vmax.f32 %v1123_v53, %v1145_v28  ;;  %v1124_v17 = vmax.f32 %v1036_v43, %v1058_v59  ;;  %v1056_v25 = vmax.f32 %v816_v35, 0.0 }
 0x13d   : > { %1540 = vst [vmem:[%s2092_s25 + $0x28] sm:$0xff] %v1509_v26   ;;  %v1146_v36 = vmax.f32 %v1080_v57, %v1102_v37  ;;  %v1100_v1 = vmax.f32 %v992_v3, 0.0  ;;  %v837_v4 = vadd.f32 %v1635_v55, %v1878_v9  ;;  %v1084_v50 = vmax.f32 %v2184_v20, 0.0 }
 0x13e   : > { %v1165_v0 = vmax.f32 %v1121_v38, %v1143_v7  ;;  %v2272_v56 = vmax.f32 %v2012_v39, 0.0  ;;  %v1013_v49 = vadd.f32 %v1679_v18, %v1878_v9  ;;  %v829_v43 = vadd.f32 %v1878_v9, %v828_v13 }
 0x13f   : > { %v1168_v5 = vmax.f32 %v1124_v17, %v1146_v36  ;;  %v2273_v33 = vmax.f32 %v2020_v14, 0.0  ;;  %v1061_v16 = vmax.f32 %v837_v4, 0.0  ;;  %v1005_v11 = vadd.f32 %v1878_v9, %v1004_v2 }
 0x140   : > { %v1122_v63 = vmax.f32 %v2272_v56, %v1056_v25  ;;  %v1105_v20 = vmax.f32 %v1013_v49, 0.0  ;;  %v1059_v45 = vmax.f32 %v829_v43, 0.0  ;;  %v840_v39 = vadd.f32 %v1636_v62, %v1878_v9 }
 0x141   : > { %v1144_v57 = vmax.f32 %v2273_v33, %v1100_v1  ;;  %v1016_v42 = vadd.f32 %v1680_v21, %v1878_v9  ;;  %v1524_v31 = vpack.c.bf16 %v1168_v5, %v1167_v47  ;;  %v1127_v12 = vmax.f32 %v1039_v44, %v1061_v16 }
 0x142   : > { %v1103_v14 = vmax.f32 %v1005_v11, 0.0  ;;  %v1149_v29 = vmax.f32 %v1083_v22, %v1105_v20  ;;  %v2274_v34 = vmax.f32 %v2034_v6, 0.0  ;;  %v1062_v8 = vmax.f32 %v840_v39, 0.0 }
 0x143   : > { %v1166_v60 = vmax.f32 %v1122_v63, %v1144_v57  ;;  %v1106_v41 = vmax.f32 %v1016_v42, 0.0  ;;  %1543 = vst [vmem:[%s2092_s25 + $0x40] sm:$0xff] %v1524_v31   ;;  %v2275_v15 = vmax.f32 %v2045_v24, 0.0  ;;  %v832_v53 = vadd.f32 %v1878_v9, %v831_v32 }
 0x144   : > { %v1125_v51 = vmax.f32 %v2274_v34, %v1059_v45  ;;  %v1008_v27 = vadd.f32 %v1878_v9, %v1007_v40  ;;  %v1038_v44 = vmax.f32 %v2068_v30, 0.0  ;;  %v1171_v52 = vmax.f32 %v1127_v12, %v1149_v29 }
 0x145   : > { %v1519_v46 = vpack.c.bf16 %v1166_v60, %v1165_v0  ;;  %v1147_v48 = vmax.f32 %v2275_v15, %v1103_v14  ;;  %v1128_v22 = vmax.f32 %v1040_v54, %v1062_v8  ;;  %v1150_v19 = vmax.f32 %v1084_v50, %v1106_v41 }
 0x146   : > { %v1082_v6 = vmax.f32 %v2076_v23, 0.0  ;;  %v1060_v28 = vmax.f32 %v832_v53, 0.0  ;;  %v1104_v10 = vmax.f32 %v1008_v27, 0.0 }
 0x147   : > { %1542 = vst [vmem:[%s2092_s25 + $0x38] sm:$0xff] %v1519_v46   ;;  %v1169_v58 = vmax.f32 %v1125_v51, %v1147_v48  ;;  %v1172_v38 = vmax.f32 %v1128_v22, %v1150_v19 }
 0x148   : > { %v1126_v24 = vmax.f32 %v1038_v44, %v1060_v28  ;;  %v1148_v59 = vmax.f32 %v1082_v6, %v1104_v10 }
 0x149   : > { %v1534_v35 = vpack.c.bf16 %v1172_v38, %v1171_v52 }
 0x14a   : > { %v1170_v26 = vmax.f32 %v1126_v24, %v1148_v59 }
 0x14b   : > { %1545 = vst [vmem:[%s2092_s25 + $0x50] sm:$0xff] %v1534_v35  }
 0x14c   : > { %v1529_v61 = vpack.c.bf16 %v1170_v26, %v1169_v58 }
 0x14e   : > { %1544 = vst [vmem:[%s2092_s25 + $0x48] sm:$0xff] %v1529_v61  }
 0x14f PF: > { %s13_s12 = sadd.s32 1, %s1745_s12  }
 0x150   : > { %p10_p4 = scmp.ge.s32.totalorder %s13_s12, 4  }
 0x152   :  { %12 = sbr.rel (!%p10_p4) target bundleno = 1 (0x1), region = 62 }

// kernel: cnn_forward.4
= control target key start
LH: loop header
LB: loop body
LE: loop exit
PB: predicated region body
PF: predicated region fallthrough
CT: control target
= control target key end

     0   :  { %s4549_s12 = smov 0   ;;  %s5349_s0 = inlined_call_operand.vmem [shape: bf16[2,64,3200], index: 0, kind: input, shape index: {}]   ;;  %s5350_s1 = inlined_call_operand.vmem [shape: bf16[3200,128], index: 1, kind: input, shape index: {}]   ;;  %s5351_s2 = inlined_call_operand.vmem [shape: f32[1,128], index: 2, kind: input, shape index: {}]   ;;  %s5352_s3 = inlined_call_operand.vmem [shape: bf16[2,16,128], index: 3, kind: output, shape index: {}]  }
   0x1 LB: > { %s3311_s13 = sadd.s32 4294967295, %s4527_s12   ;;  %p3315_p0 = scmp.ge.s32.totalorder %s4527_s12, 1  ;;  %s4527_s12 = sphi %s4549_s12, %s13_s12  }
   0x2   : > { %p137_p1 = scmp.lt.s32.totalorder %s4527_s12, 3 }
   0x4   : > { %p138_p2 = pnand %p3315_p0, %p137_p1 }
   0x5   : > { %v4173_v0 = vld [vmem:[%s5350_s1 + $0x40] sm:$0xff] (!%p138_p2)   ;;  %v4177_v4 = vld [vmem:[%s5350_s1 + $0x48] sm:$0xff] (!%p138_p2)   ;;  %v4181_v8 = vld [vmem:[%s5350_s1 + $0x50] sm:$0xff] (!%p138_p2)   ;;  %p161_p3 = scmp.lt.s32.totalorder (!%p138_p2), %s3311_s13, 1 }
   0x6   : > { %141 = sbr.rel (%p138_p2) target bundleno = 481 (0x1e1), region = 32  ;;  %v4174_v1 = vld [vmem:[%s5350_s1 + $0xc0] sm:$0xff] (!%p138_p2)   ;;  %3632 = vmatprep.subr.bf16.mxu0 (!%p138_p2), %v4173_v0  ;;  %v4178_v5 = vld [vmem:[%s5350_s1 + $0xc8] sm:$0xff] (!%p138_p2)   ;;  %v4182_v9 = vld [vmem:[%s5350_s1 + $0xd0] sm:$0xff] (!%p138_p2)  }
   0x7   : > { %v4175_v2 = vld [vmem:[%s5350_s1] sm:$0xff] (!%p138_p2)   ;;  %3672 = vmatprep.subr.bf16.mxu1 (!%p138_p2), %v4174_v1  ;;  %v4179_v6 = vld [vmem:[%s5350_s1 + $0x8] sm:$0xff] (!%p138_p2)   ;;  %v4183_v10 = vld [vmem:[%s5350_s1 + $0x10] sm:$0xff] (!%p138_p2)  }
   0x8   : > { %v4176_v3 = vld [vmem:[%s5350_s1 + $0x80] sm:$0xff] (!%p138_p2)   ;;  %3633 = vmatpush3.bf16.msra.mxu0 (!%p138_p2), %v4175_v2  ;;  %v4180_v7 = vld [vmem:[%s5350_s1 + $0x88] sm:$0xff] (!%p138_p2)   ;;  %v4184_v11 = vld [vmem:[%s5350_s1 + $0x90] sm:$0xff] (!%p138_p2)  }
   0x9   : > { %3673 = vmatpush3.bf16.msra.mxu1 (!%p138_p2), %v4176_v3  ;;  %3634 = vmatprep.subr.bf16.mxu0 (!%p138_p2), %v4177_v4  ;;  %v4185_v12 = vld [vmem:[%s5350_s1 + $0x58] sm:$0xff] (!%p138_p2)   ;;  %v4189_v16 = vld [vmem:[%s5350_s1 + $0x60] sm:$0xff] (!%p138_p2)   ;;  %v4193_v20 = vld [vmem:[%s5350_s1 + $0x68] sm:$0xff] (!%p138_p2)  }
   0xa   : > { %3674 = vmatprep.subr.bf16.mxu1 (!%p138_p2), %v4178_v5  ;;  %v4186_v13 = vld [vmem:[%s5350_s1 + $0xd8] sm:$0xff] (!%p138_p2)   ;;  %v4190_v17 = vld [vmem:[%s5350_s1 + $0xe0] sm:$0xff] (!%p138_p2)   ;;  %v4194_v21 = vld [vmem:[%s5350_s1 + $0xe8] sm:$0xff] (!%p138_p2)  }
   0xb   : > { %v4187_v14 = vld [vmem:[%s5350_s1 + $0x18] sm:$0xff] (!%p138_p2)   ;;  %v4191_v18 = vld [vmem:[%s5350_s1 + $0x20] sm:$0xff] (!%p138_p2)   ;;  %v4195_v22 = vld [vmem:[%s5350_s1 + $0x28] sm:$0xff] (!%p138_p2)  }
   0xc   : > { %3635 = vmatpush3.bf16.msra.mxu0 (!%p138_p2), %v4179_v6  ;;  %v4188_v15 = vld [vmem:[%s5350_s1 + $0x98] sm:$0xff] (!%p138_p2)   ;;  %v4192_v19 = vld [vmem:[%s5350_s1 + $0xa0] sm:$0xff] (!%p138_p2)   ;;  %v4196_v23 = vld [vmem:[%s5350_s1 + $0xa8] sm:$0xff] (!%p138_p2)  }
   0xd   : > { %3675 = vmatpush3.bf16.msra.mxu1 %v4180_v7  ;;  %3636 = vmatprep.subr.bf16.mxu0 %v4181_v8  ;;  %s5354_s13 = smov (!%p161_p3, %s3311_s13), 1  ;;  %v4197_v24 = vld [vmem:[%s5350_s1 + $0x70] sm:$0xff]   ;;  %v4201_v28 = vld [vmem:[%s5350_s1 + $0x78] sm:$0xff]   ;;  %v4211_v36 = vld [vmem:[%s5350_s1 + $0x140] sm:$0xff]  }
   0xe   : > { %3676 = vmatprep.subr.bf16.mxu1 %v4182_v9  ;;  %v4198_v25 = vld [vmem:[%s5350_s1 + $0xf0] sm:$0xff]   ;;  %s4164_s16 = smul.u32 800, %s5354_s13  ;;  %v4202_v29 = vld [vmem:[%s5350_s1 + $0xf8] sm:$0xff]   ;;  %v4212_v37 = vld [vmem:[%s5350_s1 + $0x1c0] sm:$0xff]  }
   0xf   : > { %v4199_v26 = vld [vmem:[%s5350_s1 + $0x30] sm:$0xff]   ;;  %v4203_v30 = vld [vmem:[%s5350_s1 + $0x38] sm:$0xff]   ;;  %v4213_v38 = vld [vmem:[%s5350_s1 + $0x100] sm:$0xff]  }
  0x10   : > { %3637 = vmatpush3.bf16.msra.mxu0 %v4183_v10  ;;  %v4200_v27 = vld [vmem:[%s5350_s1 + $0xb0] sm:$0xff]   ;;  %s4657_s27 = scalar_lea.vmem %s5349_s0, %s4164_s16  ;;  %v4204_v31 = vld [vmem:[%s5350_s1 + $0xb8] sm:$0xff]   ;;  %v4214_v39 = vld [vmem:[%s5350_s1 + $0x180] sm:$0xff]  }
  0x11   : > { %3677 = vmatpush3.bf16.msra.mxu1 %v4184_v11  ;;  %3638 = vmatprep.subr.bf16.mxu0 %v4185_v12  ;;  %v4205_v32 = vld [vmem:[%s4657_s27] ss:$100 sps:$4 sm:$0xff]   ;;  %v4208_v34 = vld [vmem:[%s4657_s27 + $0x8] ss:$100 sps:$4 sm:$0xff]   ;;  %v4221_v45 = vld [vmem:[%s4657_s27 + $0xd4] ss:$100 sps:$4 sm:$0xff]  }
  0x12   : > { %3678 = vmatprep.subr.bf16.mxu1 %v4186_v13  ;;  %v4207_v33 = vld [vmem:[%s4657_s27 + $0x4] ss:$100 sps:$4 sm:$0xff]   ;;  %v4210_v35 = vld [vmem:[%s4657_s27 + $0xc] ss:$100 sps:$4 sm:$0xff]   ;;  %v4229_v52 = vld [vmem:[%s5350_s1 + $0x158] sm:$0xff]  }
  0x13   : > { %2419 = vmatprep.mubr.bf16.mxu0 %v4207_v33  ;;  %2484 = vmatprep.mubr.bf16.mxu1 %v4210_v35  ;;  %v4215_v40 = vld [vmem:[%s5350_s1 + $0x148] sm:$0xff]   ;;  %v4224_v47 = vld [vmem:[%s4657_s27 + $0xd0] ss:$100 sps:$4 sm:$0xff]   ;;  %v4230_v53 = vld [vmem:[%s5350_s1 + $0x1d8] sm:$0xff]  }
  0x14   : > { %3639 = vmatpush3.bf16.msra.mxu0 %v4187_v14  ;;  %v4216_v41 = vld [vmem:[%s5350_s1 + $0x1c8] sm:$0xff]   ;;  %v4225_v48 = vld [vmem:[%s5350_s1 + $0x150] sm:$0xff]   ;;  %v4231_v54 = vld [vmem:[%s5350_s1 + $0x118] sm:$0xff]  }
  0x15   : > { %3679 = vmatpush3.bf16.msra.mxu1 %v4188_v15  ;;  %3640 = vmatprep.subr.bf16.mxu0 %v4189_v16  ;;  %v4217_v42 = vld [vmem:[%s5350_s1 + $0x108] sm:$0xff]   ;;  %v4226_v49 = vld [vmem:[%s5350_s1 + $0x1d0] sm:$0xff]   ;;  %v4232_v55 = vld [vmem:[%s5350_s1 + $0x198] sm:$0xff]  }
  0x16   : > { %3680 = vmatprep.subr.bf16.mxu1 %v4190_v17  ;;  %v4218_v43 = vld [vmem:[%s5350_s1 + $0x188] sm:$0xff]   ;;  %v4227_v50 = vld [vmem:[%s5350_s1 + $0x110] sm:$0xff]   ;;  %v4235_v57 = vld [vmem:[%s4657_s27 + $0x19c] ss:$100 sps:$4 sm:$0xff]  }
  0x17   : > { %v4219_v44 = vld [vmem:[%s4657_s27 + $0xcc] ss:$100 sps:$4 sm:$0xff]   ;;  %v4233_v56 = vld [vmem:[%s4657_s27 + $0x194] ss:$100 sps:$4 sm:$0xff]   ;;  %v4239_v60 = vld [vmem:[%s5350_s1 + $0x160] sm:$0xff]  }
  0x18   : > { %3641 = vmatpush3.bf16.msra.mxu0 %v4191_v18  ;;  %v4223_v46 = vld [vmem:[%s4657_s27 + $0xc8] ss:$100 sps:$4 sm:$0xff]   ;;  %v4228_v51 = vld [vmem:[%s5350_s1 + $0x190] sm:$0xff]   ;;  %v4238_v59 = vld [vmem:[%s4657_s27 + $0x198] ss:$100 sps:$4 sm:$0xff]  }
  0x19   : > { %3681 = vmatpush3.bf16.msra.mxu1 %v4192_v19  ;;  %3642 = vmatprep.subr.bf16.mxu0 %v4193_v20  ;;  %v4237_v58 = vld [vmem:[%s4657_s27 + $0x190] ss:$100 sps:$4 sm:$0xff]   ;;  %v4240_v61 = vld [vmem:[%s5350_s1 + $0x1e0] sm:$0xff]   ;;  %v4243_v0 = vld [vmem:[%s5350_s1 + $0x168] sm:$0xff]  }
  0x1a   : > { %3682 = vmatprep.subr.bf16.mxu1 %v4194_v21  ;;  %v4241_v62 = vld [vmem:[%s5350_s1 + $0x120] sm:$0xff]   ;;  %v4244_v1 = vld [vmem:[%s5350_s1 + $0x1e8] sm:$0xff]   ;;  %v4251_v6 = vld [vmem:[%s4657_s27 + $0x258] ss:$100 sps:$4 sm:$0xff]  }
  0x1b   : > { %v4242_v63 = vld [vmem:[%s5350_s1 + $0x1a0] sm:$0xff]   ;;  %v4245_v2 = vld [vmem:[%s5350_s1 + $0x128] sm:$0xff]   ;;  %v4253_v8 = vld [vmem:[%s5350_s1 + $0x170] sm:$0xff]  }
  0x1c   : > { %3643 = vmatpush3.bf16.msra.mxu0 %v4195_v22  ;;  %v4246_v3 = vld [vmem:[%s5350_s1 + $0x1a8] sm:$0xff]   ;;  %v4247_v4 = vld [vmem:[%s4657_s27 + $0x25c] ss:$100 sps:$4 sm:$0xff]   ;;  %v4254_v9 = vld [vmem:[%s5350_s1 + $0x1f0] sm:$0xff]  }
  0x1d   : > { %3683 = vmatpush3.bf16.msra.mxu1 %v4196_v23  ;;  %3644 = vmatprep.subr.bf16.mxu0 %v4197_v24  ;;  %v4249_v5 = vld [vmem:[%s4657_s27 + $0x264] ss:$100 sps:$4 sm:$0xff]   ;;  %v4255_v10 = vld [vmem:[%s5350_s1 + $0x130] sm:$0xff]   ;;  %v4257_v12 = vld [vmem:[%s5350_s1 + $0x178] sm:$0xff]  }
  0x1e   : > { %3684 = vmatprep.subr.bf16.mxu1 %v4198_v25  ;;  %v4252_v7 = vld [vmem:[%s4657_s27 + $0x260] ss:$100 sps:$4 sm:$0xff]   ;;  %v4256_v11 = vld [vmem:[%s5350_s1 + $0x1b0] sm:$0xff]   ;;  %v4258_v13 = vld [vmem:[%s5350_s1 + $0x1f8] sm:$0xff]  }
  0x1f   : > { %v4259_v14 = vld [vmem:[%s5350_s1 + $0x138] sm:$0xff]   ;;  %v4261_v16 = vld [vmem:[%s4657_s27 + $0x10] ss:$100 sps:$4 sm:$0xff]   ;;  %v4267_v20 = vld [vmem:[%s5350_s1 + $0x240] sm:$0xff]  }
  0x20   : > { %3645 = vmatpush3.bf16.msra.mxu0 %v4199_v26  ;;  %v4260_v15 = vld [vmem:[%s5350_s1 + $0x1b8] sm:$0xff]   ;;  %v4268_v21 = vld [vmem:[%s5350_s1 + $0x2c0] sm:$0xff]   ;;  %v4271_v24 = vld [vmem:[%s5350_s1 + $0x248] sm:$0xff]  }
  0x21   : > { %3685 = vmatpush3.bf16.msra.mxu1 %v4200_v27  ;;  %3646 = vmatprep.subr.bf16.mxu0 %v4201_v28  ;;  %v4263_v17 = vld [vmem:[%s4657_s27 + $0x14] ss:$100 sps:$4 sm:$0xff]   ;;  %v4266_v19 = vld [vmem:[%s4657_s27 + $0x1c] ss:$100 sps:$4 sm:$0xff]   ;;  %v4272_v25 = vld [vmem:[%s5350_s1 + $0x2c8] sm:$0xff]  }
  0x22   : > { %3686 = vmatprep.subr.bf16.mxu1 %v4202_v29  ;;  %v4264_v18 = vld [vmem:[%s4657_s27 + $0x18] ss:$100 sps:$4 sm:$0xff]   ;;  %v4269_v22 = vld [vmem:[%s5350_s1 + $0x200] sm:$0xff]   ;;  %v4273_v26 = vld [vmem:[%s5350_s1 + $0x208] sm:$0xff]  }
  0x23   : > { %v4270_v23 = vld [vmem:[%s5350_s1 + $0x280] sm:$0xff]   ;;  %v4274_v27 = vld [vmem:[%s5350_s1 + $0x288] sm:$0xff]   ;;  %v4282_v33 = vld [vmem:[%s5350_s1 + $0x2d0] sm:$0xff]  }
  0x24   : > { %3647 = vmatpush3.bf16.msra.mxu0 %v4203_v30  ;;  %v4275_v28 = vld [vmem:[%s4657_s27 + $0xdc] ss:$100 sps:$4 sm:$0xff]   ;;  %v4277_v29 = vld [vmem:[%s4657_s27 + $0xe4] ss:$100 sps:$4 sm:$0xff]   ;;  %v4284_v35 = vld [vmem:[%s5350_s1 + $0x290] sm:$0xff]  }
  0x25   : > { %3687 = vmatpush3.bf16.msra.mxu1 %v4204_v31  ;;  %3712 = vmatprep.subr.bf16.mxu0 %v4211_v36  ;;  %v4279_v30 = vld [vmem:[%s4657_s27 + $0xd8] ss:$100 sps:$4 sm:$0xff]   ;;  %v4280_v31 = vld [vmem:[%s4657_s27 + $0xe0] ss:$100 sps:$4 sm:$0xff]  }
  0x26   : > { %3752 = vmatprep.subr.bf16.mxu1 %v4212_v37  ;;  %v4285_v36 = vld [vmem:[%s5350_s1 + $0x258] sm:$0xff]  }
  0x27   : > { %2420 = vmatmul.mubr.bf16.vlgmr.msra.gmra.mrb[0].mxu0 %v4205_v32  ;;  %v4281_v32 = vld [vmem:[%s5350_s1 + $0x250] sm:$0xff]   ;;  %v4286_v37 = vld [vmem:[%s5350_s1 + $0x2d8] sm:$0xff]  }
  0x28   : > { %2485 = vmatmul.mubr.bf16.vlgmr.msra.gmra.mrb[0].mxu1 %v4208_v34  ;;  %3713 = vmatpush3.bf16.msra.mxu0 %v4213_v38  ;;  %v4283_v34 = vld [vmem:[%s5350_s1 + $0x210] sm:$0xff]   ;;  %v4287_v38 = vld [vmem:[%s5350_s1 + $0x218] sm:$0xff]  }
  0x29   : > { %3753 = vmatpush3.bf16.msra.mxu1 %v4214_v39  ;;  %3714 = vmatprep.subr.bf16.mxu0 %v4215_v40  ;;  %v4288_v39 = vld [vmem:[%s5350_s1 + $0x298] sm:$0xff]   ;;  %v4289_v40 = vld [vmem:[%s4657_s27 + $0x1a4] ss:$100 sps:$4 sm:$0xff]  }
  0x2a   : > { %3754 = vmatprep.subr.bf16.mxu1 %v4216_v41  ;;  %2427 = vmatprep.mubr.bf16.mxu0 %v4219_v44  ;;  %v4291_v41 = vld [vmem:[%s4657_s27 + $0x1ac] ss:$100 sps:$4 sm:$0xff]   ;;  %v4295_v44 = vld [vmem:[%s5350_s1 + $0x260] sm:$0xff]  }
  0x2b   : > { %2492 = vmatprep.mubr.bf16.mxu1 %v4221_v45  ;;  %v4296_v45 = vld [vmem:[%s5350_s1 + $0x2e0] sm:$0xff]  }
  0x2c   : > { %3715 = vmatpush3.bf16.msra.mxu0 %v4217_v42  ;;  %v4293_v42 = vld [vmem:[%s4657_s27 + $0x1a0] ss:$100 sps:$4 sm:$0xff]  }
  0x2d   : > { %3755 = vmatpush3.bf16.msra.mxu1 %v4218_v43  ;;  %3716 = vmatprep.subr.bf16.mxu0 %v4225_v48  ;;  %v4294_v43 = vld [vmem:[%s4657_s27 + $0x1a8] ss:$100 sps:$4 sm:$0xff]  }
  0x2e   : > { %3756 = vmatprep.subr.bf16.mxu1 %v4226_v49  ;;  %v4299_v48 = vld [vmem:[%s5350_s1 + $0x268] sm:$0xff]  }
  0x2f   : > { %2428 = vmatmul.mubr.bf16.gmra.mrb[4].mxu0 %v4223_v46  ;;  %v4297_v46 = vld [vmem:[%s5350_s1 + $0x220] sm:$0xff]   ;;  %v4300_v49 = vld [vmem:[%s5350_s1 + $0x2e8] sm:$0xff]  }
  0x30   : > { %2493 = vmatmul.mubr.bf16.gmra.mrb[4].mxu1 %v4224_v47  ;;  %3717 = vmatpush3.bf16.msra.mxu0 %v4227_v50  ;;  %v4298_v47 = vld [vmem:[%s5350_s1 + $0x2a0] sm:$0xff]   ;;  %v4301_v50 = vld [vmem:[%s5350_s1 + $0x228] sm:$0xff]  }
  0x31   : > { %3757 = vmatpush3.bf16.msra.mxu1 %v4228_v51  ;;  %3718 = vmatprep.subr.bf16.mxu0 %v4229_v52  ;;  %v4302_v51 = vld [vmem:[%s5350_s1 + $0x2a8] sm:$0xff]  }
  0x32   : > { %3758 = vmatprep.subr.bf16.mxu1 %v4230_v53  ;;  %2435 = vmatprep.mubr.bf16.mxu0 %v4233_v56  ;;  %v4303_v52 = vld [vmem:[%s4657_s27 + $0x26c] ss:$100 sps:$4 sm:$0xff]   ;;  %v4305_v53 = vld [vmem:[%s4657_s27 + $0x274] ss:$100 sps:$4 sm:$0xff]  }
  0x33   : > { %2500 = vmatprep.mubr.bf16.mxu1 %v4235_v57  ;;  %v4309_v56 = vld [vmem:[%s5350_s1 + $0x270] sm:$0xff]  }
  0x34   : > { %3719 = vmatpush3.bf16.msra.mxu0 %v4231_v54  ;;  %v4307_v54 = vld [vmem:[%s4657_s27 + $0x268] ss:$100 sps:$4 sm:$0xff]   ;;  %v4310_v57 = vld [vmem:[%s5350_s1 + $0x2f0] sm:$0xff]  }
  0x35   : > { %3759 = vmatpush3.bf16.msra.mxu1 %v4232_v55  ;;  %3720 = vmatprep.subr.bf16.mxu0 %v4239_v60  ;;  %v4308_v55 = vld [vmem:[%s4657_s27 + $0x270] ss:$100 sps:$4 sm:$0xff]   ;;  %v4313_v60 = vld [vmem:[%s5350_s1 + $0x278] sm:$0xff]  }
  0x36   : > { %3760 = vmatprep.subr.bf16.mxu1 %v4240_v61  ;;  %v4314_v61 = vld [vmem:[%s5350_s1 + $0x2f8] sm:$0xff]  }
  0x37   : > { %2436 = vmatmul.mubr.bf16.gmra.mrb[8].mxu0 %v4237_v58  ;;  %v4311_v58 = vld [vmem:[%s5350_s1 + $0x230] sm:$0xff]  }
  0x38   : > { %2501 = vmatmul.mubr.bf16.gmra.mrb[8].mxu1 %v4238_v59  ;;  %3721 = vmatpush3.bf16.msra.mxu0 %v4241_v62  ;;  %v4312_v59 = vld [vmem:[%s5350_s1 + $0x2b0] sm:$0xff]   ;;  %v4315_v62 = vld [vmem:[%s5350_s1 + $0x238] sm:$0xff]  }
  0x39   : > { %3761 = vmatpush3.bf16.msra.mxu1 %v4242_v63  ;;  %3722 = vmatprep.subr.bf16.mxu0 %v4243_v0  ;;  %v4316_v63 = vld [vmem:[%s5350_s1 + $0x2b8] sm:$0xff]   ;;  %v4317_v0 = vld [vmem:[%s4657_s27 + $0x20] ss:$100 sps:$4 sm:$0xff]  }
  0x3a   : > { %3762 = vmatprep.subr.bf16.mxu1 %v4244_v1  ;;  %2443 = vmatprep.mubr.bf16.mxu0 %v4247_v4  ;;  %v4319_v1 = vld [vmem:[%s4657_s27 + $0x24] ss:$100 sps:$4 sm:$0xff]  }
  0x3b   : > { %2508 = vmatprep.mubr.bf16.mxu1 %v4249_v5  ;;  %v4323_v4 = vld [vmem:[%s5350_s1 + $0x340] sm:$0xff]  }
  0x3c   : > { %3723 = vmatpush3.bf16.msra.mxu0 %v4245_v2  ;;  %v4320_v2 = vld [vmem:[%s4657_s27 + $0x28] ss:$100 sps:$4 sm:$0xff]   ;;  %v4324_v5 = vld [vmem:[%s5350_s1 + $0x3c0] sm:$0xff]  }
  0x3d   : > { %3763 = vmatpush3.bf16.msra.mxu1 %v4246_v3  ;;  %3724 = vmatprep.subr.bf16.mxu0 %v4253_v8  ;;  %v4322_v3 = vld [vmem:[%s4657_s27 + $0x2c] ss:$100 sps:$4 sm:$0xff]  }
  0x3e   : > { %3764 = vmatprep.subr.bf16.mxu1 %v4254_v9  ;;  %v4327_v8 = vld [vmem:[%s5350_s1 + $0x348] sm:$0xff]  }
  0x3f   : > { %2444 = vmatmul.mubr.bf16.gmra.mrb[12].mxu0 %v4251_v6  ;;  %v4325_v6 = vld [vmem:[%s5350_s1 + $0x300] sm:$0xff]   ;;  %v4328_v9 = vld [vmem:[%s5350_s1 + $0x3c8] sm:$0xff]  }
  0x40   : > { %2509 = vmatmul.mubr.bf16.gmra.mrb[12].mxu1 %v4252_v7  ;;  %3725 = vmatpush3.bf16.msra.mxu0 %v4255_v10  ;;  %v4326_v7 = vld [vmem:[%s5350_s1 + $0x380] sm:$0xff]   ;;  %v4329_v10 = vld [vmem:[%s5350_s1 + $0x308] sm:$0xff]  }
  0x41   : > { %3765 = vmatpush3.bf16.msra.mxu1 %v4256_v11  ;;  %3726 = vmatprep.subr.bf16.mxu0 %v4257_v12  ;;  %v4330_v11 = vld [vmem:[%s5350_s1 + $0x388] sm:$0xff]  }
  0x42   : > { %3766 = vmatprep.subr.bf16.mxu1 %v4258_v13  ;;  %2549 = vmatprep.mubr.bf16.mxu0 %v4263_v17  ;;  %v4331_v12 = vld [vmem:[%s4657_s27 + $0xec] ss:$100 sps:$4 sm:$0xff]   ;;  %v4333_v13 = vld [vmem:[%s4657_s27 + $0xf4] ss:$100 sps:$4 sm:$0xff]  }
  0x43   : > { %2614 = vmatprep.mubr.bf16.mxu1 %v4266_v19  ;;  %v4338_v17 = vld [vmem:[%s5350_s1 + $0x3d0] sm:$0xff]  }
  0x44   : > { %3727 = vmatpush3.bf16.msra.mxu0 %v4259_v14  ;;  %v4335_v14 = vld [vmem:[%s4657_s27 + $0xe8] ss:$100 sps:$4 sm:$0xff]   ;;  %v4340_v19 = vld [vmem:[%s5350_s1 + $0x390] sm:$0xff]  }
  0x45   : > { %3767 = vmatpush3.bf16.msra.mxu1 %v4260_v15  ;;  %3792 = vmatprep.subr.bf16.mxu0 %v4267_v20  ;;  %v4336_v15 = vld [vmem:[%s4657_s27 + $0xf0] ss:$100 sps:$4 sm:$0xff]   ;;  %v4341_v20 = vld [vmem:[%s5350_s1 + $0x358] sm:$0xff]  }
  0x46   : > { %3832 = vmatprep.subr.bf16.mxu1 %v4268_v21  ;;  %v4342_v21 = vld [vmem:[%s5350_s1 + $0x3d8] sm:$0xff]  }
  0x47   : > { %2550 = vmatmul.mubr.bf16.vlgmr.msra.gmra.mrb[16].mxu0 %v4261_v16  ;;  %v4337_v16 = vld [vmem:[%s5350_s1 + $0x350] sm:$0xff]  }
  0x48   : > { %2615 = vmatmul.mubr.bf16.vlgmr.msra.gmra.mrb[16].mxu1 %v4264_v18  ;;  %3793 = vmatpush3.bf16.msra.mxu0 %v4269_v22  ;;  %v4339_v18 = vld [vmem:[%s5350_s1 + $0x310] sm:$0xff]   ;;  %v4343_v22 = vld [vmem:[%s5350_s1 + $0x318] sm:$0xff]  }
  0x49   : > { %3833 = vmatpush3.bf16.msra.mxu1 %v4270_v23  ;;  %3794 = vmatprep.subr.bf16.mxu0 %v4271_v24  ;;  %v4344_v23 = vld [vmem:[%s5350_s1 + $0x398] sm:$0xff]  }
  0x4a   : > { %3834 = vmatprep.subr.bf16.mxu1 %v4272_v25  ;;  %2557 = vmatprep.mubr.bf16.mxu0 %v4275_v28  ;;  %v4345_v24 = vld [vmem:[%s4657_s27 + $0x1b4] ss:$100 sps:$4 sm:$0xff]   ;;  %v4347_v25 = vld [vmem:[%s4657_s27 + $0x1bc] ss:$100 sps:$4 sm:$0xff]  }
  0x4b   : > { %2622 = vmatprep.mubr.bf16.mxu1 %v4277_v29  ;;  %v4351_v28 = vld [vmem:[%s5350_s1 + $0x360] sm:$0xff]  }
  0x4c   : > { %3795 = vmatpush3.bf16.msra.mxu0 %v4273_v26  ;;  %v4349_v26 = vld [vmem:[%s4657_s27 + $0x1b0] ss:$100 sps:$4 sm:$0xff]   ;;  %v4352_v29 = vld [vmem:[%s5350_s1 + $0x3e0] sm:$0xff]  }
  0x4d   : > { %3835 = vmatpush3.bf16.msra.mxu1 %v4274_v27  ;;  %3796 = vmatprep.subr.bf16.mxu0 %v4281_v32  ;;  %v4350_v27 = vld [vmem:[%s4657_s27 + $0x1b8] ss:$100 sps:$4 sm:$0xff]   ;;  %v4355_v32 = vld [vmem:[%s5350_s1 + $0x368] sm:$0xff]  }
  0x4e   : > { %3836 = vmatprep.subr.bf16.mxu1 %v4282_v33  ;;  %v4356_v33 = vld [vmem:[%s5350_s1 + $0x3e8] sm:$0xff]  }
  0x4f   : > { %2558 = vmatmul.mubr.bf16.gmra.mrb[20].mxu0 %v4279_v30  ;;  %v4353_v30 = vld [vmem:[%s5350_s1 + $0x320] sm:$0xff]  }
  0x50   : > { %2623 = vmatmul.mubr.bf16.gmra.mrb[20].mxu1 %v4280_v31  ;;  %3797 = vmatpush3.bf16.msra.mxu0 %v4283_v34  ;;  %v4354_v31 = vld [vmem:[%s5350_s1 + $0x3a0] sm:$0xff]   ;;  %v4357_v34 = vld [vmem:[%s5350_s1 + $0x328] sm:$0xff]  }
  0x51   : > { %3837 = vmatpush3.bf16.msra.mxu1 %v4284_v35  ;;  %3798 = vmatprep.subr.bf16.mxu0 %v4285_v36  ;;  %v4358_v35 = vld [vmem:[%s5350_s1 + $0x3a8] sm:$0xff]   ;;  %v4359_v36 = vld [vmem:[%s4657_s27 + $0x27c] ss:$100 sps:$4 sm:$0xff]  }
  0x52   : > { %3838 = vmatprep.subr.bf16.mxu1 %v4286_v37  ;;  %2565 = vmatprep.mubr.bf16.mxu0 %v4289_v40  ;;  %v4361_v37 = vld [vmem:[%s4657_s27 + $0x284] ss:$100 sps:$4 sm:$0xff]   ;;  %v4365_v40 = vld [vmem:[%s5350_s1 + $0x370] sm:$0xff]  }
  0x53   : > { %2630 = vmatprep.mubr.bf16.mxu1 %v4291_v41  ;;  %v4366_v41 = vld [vmem:[%s5350_s1 + $0x3f0] sm:$0xff]  }
  0x54   : > { %3799 = vmatpush3.bf16.msra.mxu0 %v4287_v38  ;;  %v4363_v38 = vld [vmem:[%s4657_s27 + $0x278] ss:$100 sps:$4 sm:$0xff]  }
  0x55   : > { %3839 = vmatpush3.bf16.msra.mxu1 %v4288_v39  ;;  %3800 = vmatprep.subr.bf16.mxu0 %v4295_v44  ;;  %v4364_v39 = vld [vmem:[%s4657_s27 + $0x280] ss:$100 sps:$4 sm:$0xff]   ;;  %v4369_v44 = vld [vmem:[%s5350_s1 + $0x378] sm:$0xff]  }
  0x56   : > { %3840 = vmatprep.subr.bf16.mxu1 %v4296_v45  ;;  %v4370_v45 = vld [vmem:[%s5350_s1 + $0x3f8] sm:$0xff]  }
  0x57   : > { %2566 = vmatmul.mubr.bf16.gmra.mrb[24].mxu0 %v4293_v42  ;;  %v4367_v42 = vld [vmem:[%s5350_s1 + $0x330] sm:$0xff]  }
  0x58   : > { %2631 = vmatmul.mubr.bf16.gmra.mrb[24].mxu1 %v4294_v43  ;;  %3801 = vmatpush3.bf16.msra.mxu0 %v4297_v46  ;;  %v4368_v43 = vld [vmem:[%s5350_s1 + $0x3b0] sm:$0xff]   ;;  %v4371_v46 = vld [vmem:[%s5350_s1 + $0x338] sm:$0xff]  }
  0x59   : > { %3841 = vmatpush3.bf16.msra.mxu1 %v4298_v47  ;;  %3802 = vmatprep.subr.bf16.mxu0 %v4299_v48  ;;  %v4372_v47 = vld [vmem:[%s5350_s1 + $0x3b8] sm:$0xff]   ;;  %v4373_v48 = vld [vmem:[%s4657_s27 + $0x30] ss:$100 sps:$4 sm:$0xff]  }
  0x5a   : > { %3842 = vmatprep.subr.bf16.mxu1 %v4300_v49  ;;  %2573 = vmatprep.mubr.bf16.mxu0 %v4303_v52  ;;  %v4375_v49 = vld [vmem:[%s4657_s27 + $0x34] ss:$100 sps:$4 sm:$0xff]   ;;  %v4379_v52 = vld [vmem:[%s5350_s1 + $0x440] sm:$0xff]  }
  0x5b   : > { %2638 = vmatprep.mubr.bf16.mxu1 %v4305_v53  ;;  %v4380_v53 = vld [vmem:[%s5350_s1 + $0x4c0] sm:$0xff]  }
  0x5c   : > { %3803 = vmatpush3.bf16.msra.mxu0 %v4301_v50  ;;  %v4376_v50 = vld [vmem:[%s4657_s27 + $0x38] ss:$100 sps:$4 sm:$0xff]  }
  0x5d   : > { %3843 = vmatpush3.bf16.msra.mxu1 %v4302_v51  ;;  %3804 = vmatprep.subr.bf16.mxu0 %v4309_v56  ;;  %v4378_v51 = vld [vmem:[%s4657_s27 + $0x3c] ss:$100 sps:$4 sm:$0xff]   ;;  %v4383_v56 = vld [vmem:[%s5350_s1 + $0x448] sm:$0xff]  }
  0x5e   : > { %3844 = vmatprep.subr.bf16.mxu1 %v4310_v57  ;;  %v4384_v57 = vld [vmem:[%s5350_s1 + $0x4c8] sm:$0xff]  }
  0x5f   : > { %2574 = vmatmul.mubr.bf16.gmra.mrb[28].mxu0 %v4307_v54  ;;  %v4381_v54 = vld [vmem:[%s5350_s1 + $0x400] sm:$0xff]  }
  0x60   : > { %2639 = vmatmul.mubr.bf16.gmra.mrb[28].mxu1 %v4308_v55  ;;  %3805 = vmatpush3.bf16.msra.mxu0 %v4311_v58  ;;  %v4382_v55 = vld [vmem:[%s5350_s1 + $0x480] sm:$0xff]   ;;  %v4385_v58 = vld [vmem:[%s5350_s1 + $0x408] sm:$0xff]  }
  0x61   : > { %3845 = vmatpush3.bf16.msra.mxu1 %v4312_v59  ;;  %3806 = vmatprep.subr.bf16.mxu0 %v4313_v60  ;;  %v4386_v59 = vld [vmem:[%s5350_s1 + $0x488] sm:$0xff]   ;;  %v4387_v60 = vld [vmem:[%s4657_s27 + $0xfc] ss:$100 sps:$4 sm:$0xff]  }
  0x62   : > { %3846 = vmatprep.subr.bf16.mxu1 %v4314_v61  ;;  %2679 = vmatprep.mubr.bf16.mxu0 %v4319_v1  ;;  %v4389_v61 = vld [vmem:[%s4657_s27 + $0x104] ss:$100 sps:$4 sm:$0xff]   ;;  %v4394_v1 = vld [vmem:[%s5350_s1 + $0x4d0] sm:$0xff]  }
  0x63   : > { %2744 = vmatprep.mubr.bf16.mxu1 %v4322_v3  ;;  %v4396_v3 = vld [vmem:[%s5350_s1 + $0x490] sm:$0xff]  }
  0x64   : > { %3807 = vmatpush3.bf16.msra.mxu0 %v4315_v62  ;;  %v4391_v62 = vld [vmem:[%s4657_s27 + $0xf8] ss:$100 sps:$4 sm:$0xff]  }
  0x65   : > { %3847 = vmatpush3.bf16.msra.mxu1 %v4316_v63  ;;  %3872 = vmatprep.subr.bf16.mxu0 %v4323_v4  ;;  %v4392_v63 = vld [vmem:[%s4657_s27 + $0x100] ss:$100 sps:$4 sm:$0xff]   ;;  %v4397_v4 = vld [vmem:[%s5350_s1 + $0x458] sm:$0xff]  }
  0x66   : > { %3912 = vmatprep.subr.bf16.mxu1 %v4324_v5  ;;  %v4398_v5 = vld [vmem:[%s5350_s1 + $0x4d8] sm:$0xff]  }
  0x67   : > { %2680 = vmatmul.mubr.bf16.vlgmr.msra.gmra.mrb[32].mxu0 %v4317_v0  ;;  %v4393_v0 = vld [vmem:[%s5350_s1 + $0x450] sm:$0xff]  }
  0x68   : > { %2745 = vmatmul.mubr.bf16.vlgmr.msra.gmra.mrb[32].mxu1 %v4320_v2  ;;  %3873 = vmatpush3.bf16.msra.mxu0 %v4325_v6  ;;  %v4395_v2 = vld [vmem:[%s5350_s1 + $0x410] sm:$0xff]   ;;  %v4399_v6 = vld [vmem:[%s5350_s1 + $0x418] sm:$0xff]  }
  0x69   : > { %3913 = vmatpush3.bf16.msra.mxu1 %v4326_v7  ;;  %3874 = vmatprep.subr.bf16.mxu0 %v4327_v8  ;;  %v4400_v7 = vld [vmem:[%s5350_s1 + $0x498] sm:$0xff]   ;;  %v4401_v8 = vld [vmem:[%s4657_s27 + $0x1c4] ss:$100 sps:$4 sm:$0xff]  }
  0x6a   : > { %3914 = vmatprep.subr.bf16.mxu1 %v4328_v9  ;;  %2687 = vmatprep.mubr.bf16.mxu0 %v4331_v12  ;;  %v4403_v9 = vld [vmem:[%s4657_s27 + $0x1cc] ss:$100 sps:$4 sm:$0xff]   ;;  %v4407_v12 = vld [vmem:[%s5350_s1 + $0x460] sm:$0xff]  }
  0x6b   : > { %2752 = vmatprep.mubr.bf16.mxu1 %v4333_v13  ;;  %v4408_v13 = vld [vmem:[%s5350_s1 + $0x4e0] sm:$0xff]  }
  0x6c   : > { %3875 = vmatpush3.bf16.msra.mxu0 %v4329_v10  ;;  %v4405_v10 = vld [vmem:[%s4657_s27 + $0x1c0] ss:$100 sps:$4 sm:$0xff]  }
  0x6d   : > { %3915 = vmatpush3.bf16.msra.mxu1 %v4330_v11  ;;  %3876 = vmatprep.subr.bf16.mxu0 %v4337_v16  ;;  %v4406_v11 = vld [vmem:[%s4657_s27 + $0x1c8] ss:$100 sps:$4 sm:$0xff]  }
  0x6e   : > { %3916 = vmatprep.subr.bf16.mxu1 %v4338_v17  ;;  %v4411_v16 = vld [vmem:[%s5350_s1 + $0x468] sm:$0xff]  }
  0x6f   : > { %2688 = vmatmul.mubr.bf16.gmra.mrb[36].mxu0 %v4335_v14  ;;  %v4409_v14 = vld [vmem:[%s5350_s1 + $0x420] sm:$0xff]   ;;  %v4412_v17 = vld [vmem:[%s5350_s1 + $0x4e8] sm:$0xff]  }
  0x70   : > { %2753 = vmatmul.mubr.bf16.gmra.mrb[36].mxu1 %v4336_v15  ;;  %3877 = vmatpush3.bf16.msra.mxu0 %v4339_v18  ;;  %v4410_v15 = vld [vmem:[%s5350_s1 + $0x4a0] sm:$0xff]   ;;  %v4413_v18 = vld [vmem:[%s5350_s1 + $0x428] sm:$0xff]  }
  0x71   : > { %3917 = vmatpush3.bf16.msra.mxu1 %v4340_v19  ;;  %3878 = vmatprep.subr.bf16.mxu0 %v4341_v20  ;;  %v4414_v19 = vld [vmem:[%s5350_s1 + $0x4a8] sm:$0xff]  }
  0x72   : > { %3918 = vmatprep.subr.bf16.mxu1 %v4342_v21  ;;  %2695 = vmatprep.mubr.bf16.mxu0 %v4345_v24  ;;  %v4415_v20 = vld [vmem:[%s4657_s27 + $0x28c] ss:$100 sps:$4 sm:$0xff]   ;;  %v4417_v21 = vld [vmem:[%s4657_s27 + $0x294] ss:$100 sps:$4 sm:$0xff]  }
  0x73   : > { %2760 = vmatprep.mubr.bf16.mxu1 %v4347_v25  ;;  %v4421_v24 = vld [vmem:[%s5350_s1 + $0x470] sm:$0xff]  }
  0x74   : > { %3879 = vmatpush3.bf16.msra.mxu0 %v4343_v22  ;;  %v4419_v22 = vld [vmem:[%s4657_s27 + $0x288] ss:$100 sps:$4 sm:$0xff]   ;;  %v4422_v25 = vld [vmem:[%s5350_s1 + $0x4f0] sm:$0xff]  }
  0x75   : > { %3919 = vmatpush3.bf16.msra.mxu1 %v4344_v23  ;;  %3880 = vmatprep.subr.bf16.mxu0 %v4351_v28  ;;  %v4420_v23 = vld [vmem:[%s4657_s27 + $0x290] ss:$100 sps:$4 sm:$0xff]   ;;  %v4425_v28 = vld [vmem:[%s5350_s1 + $0x478] sm:$0xff]  }
  0x76   : > { %3920 = vmatprep.subr.bf16.mxu1 %v4352_v29  ;;  %v4426_v29 = vld [vmem:[%s5350_s1 + $0x4f8] sm:$0xff]  }
  0x77   : > { %2696 = vmatmul.mubr.bf16.gmra.mrb[40].mxu0 %v4349_v26  ;;  %v4423_v26 = vld [vmem:[%s5350_s1 + $0x430] sm:$0xff]  }
  0x78   : > { %2761 = vmatmul.mubr.bf16.gmra.mrb[40].mxu1 %v4350_v27  ;;  %3881 = vmatpush3.bf16.msra.mxu0 %v4353_v30  ;;  %v4424_v27 = vld [vmem:[%s5350_s1 + $0x4b0] sm:$0xff]   ;;  %v4427_v30 = vld [vmem:[%s5350_s1 + $0x438] sm:$0xff]  }
  0x79   : > { %3921 = vmatpush3.bf16.msra.mxu1 %v4354_v31  ;;  %3882 = vmatprep.subr.bf16.mxu0 %v4355_v32  ;;  %v4428_v31 = vld [vmem:[%s5350_s1 + $0x4b8] sm:$0xff]   ;;  %v4429_v32 = vld [vmem:[%s4657_s27 + $0x40] ss:$100 sps:$4 sm:$0xff]  }
  0x7a   : > { %3922 = vmatprep.subr.bf16.mxu1 %v4356_v33  ;;  %2703 = vmatprep.mubr.bf16.mxu0 %v4359_v36  ;;  %v4431_v33 = vld [vmem:[%s4657_s27 + $0x44] ss:$100 sps:$4 sm:$0xff]  }
  0x7b   : > { %2768 = vmatprep.mubr.bf16.mxu1 %v4361_v37  ;;  %v4435_v36 = vld [vmem:[%s5350_s1 + $0x540] sm:$0xff]  }
  0x7c   : > { %3883 = vmatpush3.bf16.msra.mxu0 %v4357_v34  ;;  %v4432_v34 = vld [vmem:[%s4657_s27 + $0x48] ss:$100 sps:$4 sm:$0xff]   ;;  %v4436_v37 = vld [vmem:[%s5350_s1 + $0x5c0] sm:$0xff]  }
  0x7d   : > { %3923 = vmatpush3.bf16.msra.mxu1 %v4358_v35  ;;  %3884 = vmatprep.subr.bf16.mxu0 %v4365_v40  ;;  %v4434_v35 = vld [vmem:[%s4657_s27 + $0x4c] ss:$100 sps:$4 sm:$0xff]  }
  0x7e   : > { %3924 = vmatprep.subr.bf16.mxu1 %v4366_v41  ;;  %v4439_v40 = vld [vmem:[%s5350_s1 + $0x548] sm:$0xff]  }
  0x7f   : > { %2704 = vmatmul.mubr.bf16.gmra.mrb[44].mxu0 %v4363_v38  ;;  %v4437_v38 = vld [vmem:[%s5350_s1 + $0x500] sm:$0xff]   ;;  %v4440_v41 = vld [vmem:[%s5350_s1 + $0x5c8] sm:$0xff]  }
  0x80   : > { %2769 = vmatmul.mubr.bf16.gmra.mrb[44].mxu1 %v4364_v39  ;;  %3885 = vmatpush3.bf16.msra.mxu0 %v4367_v42  ;;  %v4438_v39 = vld [vmem:[%s5350_s1 + $0x580] sm:$0xff]   ;;  %v4441_v42 = vld [vmem:[%s5350_s1 + $0x508] sm:$0xff]  }
  0x81   : > { %3925 = vmatpush3.bf16.msra.mxu1 %v4368_v43  ;;  %3886 = vmatprep.subr.bf16.mxu0 %v4369_v44  ;;  %v4442_v43 = vld [vmem:[%s5350_s1 + $0x588] sm:$0xff]  }
  0x82   : > { %3926 = vmatprep.subr.bf16.mxu1 %v4370_v45  ;;  %2809 = vmatprep.mubr.bf16.mxu0 %v4375_v49  ;;  %v4443_v44 = vld [vmem:[%s4657_s27 + $0x10c] ss:$100 sps:$4 sm:$0xff]   ;;  %v4445_v45 = vld [vmem:[%s4657_s27 + $0x114] ss:$100 sps:$4 sm:$0xff]  }
  0x83   : > { %2874 = vmatprep.mubr.bf16.mxu1 %v4378_v51  ;;  %v4450_v49 = vld [vmem:[%s5350_s1 + $0x5d0] sm:$0xff]  }
  0x84   : > { %3887 = vmatpush3.bf16.msra.mxu0 %v4371_v46  ;;  %v4447_v46 = vld [vmem:[%s4657_s27 + $0x108] ss:$100 sps:$4 sm:$0xff]   ;;  %v4452_v51 = vld [vmem:[%s5350_s1 + $0x590] sm:$0xff]  }
  0x85   : > { %3927 = vmatpush3.bf16.msra.mxu1 %v4372_v47  ;;  %3952 = vmatprep.subr.bf16.mxu0 %v4379_v52  ;;  %v4448_v47 = vld [vmem:[%s4657_s27 + $0x110] ss:$100 sps:$4 sm:$0xff]   ;;  %v4453_v52 = vld [vmem:[%s5350_s1 + $0x558] sm:$0xff]  }
  0x86   : > { %3992 = vmatprep.subr.bf16.mxu1 %v4380_v53  ;;  %v4454_v53 = vld [vmem:[%s5350_s1 + $0x5d8] sm:$0xff]  }
  0x87   : > { %2810 = vmatmul.mubr.bf16.vlgmr.msra.gmra.mrb[48].mxu0 %v4373_v48  ;;  %v4449_v48 = vld [vmem:[%s5350_s1 + $0x550] sm:$0xff]  }
  0x88   : > { %2875 = vmatmul.mubr.bf16.vlgmr.msra.gmra.mrb[48].mxu1 %v4376_v50  ;;  %3953 = vmatpush3.bf16.msra.mxu0 %v4381_v54  ;;  %v4451_v50 = vld [vmem:[%s5350_s1 + $0x510] sm:$0xff]   ;;  %v4455_v54 = vld [vmem:[%s5350_s1 + $0x518] sm:$0xff]  }
  0x89   : > { %3993 = vmatpush3.bf16.msra.mxu1 %v4382_v55  ;;  %3954 = vmatprep.subr.bf16.mxu0 %v4383_v56  ;;  %v4456_v55 = vld [vmem:[%s5350_s1 + $0x598] sm:$0xff]  }
  0x8a   : > { %3994 = vmatprep.subr.bf16.mxu1 %v4384_v57  ;;  %2817 = vmatprep.mubr.bf16.mxu0 %v4387_v60  ;;  %v4457_v56 = vld [vmem:[%s4657_s27 + $0x1d4] ss:$100 sps:$4 sm:$0xff]   ;;  %v4459_v57 = vld [vmem:[%s4657_s27 + $0x1dc] ss:$100 sps:$4 sm:$0xff]  }
  0x8b   : > { %2882 = vmatprep.mubr.bf16.mxu1 %v4389_v61  ;;  %v4463_v60 = vld [vmem:[%s5350_s1 + $0x560] sm:$0xff]  }
  0x8c   : > { %3955 = vmatpush3.bf16.msra.mxu0 %v4385_v58  ;;  %v4461_v58 = vld [vmem:[%s4657_s27 + $0x1d0] ss:$100 sps:$4 sm:$0xff]   ;;  %v4464_v61 = vld [vmem:[%s5350_s1 + $0x5e0] sm:$0xff]  }
  0x8d   : > { %3995 = vmatpush3.bf16.msra.mxu1 %v4386_v59  ;;  %3956 = vmatprep.subr.bf16.mxu0 %v4393_v0  ;;  %v4462_v59 = vld [vmem:[%s4657_s27 + $0x1d8] ss:$100 sps:$4 sm:$0xff]   ;;  %v4467_v0 = vld [vmem:[%s5350_s1 + $0x568] sm:$0xff]  }
  0x8e   : > { %3996 = vmatprep.subr.bf16.mxu1 %v4394_v1  ;;  %v4468_v1 = vld [vmem:[%s5350_s1 + $0x5e8] sm:$0xff]  }
  0x8f   : > { %2818 = vmatmul.mubr.bf16.gmra.mrb[52].mxu0 %v4391_v62  ;;  %v4465_v62 = vld [vmem:[%s5350_s1 + $0x520] sm:$0xff]  }
  0x90   : > { %2883 = vmatmul.mubr.bf16.gmra.mrb[52].mxu1 %v4392_v63  ;;  %3957 = vmatpush3.bf16.msra.mxu0 %v4395_v2  ;;  %v4466_v63 = vld [vmem:[%s5350_s1 + $0x5a0] sm:$0xff]   ;;  %v4469_v2 = vld [vmem:[%s5350_s1 + $0x528] sm:$0xff]  }
  0x91   : > { %3997 = vmatpush3.bf16.msra.mxu1 %v4396_v3  ;;  %3958 = vmatprep.subr.bf16.mxu0 %v4397_v4  ;;  %v4470_v3 = vld [vmem:[%s5350_s1 + $0x5a8] sm:$0xff]   ;;  %v4471_v4 = vld [vmem:[%s4657_s27 + $0x29c] ss:$100 sps:$4 sm:$0xff]  }
  0x92   : > { %3998 = vmatprep.subr.bf16.mxu1 %v4398_v5  ;;  %2825 = vmatprep.mubr.bf16.mxu0 %v4401_v8  ;;  %v4473_v5 = vld [vmem:[%s4657_s27 + $0x2a4] ss:$100 sps:$4 sm:$0xff]   ;;  %v4477_v8 = vld [vmem:[%s5350_s1 + $0x570] sm:$0xff]  }
  0x93   : > { %2890 = vmatprep.mubr.bf16.mxu1 %v4403_v9  ;;  %v4478_v9 = vld [vmem:[%s5350_s1 + $0x5f0] sm:$0xff]  }
  0x94   : > { %3959 = vmatpush3.bf16.msra.mxu0 %v4399_v6  ;;  %v4475_v6 = vld [vmem:[%s4657_s27 + $0x298] ss:$100 sps:$4 sm:$0xff]  }
  0x95   : > { %3999 = vmatpush3.bf16.msra.mxu1 %v4400_v7  ;;  %3960 = vmatprep.subr.bf16.mxu0 %v4407_v12  ;;  %v4476_v7 = vld [vmem:[%s4657_s27 + $0x2a0] ss:$100 sps:$4 sm:$0xff]   ;;  %v4481_v12 = vld [vmem:[%s5350_s1 + $0x578] sm:$0xff]  }
  0x96   : > { %4000 = vmatprep.subr.bf16.mxu1 %v4408_v13  ;;  %v4482_v13 = vld [vmem:[%s5350_s1 + $0x5f8] sm:$0xff]  }
  0x97   : > { %2826 = vmatmul.mubr.bf16.gmra.mrb[56].mxu0 %v4405_v10  ;;  %v4479_v10 = vld [vmem:[%s5350_s1 + $0x530] sm:$0xff]  }
  0x98   : > { %2891 = vmatmul.mubr.bf16.gmra.mrb[56].mxu1 %v4406_v11  ;;  %3961 = vmatpush3.bf16.msra.mxu0 %v4409_v14  ;;  %v4480_v11 = vld [vmem:[%s5350_s1 + $0x5b0] sm:$0xff]   ;;  %v4483_v14 = vld [vmem:[%s5350_s1 + $0x538] sm:$0xff]  }
  0x99   : > { %4001 = vmatpush3.bf16.msra.mxu1 %v4410_v15  ;;  %3962 = vmatprep.subr.bf16.mxu0 %v4411_v16  ;;  %v4484_v15 = vld [vmem:[%s5350_s1 + $0x5b8] sm:$0xff]   ;;  %v4485_v16 = vld [vmem:[%s4657_s27 + $0x50] ss:$100 sps:$4 sm:$0xff]  }
  0x9a   : > { %4002 = vmatprep.subr.bf16.mxu1 %v4412_v17  ;;  %2833 = vmatprep.mubr.bf16.mxu0 %v4415_v20  ;;  %v4487_v17 = vld [vmem:[%s4657_s27 + $0x54] ss:$100 sps:$4 sm:$0xff]  }
  0x9b   : > { %2898 = vmatprep.mubr.bf16.mxu1 %v4417_v21  ;;  %v4491_v21 = vld [vmem:[%s5350_s1 + $0x600] sm:$0xff]  }
  0x9c   : > { %3963 = vmatpush3.bf16.msra.mxu0 %v4413_v18  ;;  %v4488_v18 = vld [vmem:[%s4657_s27 + $0x58] ss:$100 sps:$4 sm:$0xff]  }
  0x9d   : > { %4003 = vmatpush3.bf16.msra.mxu1 %v4414_v19  ;;  %3964 = vmatprep.subr.bf16.mxu0 %v4421_v24  ;;  %v4490_v19 = vld [vmem:[%s4657_s27 + $0x5c] ss:$100 sps:$4 sm:$0xff]  }
  0x9e   : > { %4004 = vmatprep.subr.bf16.mxu1 %v4422_v25  ;;  %v4493_v25 = vld [vmem:[%s4657_s27 + $0x11c] ss:$100 sps:$4 sm:$0xff]  }
  0x9f   : > { %2834 = vmatmul.mubr.bf16.gmra.mrb[60].mxu0 %v4419_v22 }
  0xa0   : > { %2899 = vmatmul.mubr.bf16.gmra.mrb[60].mxu1 %v4420_v23  ;;  %3965 = vmatpush3.bf16.msra.mxu0 %v4423_v26  ;;  %v4492_v23 = vld [vmem:[%s5350_s1 + $0x608] sm:$0xff]  }
  0xa1   : > { %4005 = vmatpush3.bf16.msra.mxu1 %v4424_v27  ;;  %3966 = vmatprep.subr.bf16.mxu0 %v4425_v28 }
  0xa2   : > { %4006 = vmatprep.subr.bf16.mxu1 %v4426_v29  ;;  %2939 = vmatprep.mubr.bf16.mxu0 %v4431_v33  ;;  %v4495_v29 = vld [vmem:[%s4657_s27 + $0x124] ss:$100 sps:$4 sm:$0xff]   ;;  %v4497_v33 = vld [vmem:[%s4657_s27 + $0x118] ss:$100 sps:$4 sm:$0xff]  }
  0xa3   : > { %3004 = vmatprep.mubr.bf16.mxu1 %v4434_v35  ;;  %v4499_v35 = vld [vmem:[%s5350_s1 + $0x610] sm:$0xff]  }
  0xa4   : > { %3967 = vmatpush3.bf16.msra.mxu0 %v4427_v30 }
  0xa5   : > { %4007 = vmatpush3.bf16.msra.mxu1 %v4428_v31  ;;  %4032 = vmatprep.subr.bf16.mxu0 %v4435_v36 }
  0xa6   : > { %4072 = vmatprep.subr.bf16.mxu1 %v4436_v37  ;;  %v4498_v37 = vld [vmem:[%s4657_s27 + $0x120] ss:$100 sps:$4 sm:$0xff]  }
  0xa7   : > { %2940 = vmatmul.mubr.bf16.vlgmr.msra.gmra.mrb[64].mxu0 %v4429_v32 }
  0xa8   : > { %3005 = vmatmul.mubr.bf16.vlgmr.msra.gmra.mrb[64].mxu1 %v4432_v34  ;;  %4033 = vmatpush3.bf16.msra.mxu0 %v4437_v38 }
  0xa9   : > { %4073 = vmatpush3.bf16.msra.mxu1 %v4438_v39  ;;  %4034 = vmatprep.subr.bf16.mxu0 %v4439_v40  ;;  %v4501_v39 = vld [vmem:[%s4657_s27 + $0x1e4] ss:$100 sps:$4 sm:$0xff]   ;;  %v4500_v40 = vld [vmem:[%s5350_s1 + $0x618] sm:$0xff]  }
  0xaa   : > { %4074 = vmatprep.subr.bf16.mxu1 %v4440_v41  ;;  %2947 = vmatprep.mubr.bf16.mxu0 %v4443_v44  ;;  %v4503_v41 = vld [vmem:[%s4657_s27 + $0x1ec] ss:$100 sps:$4 sm:$0xff]  }
  0xab   : > { %3012 = vmatprep.mubr.bf16.mxu1 %v4445_v45 }
  0xac   : > { %4035 = vmatpush3.bf16.msra.mxu0 %v4441_v42 }
  0xad   : > { %4075 = vmatpush3.bf16.msra.mxu1 %v4442_v43  ;;  %4036 = vmatprep.subr.bf16.mxu0 %v4449_v48  ;;  %v4505_v43 = vld [vmem:[%s4657_s27 + $0x1e0] ss:$100 sps:$4 sm:$0xff]  }
  0xae   : > { %4076 = vmatprep.subr.bf16.mxu1 %v4450_v49 }
  0xaf   : > { %2948 = vmatmul.mubr.bf16.gmra.mrb[68].mxu0 %v4447_v46  ;;  %v4507_v46 = vld [vmem:[%s5350_s1 + $0x620] sm:$0xff]  }
  0xb0   : > { %3013 = vmatmul.mubr.bf16.gmra.mrb[68].mxu1 %v4448_v47  ;;  %4037 = vmatpush3.bf16.msra.mxu0 %v4451_v50  ;;  %v4506_v50 = vld [vmem:[%s4657_s27 + $0x1e8] ss:$100 sps:$4 sm:$0xff]  }
  0xb1   : > { %4077 = vmatpush3.bf16.msra.mxu1 %v4452_v51  ;;  %4038 = vmatprep.subr.bf16.mxu0 %v4453_v52  ;;  %v4509_v51 = vld [vmem:[%s4657_s27 + $0x2ac] ss:$100 sps:$4 sm:$0xff]   ;;  %v4511_v52 = vld [vmem:[%s4657_s27 + $0x2b4] ss:$100 sps:$4 sm:$0xff]  }
  0xb2   : > { %4078 = vmatprep.subr.bf16.mxu1 %v4454_v53  ;;  %2955 = vmatprep.mubr.bf16.mxu0 %v4457_v56  ;;  %v4508_v56 = vld [vmem:[%s5350_s1 + $0x628] sm:$0xff]  }
  0xb3   : > { %3020 = vmatprep.mubr.bf16.mxu1 %v4459_v57 }
  0xb4   : > { %4039 = vmatpush3.bf16.msra.mxu0 %v4455_v54 }
  0xb5   : > { %4079 = vmatpush3.bf16.msra.mxu1 %v4456_v55  ;;  %4040 = vmatprep.subr.bf16.mxu0 %v4463_v60 }
  0xb6   : > { %4080 = vmatprep.subr.bf16.mxu1 %v4464_v61 }
  0xb7   : > { %2956 = vmatmul.mubr.bf16.gmra.mrb[72].mxu0 %v4461_v58  ;;  %v4515_v58 = vld [vmem:[%s5350_s1 + $0x630] sm:$0xff]  }
  0xb8   : > { %3021 = vmatmul.mubr.bf16.gmra.mrb[72].mxu1 %v4462_v59  ;;  %4041 = vmatpush3.bf16.msra.mxu0 %v4465_v62  ;;  %v5269_v59 = vld [vmem:[%s5351_s2] ss:$0 sm:$0xff]  ;;  %v4513_v62 = vld [vmem:[%s4657_s27 + $0x2a8] ss:$100 sps:$4 sm:$0xff]  }
  0xb9   : > { %4081 = vmatpush3.bf16.msra.mxu1 %v4466_v63  ;;  %4042 = vmatprep.subr.bf16.mxu0 %v4467_v0 }
  0xba   : > { %4082 = vmatprep.subr.bf16.mxu1 %v4468_v1  ;;  %2963 = vmatprep.mubr.bf16.mxu0 %v4471_v4 }
  0xbb   : > { %3028 = vmatprep.mubr.bf16.mxu1 %v4473_v5  ;;  %v4514_v5 = vld [vmem:[%s4657_s27 + $0x2b0] ss:$100 sps:$4 sm:$0xff]  }
  0xbc   : > { %4043 = vmatpush3.bf16.msra.mxu0 %v4469_v2 }
  0xbd   : > { %4083 = vmatpush3.bf16.msra.mxu1 %v4470_v3  ;;  %4044 = vmatprep.subr.bf16.mxu0 %v4477_v8 }
  0xbe   : > { %4084 = vmatprep.subr.bf16.mxu1 %v4478_v9 }
  0xbf   : > { %2964 = vmatmul.mubr.bf16.gmra.mrb[76].mxu0 %v4475_v6  ;;  %v4517_v6 = vld [vmem:[%s4657_s27 + $0x60] ss:$100 sps:$4 sm:$0xff]  }
  0xc0   : > { %3029 = vmatmul.mubr.bf16.gmra.mrb[76].mxu1 %v4476_v7  ;;  %4045 = vmatpush3.bf16.msra.mxu0 %v4479_v10 }
  0xc1   : > { %4085 = vmatpush3.bf16.msra.mxu1 %v4480_v11  ;;  %4046 = vmatprep.subr.bf16.mxu0 %v4481_v12  ;;  %v4518_v11 = vld [vmem:[%s4657_s27 + $0x1f0] ss:$100 sps:$4 sm:$0xff]  }
  0xc2   : > { %4086 = vmatprep.subr.bf16.mxu1 %v4482_v13  ;;  %3069 = vmatprep.mubr.bf16.mxu0 %v4487_v17 }
  0xc3   : > { %3134 = vmatprep.mubr.bf16.mxu1 %v4490_v19 }
  0xc4   : > { %4047 = vmatpush3.bf16.msra.mxu0 %v4483_v14 }
  0xc5   : > { %4087 = vmatpush3.bf16.msra.mxu1 %v4484_v15  ;;  %4124 = vmatprep.subr.bf16.mxu0 %v4491_v21 }
  0xc6   : > { %4148 = vmatprep.subr.bf16.mxu1 %v4491_v21 }
  0xc7   : > { %3070 = vmatmul.mubr.bf16.vlgmr.msra.gmra.mrb[80].mxu0 %v4485_v16 }
  0xc8   : > { %3135 = vmatmul.mubr.bf16.vlgmr.msra.gmra.mrb[80].mxu1 %v4488_v18  ;;  %4125 = vmatpush3.bf16.msra.mxu0 %v4491_v21  ;;  %v4516_v18 = vld [vmem:[%s5350_s1 + $0x638] sm:$0xff]  }
  0xc9   : > { %4156 = vmatpush3.bf16.msra.mxu1 %v4491_v21  ;;  %4126 = vmatprep.subr.bf16.mxu0 %v4492_v23 }
  0xca   : > { %4149 = vmatprep.subr.bf16.mxu1 %v4492_v23  ;;  %3077 = vmatprep.mubr.bf16.mxu0 %v4493_v25 }
  0xcb   : > { %3142 = vmatprep.mubr.bf16.mxu1 %v4495_v29 }
  0xcc   : > { %4127 = vmatpush3.bf16.msra.mxu0 %v4492_v23 }
  0xcd   : > { %4157 = vmatpush3.bf16.msra.mxu1 %v4492_v23  ;;  %4128 = vmatprep.subr.bf16.mxu0 %v4499_v35 }
  0xce   : > { %4150 = vmatprep.subr.bf16.mxu1 %v4499_v35 }
  0xcf   : > { %3078 = vmatmul.mubr.bf16.gmra.mrb[84].mxu0 %v4497_v33 }
  0xd0   : > { %3143 = vmatmul.mubr.bf16.gmra.mrb[84].mxu1 %v4498_v37  ;;  %3085 = vmatprep.mubr.bf16.mxu0 %v4501_v39 }
  0xd1   : > { %4129 = vmatpush3.bf16.msra.mxu0 %v4499_v35  ;;  %3150 = vmatprep.mubr.bf16.mxu1 %v4503_v41 }
  0xd2   : > { %4158 = vmatpush3.bf16.msra.mxu1 %v4499_v35  ;;  %4130 = vmatprep.subr.bf16.mxu0 %v4500_v40 }
  0xd3   : > { %4151 = vmatprep.subr.bf16.mxu1 %v4500_v40 }
  0xd5   : > { %4131 = vmatpush3.bf16.msra.mxu0 %v4500_v40 }
  0xd6   : > { %4159 = vmatpush3.bf16.msra.mxu1 %v4500_v40  ;;  %4132 = vmatprep.subr.bf16.mxu0 %v4507_v46 }
  0xd7   : > { %3086 = vmatmul.mubr.bf16.gmra.mrb[88].mxu0 %v4505_v43  ;;  %4152 = vmatprep.subr.bf16.mxu1 %v4507_v46 }
  0xd8   : > { %3151 = vmatmul.mubr.bf16.gmra.mrb[88].mxu1 %v4506_v50  ;;  %3093 = vmatprep.mubr.bf16.mxu0 %v4509_v51 }
  0xd9   : > { %4133 = vmatpush3.bf16.msra.mxu0 %v4507_v46  ;;  %3158 = vmatprep.mubr.bf16.mxu1 %v4511_v52 }
  0xda   : > { %4160 = vmatpush3.bf16.msra.mxu1 %v4507_v46  ;;  %4134 = vmatprep.subr.bf16.mxu0 %v4508_v56 }
  0xdb   : > { %4153 = vmatprep.subr.bf16.mxu1 %v4508_v56 }
  0xdd   : > { %4135 = vmatpush3.bf16.msra.mxu0 %v4508_v56 }
  0xde   : > { %4161 = vmatpush3.bf16.msra.mxu1 %v4508_v56  ;;  %4136 = vmatprep.subr.bf16.mxu0 %v4515_v58 }
  0xdf   : > { %3094 = vmatmul.mubr.bf16.gmra.mrb[92].mxu0 %v4513_v62  ;;  %4154 = vmatprep.subr.bf16.mxu1 %v4515_v58 }
  0xe0   : > { %3159 = vmatmul.mubr.bf16.gmra.mrb[92].mxu1 %v4514_v5  ;;  %4140 = vmatprep.mubr.bf16.mxu0 %v4517_v6 }
  0xe1   : > { %4137 = vmatpush3.bf16.msra.mxu0 %v4515_v58  ;;  %4144 = vmatprep.mubr.bf16.mxu1 %v4518_v11 }
  0xe2   : > { %4162 = vmatpush3.bf16.msra.mxu1 %v4515_v58  ;;  %4138 = vmatprep.subr.bf16.mxu0 %v4516_v18 }
  0xe3   : > { %4155 = vmatprep.subr.bf16.mxu1 %v4516_v18 }
  0xe5   : > { %4139 = vmatpush3.bf16.msra.mxu0 %v4516_v18 }
  0xe6   : > { %4163 = vmatpush3.bf16.msra.mxu1 %v4516_v18 }
  0xfa   : > { %v3648_v20 = vpop.f32.mrb[0].mxu0 }
  0xfb   : > { %v3688_v22 = vpop.f32.mrb[0].mxu1  ;;  %v3649_v24 = vpop.f32.mrb[1].mxu0 }
  0xfc   : > { %v5236_v26 = vadd.f32 %v3649_v24, %v3648_v20  ;;  %v3689_v27 = vpop.f32.mrb[1].mxu1  ;;  %v3651_v28 = vpop.f32.mrb[2].mxu0 }
  0xfd   : > { %v5239_v30 = vadd.f32 %v3689_v27, %v3688_v22  ;;  %v3691_v31 = vpop.f32.mrb[2].mxu1  ;;  %v3652_v32 = vpop.f32.mrb[3].mxu0  ;;  %v4519_v27 = vld [vmem:[%s4657_s27 + $0x128] ss:$100 sps:$4 sm:$0xff]  }
  0xfe   : > { %v3653_v34 = vadd.f32 %v3652_v32, %v3651_v28  ;;  %v3692_v36 = vpop.f32.mrb[3].mxu1  ;;  %v2422_v63 = vadd.f32 %v5236_v26, %v5269_v59  ;;  %v4520_v28 = vld [vmem:[%s4657_s27 + $0x2b8] ss:$100 sps:$4 sm:$0xff]   ;;  %4141 = vmatmul.mubr.bf16.vlgmr.msra.gmra.mrb[96].mxu0 %v4519_v27  ;;  %s3624_s27 = sshll.u32 %s5354_s13, 3 }
  0xff   : > { %v5246_v38 = vadd.f32 %v3692_v36, %v3691_v31  ;;  %4145 = vmatmul.mubr.bf16.vlgmr.msra.gmra.mrb[96].mxu1 %v4520_v28  ;;  %s170_s9 = scalar_lea.vmem %s5352_s3, %s3624_s27 }
 0x100   : > { %v2425_v0 = vadd.f32 %v3653_v34, %v5269_v59  ;;  %v2487_v12 = vadd.f32 %v5239_v30, %v2422_v63 }
 0x102   : > { %v3654_v42 = vpop.f32.mrb[4].mxu0  ;;  %v2490_v13 = vadd.f32 %v5246_v38, %v2425_v0 }
 0x103   : > { %v3694_v44 = vpop.f32.mrb[4].mxu1  ;;  %v3655_v45 = vpop.f32.mrb[5].mxu0 }
 0x104   : > { %v3656_v47 = vadd.f32 %v3655_v45, %v3654_v42  ;;  %v3695_v48 = vpop.f32.mrb[5].mxu1  ;;  %v3657_v49 = vpop.f32.mrb[6].mxu0 }
 0x105   : > { %v3696_v53 = vadd.f32 %v3695_v48, %v3694_v44  ;;  %v3697_v54 = vpop.f32.mrb[6].mxu1  ;;  %v3658_v55 = vpop.f32.mrb[7].mxu0 }
 0x106   : > { %v3659_v57 = vadd.f32 %v3658_v55, %v3657_v49  ;;  %v3698_v60 = vpop.f32.mrb[7].mxu1  ;;  %v2430_v1 = vadd.f32 %v3656_v47, %v5269_v59 }
 0x107   : > { %v3699_v7 = vadd.f32 %v3698_v60, %v3697_v54 }
 0x108   : > { %v2433_v2 = vadd.f32 %v3659_v57, %v5269_v59  ;;  %v5282_v14 = vadd.f32 %v3696_v53, %v2430_v1 }
 0x10a   : > { %v3660_v61 = vpop.f32.mrb[8].mxu0  ;;  %v5287_v19 = vadd.f32 %v3699_v7, %v2433_v2 }
 0x10b   : > { %v3700_v3 = vpop.f32.mrb[8].mxu1  ;;  %v3661_v4 = vpop.f32.mrb[9].mxu0 }
 0x10c   : > { %v3662_v8 = vadd.f32 %v3661_v4, %v3660_v61  ;;  %v3701_v9 = vpop.f32.mrb[9].mxu1  ;;  %v3663_v10 = vpop.f32.mrb[10].mxu0 }
 0x10d   : > { %v3702_v15 = vadd.f32 %v3701_v9, %v3700_v3  ;;  %v3703_v16 = vpop.f32.mrb[10].mxu1  ;;  %v3664_v17 = vpop.f32.mrb[11].mxu0 }
 0x10e   : > { %v2438_v20 = vadd.f32 %v3662_v8, %v5269_v59  ;;  %v3665_v21 = vadd.f32 %v3664_v17, %v3663_v10  ;;  %v3704_v22 = vpop.f32.mrb[11].mxu1 }
 0x10f   : > { %v3705_v23 = vadd.f32 %v3704_v22, %v3703_v16 }
 0x110   : > { %v5290_v24 = vadd.f32 %v3702_v15, %v2438_v20  ;;  %v2441_v25 = vadd.f32 %v3665_v21, %v5269_v59 }
 0x112   : > { %v5293_v26 = vadd.f32 %v3705_v23, %v2441_v25  ;;  %v3666_v29 = vpop.f32.mrb[12].mxu0 }
 0x113   : > { %v3706_v30 = vpop.f32.mrb[12].mxu1  ;;  %v3667_v31 = vpop.f32.mrb[13].mxu0 }
 0x114   : > { %v3707_v32 = vpop.f32.mrb[13].mxu1  ;;  %v3668_v33 = vadd.f32 %v3667_v31, %v3666_v29  ;;  %v3669_v35 = vpop.f32.mrb[14].mxu0 }
 0x115   : > { %v3708_v34 = vadd.f32 %v3707_v32, %v3706_v30  ;;  %v3709_v36 = vpop.f32.mrb[14].mxu1  ;;  %v3670_v37 = vpop.f32.mrb[15].mxu0 }
 0x116   : > { %v3710_v38 = vpop.f32.mrb[15].mxu1  ;;  %v2446_v39 = vadd.f32 %v3668_v33, %v5269_v59  ;;  %v3671_v40 = vadd.f32 %v3670_v37, %v3669_v35 }
 0x117   : > { %v3711_v41 = vadd.f32 %v3710_v38, %v3709_v36 }
 0x118   : > { %v2511_v42 = vadd.f32 %v3708_v34, %v2446_v39  ;;  %v2449_v43 = vadd.f32 %v3671_v40, %v5269_v59 }
 0x11a   : > { %v5299_v44 = vadd.f32 %v3711_v41, %v2449_v43  ;;  %v3728_v45 = vpop.f32.mrb[16].mxu0 }
 0x11b   : > { %v3729_v46 = vpop.f32.mrb[17].mxu0  ;;  %v3768_v47 = vpop.f32.mrb[16].mxu1 }
 0x11c   : > { %v3730_v48 = vadd.f32 %v3729_v46, %v3728_v45  ;;  %v3731_v49 = vpop.f32.mrb[18].mxu0  ;;  %v3769_v50 = vpop.f32.mrb[17].mxu1 }
 0x11d   : > { %v3732_v51 = vpop.f32.mrb[19].mxu0  ;;  %v3770_v53 = vadd.f32 %v3769_v50, %v3768_v47  ;;  %v3771_v54 = vpop.f32.mrb[18].mxu1 }
 0x11e   : > { %v2552_v52 = vadd.f32 %v3730_v48, %v2487_v12  ;;  %v3733_v55 = vadd.f32 %v3732_v51, %v3731_v49  ;;  %v3772_v56 = vpop.f32.mrb[19].mxu1 }
 0x11f   : > { %v3773_v60 = vadd.f32 %v3772_v56, %v3771_v54 }
 0x120   : > { %v2617_v57 = vadd.f32 %v3770_v53, %v2552_v52  ;;  %v2555_v58 = vadd.f32 %v3733_v55, %v2490_v13 }
 0x122   : > { %v5301_v61 = vadd.f32 %v3773_v60, %v2555_v58  ;;  %v3734_v59 = vpop.f32.mrb[20].mxu0 }
 0x123   : > { %v3774_v62 = vpop.f32.mrb[20].mxu1  ;;  %v3735_v63 = vpop.f32.mrb[21].mxu0 }
 0x124   : > { %v3736_v0 = vadd.f32 %v3735_v63, %v3734_v59  ;;  %v3775_v1 = vpop.f32.mrb[21].mxu1  ;;  %v3737_v2 = vpop.f32.mrb[22].mxu0 }
 0x125   : > { %v3776_v3 = vadd.f32 %v3775_v1, %v3774_v62  ;;  %v3777_v4 = vpop.f32.mrb[22].mxu1  ;;  %v3738_v5 = vpop.f32.mrb[23].mxu0 }
 0x126   : > { %v2560_v6 = vadd.f32 %v3736_v0, %v5282_v14  ;;  %v3739_v7 = vadd.f32 %v3738_v5, %v3737_v2  ;;  %v3778_v8 = vpop.f32.mrb[23].mxu1 }
 0x127   : > { %v3779_v9 = vadd.f32 %v3778_v8, %v3777_v4 }
 0x128   : > { %v2625_v10 = vadd.f32 %v3776_v3, %v2560_v6  ;;  %v2563_v11 = vadd.f32 %v3739_v7, %v5287_v19 }
 0x12a   : > { %v5305_v12 = vadd.f32 %v3779_v9, %v2563_v11  ;;  %v3740_v13 = vpop.f32.mrb[24].mxu0 }
 0x12b   : > { %v3780_v15 = vpop.f32.mrb[24].mxu1  ;;  %v3741_v16 = vpop.f32.mrb[25].mxu0 }
 0x12c   : > { %v3781_v17 = vpop.f32.mrb[25].mxu1  ;;  %v3742_v18 = vadd.f32 %v3741_v16, %v3740_v13  ;;  %v3743_v21 = vpop.f32.mrb[26].mxu0 }
 0x12d   : > { %v3782_v20 = vadd.f32 %v3781_v17, %v3780_v15  ;;  %v3783_v22 = vpop.f32.mrb[26].mxu1  ;;  %v3744_v23 = vpop.f32.mrb[27].mxu0 }
 0x12e   : > { %v3784_v25 = vpop.f32.mrb[27].mxu1  ;;  %v2568_v14 = vadd.f32 %v3742_v18, %v5290_v24  ;;  %v3745_v27 = vadd.f32 %v3744_v23, %v3743_v21 }
 0x12f   : > { %v3785_v28 = vadd.f32 %v3784_v25, %v3783_v22 }
 0x130   : > { %v2633_v29 = vadd.f32 %v3782_v20, %v2568_v14  ;;  %v2571_v30 = vadd.f32 %v3745_v27, %v5293_v26 }
 0x132   : > { %v5309_v19 = vadd.f32 %v3785_v28, %v2571_v30  ;;  %v3746_v31 = vpop.f32.mrb[28].mxu0 }
 0x133   : > { %v3786_v32 = vpop.f32.mrb[28].mxu1  ;;  %v3747_v33 = vpop.f32.mrb[29].mxu0 }
 0x134   : > { %v3748_v34 = vadd.f32 %v3747_v33, %v3746_v31  ;;  %v3787_v35 = vpop.f32.mrb[29].mxu1  ;;  %v3749_v36 = vpop.f32.mrb[30].mxu0 }
 0x135   : > { %v3788_v37 = vadd.f32 %v3787_v35, %v3786_v32  ;;  %v3789_v38 = vpop.f32.mrb[30].mxu1  ;;  %v3750_v39 = vpop.f32.mrb[31].mxu0 }
 0x136   : > { %v2576_v40 = vadd.f32 %v3748_v34, %v2511_v42  ;;  %v3751_v41 = vadd.f32 %v3750_v39, %v3749_v36  ;;  %v3790_v43 = vpop.f32.mrb[31].mxu1 }
 0x137   : > { %v3791_v24 = vadd.f32 %v3790_v43, %v3789_v38 }
 0x138   : > { %v2641_v45 = vadd.f32 %v3788_v37, %v2576_v40  ;;  %v2579_v46 = vadd.f32 %v3751_v41, %v5299_v44 }
 0x13a   : > { %v5312_v47 = vadd.f32 %v3791_v24, %v2579_v46  ;;  %v3808_v26 = vpop.f32.mrb[32].mxu0 }
 0x13b   : > { %v3848_v48 = vpop.f32.mrb[32].mxu1  ;;  %v3809_v49 = vpop.f32.mrb[33].mxu0 }
 0x13c   : > { %v3810_v50 = vadd.f32 %v3809_v49, %v3808_v26  ;;  %v3849_v51 = vpop.f32.mrb[33].mxu1  ;;  %v3811_v52 = vpop.f32.mrb[34].mxu0 }
 0x13d   : > { %v3850_v53 = vadd.f32 %v3849_v51, %v3848_v48  ;;  %v3851_v54 = vpop.f32.mrb[34].mxu1  ;;  %v3812_v55 = vpop.f32.mrb[35].mxu0 }
 0x13e   : > { %v2682_v56 = vadd.f32 %v3810_v50, %v2617_v57  ;;  %v3813_v58 = vadd.f32 %v3812_v55, %v3811_v52  ;;  %v3852_v42 = vpop.f32.mrb[35].mxu1 }
 0x13f   : > { %v3853_v60 = vadd.f32 %v3852_v42, %v3851_v54 }
 0x140   : > { %v2747_v59 = vadd.f32 %v3850_v53, %v2682_v56  ;;  %v2685_v62 = vadd.f32 %v3813_v58, %v5301_v61 }
 0x142   : > { %v5315_v63 = vadd.f32 %v3853_v60, %v2685_v62  ;;  %v3814_v44 = vpop.f32.mrb[36].mxu0 }
 0x143   : > { %v3854_v0 = vpop.f32.mrb[36].mxu1  ;;  %v3815_v1 = vpop.f32.mrb[37].mxu0 }
 0x144   : > { %v3855_v2 = vpop.f32.mrb[37].mxu1  ;;  %v3816_v3 = vadd.f32 %v3815_v1, %v3814_v44  ;;  %v3817_v5 = vpop.f32.mrb[38].mxu0 }
 0x145   : > { %v3856_v4 = vadd.f32 %v3855_v2, %v3854_v0  ;;  %v3857_v6 = vpop.f32.mrb[38].mxu1  ;;  %v3818_v7 = vpop.f32.mrb[39].mxu0 }
 0x146   : > { %v3858_v8 = vpop.f32.mrb[39].mxu1  ;;  %v2690_v9 = vadd.f32 %v3816_v3, %v2625_v10  ;;  %v3819_v57 = vadd.f32 %v3818_v7, %v3817_v5 }
 0x147   : > { %v3859_v11 = vadd.f32 %v3858_v8, %v3857_v6 }
 0x148   : > { %v2755_v13 = vadd.f32 %v3856_v4, %v2690_v9  ;;  %v2693_v15 = vadd.f32 %v3819_v57, %v5305_v12 }
 0x14a   : > { %v5318_v16 = vadd.f32 %v3859_v11, %v2693_v15  ;;  %v3820_v61 = vpop.f32.mrb[40].mxu0 }
 0x14b   : > { %v3860_v17 = vpop.f32.mrb[40].mxu1  ;;  %v3821_v18 = vpop.f32.mrb[41].mxu0 }
 0x14c   : > { %v3822_v20 = vadd.f32 %v3821_v18, %v3820_v61  ;;  %v3861_v21 = vpop.f32.mrb[41].mxu1  ;;  %v3823_v22 = vpop.f32.mrb[42].mxu0 }
 0x14d   : > { %v3862_v23 = vadd.f32 %v3861_v21, %v3860_v17  ;;  %v3863_v25 = vpop.f32.mrb[42].mxu1  ;;  %v3824_v14 = vpop.f32.mrb[43].mxu0 }
 0x14e   : > { %v2698_v27 = vadd.f32 %v3822_v20, %v2633_v29  ;;  %v3825_v28 = vadd.f32 %v3824_v14, %v3823_v22  ;;  %v3864_v30 = vpop.f32.mrb[43].mxu1 }
 0x14f   : > { %v3865_v10 = vadd.f32 %v3864_v30, %v3863_v25 }
 0x150   : > { %v2763_v31 = vadd.f32 %v3862_v23, %v2698_v27  ;;  %v2701_v32 = vadd.f32 %v3825_v28, %v5309_v19 }
 0x152   : > { %v5321_v33 = vadd.f32 %v3865_v10, %v2701_v32  ;;  %v3826_v12 = vpop.f32.mrb[44].mxu0 }
 0x153   : > { %v3866_v34 = vpop.f32.mrb[44].mxu1  ;;  %v3827_v35 = vpop.f32.mrb[45].mxu0 }
 0x154   : > { %v3828_v36 = vadd.f32 %v3827_v35, %v3826_v12  ;;  %v3867_v37 = vpop.f32.mrb[45].mxu1  ;;  %v3829_v38 = vpop.f32.mrb[46].mxu0 }
 0x155   : > { %v3868_v39 = vadd.f32 %v3867_v37, %v3866_v34  ;;  %v3869_v40 = vpop.f32.mrb[46].mxu1  ;;  %v3830_v41 = vpop.f32.mrb[47].mxu0 }
 0x156   : > { %v2706_v43 = vadd.f32 %v3828_v36, %v2641_v45  ;;  %v3831_v24 = vadd.f32 %v3830_v41, %v3829_v38  ;;  %v3870_v29 = vpop.f32.mrb[47].mxu1 }
 0x157   : > { %v3871_v46 = vadd.f32 %v3870_v29, %v3869_v40 }
 0x158   : > { %v2771_v26 = vadd.f32 %v3868_v39, %v2706_v43  ;;  %v2709_v48 = vadd.f32 %v3831_v24, %v5312_v47 }
 0x15a   : > { %v5324_v49 = vadd.f32 %v3871_v46, %v2709_v48  ;;  %v3888_v19 = vpop.f32.mrb[48].mxu0 }
 0x15b   : > { %v3928_v50 = vpop.f32.mrb[48].mxu1  ;;  %v3889_v51 = vpop.f32.mrb[49].mxu0 }
 0x15c   : > { %v3890_v52 = vadd.f32 %v3889_v51, %v3888_v19  ;;  %v3929_v53 = vpop.f32.mrb[49].mxu1  ;;  %v3891_v54 = vpop.f32.mrb[50].mxu0 }
 0x15d   : > { %v3930_v55 = vadd.f32 %v3929_v53, %v3928_v50  ;;  %v3931_v56 = vpop.f32.mrb[50].mxu1  ;;  %v3892_v58 = vpop.f32.mrb[51].mxu0 }
 0x15e   : > { %v2812_v42 = vadd.f32 %v3890_v52, %v2747_v59  ;;  %v3893_v60 = vadd.f32 %v3892_v58, %v3891_v54  ;;  %v3932_v45 = vpop.f32.mrb[51].mxu1 }
 0x15f   : > { %v3933_v62 = vadd.f32 %v3932_v45, %v3931_v56 }
 0x160   : > { %v2877_v44 = vadd.f32 %v3930_v55, %v2812_v42  ;;  %v2815_v0 = vadd.f32 %v3893_v60, %v5315_v63 }
 0x162   : > { %v2880_v1 = vadd.f32 %v3933_v62, %v2815_v0  ;;  %v3894_v47 = vpop.f32.mrb[52].mxu0 }
 0x163   : > { %v3934_v2 = vpop.f32.mrb[52].mxu1  ;;  %v3895_v3 = vpop.f32.mrb[53].mxu0 }
 0x164   : > { %v3896_v4 = vadd.f32 %v3895_v3, %v3894_v47  ;;  %v3935_v5 = vpop.f32.mrb[53].mxu1  ;;  %v3897_v6 = vpop.f32.mrb[54].mxu0 }
 0x165   : > { %v3936_v7 = vadd.f32 %v3935_v5, %v3934_v2  ;;  %v3937_v8 = vpop.f32.mrb[54].mxu1  ;;  %v3898_v9 = vpop.f32.mrb[55].mxu0 }
 0x166   : > { %v2820_v57 = vadd.f32 %v3896_v4, %v2755_v13  ;;  %v3899_v11 = vadd.f32 %v3898_v9, %v3897_v6  ;;  %v3938_v15 = vpop.f32.mrb[55].mxu1 }
 0x167   : > { %v3939_v59 = vadd.f32 %v3938_v15, %v3937_v8 }
 0x168   : > { %v2885_v61 = vadd.f32 %v3936_v7, %v2820_v57  ;;  %v2823_v17 = vadd.f32 %v3899_v11, %v5318_v16 }
 0x16a   : > { %v5328_v18 = vadd.f32 %v3939_v59, %v2823_v17  ;;  %v3900_v63 = vpop.f32.mrb[56].mxu0 }
 0x16b   : > { %v3940_v20 = vpop.f32.mrb[56].mxu1  ;;  %v3901_v21 = vpop.f32.mrb[57].mxu0 }
 0x16c   : > { %v3902_v22 = vadd.f32 %v3901_v21, %v3900_v63  ;;  %v3941_v23 = vpop.f32.mrb[57].mxu1  ;;  %v3903_v25 = vpop.f32.mrb[58].mxu0 }
 0x16d   : > { %v3942_v14 = vadd.f32 %v3941_v23, %v3940_v20  ;;  %v3943_v27 = vpop.f32.mrb[58].mxu1  ;;  %v3904_v28 = vpop.f32.mrb[59].mxu0 }
 0x16e   : > { %v2828_v30 = vadd.f32 %v3902_v22, %v2763_v31  ;;  %v3905_v10 = vadd.f32 %v3904_v28, %v3903_v25  ;;  %v3944_v13 = vpop.f32.mrb[59].mxu1 }
 0x16f   : > { %v3945_v32 = vadd.f32 %v3944_v13, %v3943_v27 }
 0x170   : > { %v2893_v12 = vadd.f32 %v3942_v14, %v2828_v30  ;;  %v2831_v34 = vadd.f32 %v3905_v10, %v5321_v33 }
 0x172   : > { %v5331_v35 = vadd.f32 %v3945_v32, %v2831_v34  ;;  %v3906_v16 = vpop.f32.mrb[60].mxu0 }
 0x173   : > { %v3946_v36 = vpop.f32.mrb[60].mxu1  ;;  %v3907_v37 = vpop.f32.mrb[61].mxu0 }
 0x174   : > { %v3947_v38 = vpop.f32.mrb[61].mxu1  ;;  %v3908_v39 = vadd.f32 %v3907_v37, %v3906_v16  ;;  %v3909_v41 = vpop.f32.mrb[62].mxu0 }
 0x175   : > { %v3948_v40 = vadd.f32 %v3947_v38, %v3946_v36  ;;  %v3949_v43 = vpop.f32.mrb[62].mxu1  ;;  %v3910_v24 = vpop.f32.mrb[63].mxu0 }
 0x176   : > { %v3950_v29 = vpop.f32.mrb[63].mxu1  ;;  %v2836_v46 = vadd.f32 %v3908_v39, %v2771_v26  ;;  %v3911_v31 = vadd.f32 %v3910_v24, %v3909_v41 }
 0x177   : > { %v3951_v48 = vadd.f32 %v3950_v29, %v3949_v43 }
 0x178   : > { %v2901_v19 = vadd.f32 %v3948_v40, %v2836_v46  ;;  %v2839_v50 = vadd.f32 %v3911_v31, %v5324_v49 }
 0x17a   : > { %v5334_v51 = vadd.f32 %v3951_v48, %v2839_v50  ;;  %v3968_v33 = vpop.f32.mrb[64].mxu0 }
 0x17b   : > { %v3969_v52 = vpop.f32.mrb[65].mxu0  ;;  %v4008_v53 = vpop.f32.mrb[64].mxu1 }
 0x17c   : > { %v3970_v54 = vadd.f32 %v3969_v52, %v3968_v33  ;;  %v3971_v55 = vpop.f32.mrb[66].mxu0  ;;  %v4009_v56 = vpop.f32.mrb[65].mxu1 }
 0x17d   : > { %v3972_v58 = vpop.f32.mrb[67].mxu0  ;;  %v4010_v60 = vadd.f32 %v4009_v56, %v4008_v53  ;;  %v4011_v45 = vpop.f32.mrb[66].mxu1 }
 0x17e   : > { %v2942_v42 = vadd.f32 %v3970_v54, %v2877_v44  ;;  %v3973_v62 = vadd.f32 %v3972_v58, %v3971_v55  ;;  %v4012_v0 = vpop.f32.mrb[67].mxu1 }
 0x17f   : > { %v4013_v2 = vadd.f32 %v4012_v0, %v4011_v45 }
 0x180   : > { %v3007_v26 = vadd.f32 %v4010_v60, %v2942_v42  ;;  %v2945_v47 = vadd.f32 %v3973_v62, %v2880_v1 }
 0x182   : > { %v3010_v3 = vadd.f32 %v4013_v2, %v2945_v47  ;;  %v3974_v4 = vpop.f32.mrb[68].mxu0 }
 0x183   : > { %v4014_v49 = vpop.f32.mrb[68].mxu1  ;;  %v3975_v5 = vpop.f32.mrb[69].mxu0 }
 0x184   : > { %v3976_v6 = vadd.f32 %v3975_v5, %v3974_v4  ;;  %v4015_v7 = vpop.f32.mrb[69].mxu1  ;;  %v3977_v8 = vpop.f32.mrb[70].mxu0 }
 0x185   : > { %v4016_v9 = vadd.f32 %v4015_v7, %v4014_v49  ;;  %v4017_v57 = vpop.f32.mrb[70].mxu1  ;;  %v3978_v11 = vpop.f32.mrb[71].mxu0 }
 0x186   : > { %v2950_v15 = vadd.f32 %v3976_v6, %v2885_v61  ;;  %v3979_v59 = vadd.f32 %v3978_v11, %v3977_v8  ;;  %v4018_v44 = vpop.f32.mrb[71].mxu1 }
 0x187   : > { %v4019_v17 = vadd.f32 %v4018_v44, %v4017_v57 }
 0x188   : > { %v3015_v63 = vadd.f32 %v4016_v9, %v2950_v15  ;;  %v2953_v20 = vadd.f32 %v3979_v59, %v5328_v18 }
 0x18a   : > { %v3018_v21 = vadd.f32 %v4019_v17, %v2953_v20  ;;  %v3980_v1 = vpop.f32.mrb[72].mxu0 }
 0x18b   : > { %v4020_v22 = vpop.f32.mrb[72].mxu1  ;;  %v3981_v23 = vpop.f32.mrb[73].mxu0 }
 0x18c   : > { %v4021_v25 = vpop.f32.mrb[73].mxu1  ;;  %v3982_v14 = vadd.f32 %v3981_v23, %v3980_v1  ;;  %v3983_v28 = vpop.f32.mrb[74].mxu0 }
 0x18d   : > { %v4022_v27 = vadd.f32 %v4021_v25, %v4020_v22  ;;  %v4023_v30 = vpop.f32.mrb[74].mxu1  ;;  %v3984_v10 = vpop.f32.mrb[75].mxu0 }
 0x18e   : > { %v4024_v13 = vpop.f32.mrb[75].mxu1  ;;  %v2958_v32 = vadd.f32 %v3982_v14, %v2893_v12  ;;  %v3985_v34 = vadd.f32 %v3984_v10, %v3983_v28 }
 0x18f   : > { %v4025_v61 = vadd.f32 %v4024_v13, %v4023_v30 }
 0x190   : > { %v3023_v16 = vadd.f32 %v4022_v27, %v2958_v32  ;;  %v2961_v36 = vadd.f32 %v3985_v34, %v5331_v35 }
 0x192   : > { %v3026_v37 = vadd.f32 %v4025_v61, %v2961_v36  ;;  %v3986_v38 = vpop.f32.mrb[76].mxu0 }
 0x193   : > { %v4026_v18 = vpop.f32.mrb[76].mxu1  ;;  %v3987_v39 = vpop.f32.mrb[77].mxu0 }
 0x194   : > { %v3988_v40 = vadd.f32 %v3987_v39, %v3986_v38  ;;  %v4027_v41 = vpop.f32.mrb[77].mxu1  ;;  %v3989_v43 = vpop.f32.mrb[78].mxu0 }
 0x195   : > { %v4028_v24 = vadd.f32 %v4027_v41, %v4026_v18  ;;  %v4029_v29 = vpop.f32.mrb[78].mxu1  ;;  %v3990_v46 = vpop.f32.mrb[79].mxu0 }
 0x196   : > { %v2966_v31 = vadd.f32 %v3988_v40, %v2901_v19  ;;  %v3991_v48 = vadd.f32 %v3990_v46, %v3989_v43  ;;  %v4030_v50 = vpop.f32.mrb[79].mxu1 }
 0x197   : > { %v4031_v33 = vadd.f32 %v4030_v50, %v4029_v29 }
 0x198   : > { %v3031_v12 = vadd.f32 %v4028_v24, %v2966_v31  ;;  %v2969_v52 = vadd.f32 %v3991_v48, %v5334_v51 }
 0x19a   : > { %v3034_v53 = vadd.f32 %v4031_v33, %v2969_v52  ;;  %v4048_v54 = vpop.f32.mrb[80].mxu0 }
 0x19b   : > { %v4088_v35 = vpop.f32.mrb[80].mxu1  ;;  %v4049_v55 = vpop.f32.mrb[81].mxu0 }
 0x19c   : > { %v4050_v56 = vadd.f32 %v4049_v55, %v4048_v54  ;;  %v4089_v58 = vpop.f32.mrb[81].mxu1  ;;  %v4051_v42 = vpop.f32.mrb[82].mxu0 }
 0x19d   : > { %v4090_v60 = vadd.f32 %v4089_v58, %v4088_v35  ;;  %v4091_v45 = vpop.f32.mrb[82].mxu1  ;;  %v4052_v62 = vpop.f32.mrb[83].mxu0 }
 0x19e   : > { %v3072_v0 = vadd.f32 %v4050_v56, %v3007_v26  ;;  %v4053_v47 = vadd.f32 %v4052_v62, %v4051_v42  ;;  %v4092_v2 = vpop.f32.mrb[83].mxu1 }
 0x19f   : > { %v4093_v19 = vadd.f32 %v4092_v2, %v4091_v45 }
 0x1a0   : > { %v3075_v4 = vadd.f32 %v4053_v47, %v3010_v3  ;;  %v3137_v49 = vadd.f32 %v4090_v60, %v3072_v0 }
 0x1a2   : > { %v4054_v5 = vpop.f32.mrb[84].mxu0  ;;  %v5339_v6 = vadd.f32 %v4093_v19, %v3075_v4 }
 0x1a3   : > { %v4094_v51 = vpop.f32.mrb[84].mxu1  ;;  %v4055_v7 = vpop.f32.mrb[85].mxu0 }
 0x1a4   : > { %v4056_v8 = vadd.f32 %v4055_v7, %v4054_v5  ;;  %v4095_v9 = vpop.f32.mrb[85].mxu1  ;;  %v4057_v57 = vpop.f32.mrb[86].mxu0 }
 0x1a5   : > { %v4096_v11 = vadd.f32 %v4095_v9, %v4094_v51  ;;  %v4097_v15 = vpop.f32.mrb[86].mxu1  ;;  %v4058_v59 = vpop.f32.mrb[87].mxu0 }
 0x1a6   : > { %v3080_v44 = vadd.f32 %v4056_v8, %v3015_v63  ;;  %v4059_v17 = vadd.f32 %v4058_v59, %v4057_v57  ;;  %v4098_v20 = vpop.f32.mrb[87].mxu1 }
 0x1a7   : > { %v4099_v26 = vadd.f32 %v4098_v20, %v4097_v15 }
 0x1a8   : > { %v3083_v1 = vadd.f32 %v4059_v17, %v3018_v21  ;;  %v3145_v22 = vadd.f32 %v4096_v11, %v3080_v44 }
 0x1aa   : > { %v4060_v23 = vpop.f32.mrb[88].mxu0  ;;  %v3148_v3 = vadd.f32 %v4099_v26, %v3083_v1 }
 0x1ab   : > { %v4100_v25 = vpop.f32.mrb[88].mxu1  ;;  %v4061_v14 = vpop.f32.mrb[89].mxu0 }
 0x1ac   : > { %v4062_v27 = vadd.f32 %v4061_v14, %v4060_v23  ;;  %v4101_v28 = vpop.f32.mrb[89].mxu1  ;;  %v4063_v30 = vpop.f32.mrb[90].mxu0 }
 0x1ad   : > { %v4102_v10 = vadd.f32 %v4101_v28, %v4100_v25  ;;  %v4103_v13 = vpop.f32.mrb[90].mxu1  ;;  %v4064_v32 = vpop.f32.mrb[91].mxu0 }
 0x1ae   : > { %v3088_v34 = vadd.f32 %v4062_v27, %v3023_v16  ;;  %v4065_v61 = vadd.f32 %v4064_v32, %v4063_v30  ;;  %v4104_v36 = vpop.f32.mrb[91].mxu1 }
 0x1af   : > { %v4105_v38 = vadd.f32 %v4104_v36, %v4103_v13 }
 0x1b0   : > { %v3091_v63 = vadd.f32 %v4065_v61, %v3026_v37  ;;  %v3153_v18 = vadd.f32 %v4102_v10, %v3088_v34 }
 0x1b2   : > { %v4066_v39 = vpop.f32.mrb[92].mxu0  ;;  %v3156_v40 = vadd.f32 %v4105_v38, %v3091_v63 }
 0x1b3   : > { %v4106_v21 = vpop.f32.mrb[92].mxu1  ;;  %v4067_v41 = vpop.f32.mrb[93].mxu0 }
 0x1b4   : > { %v4068_v43 = vadd.f32 %v4067_v41, %v4066_v39  ;;  %v4107_v24 = vpop.f32.mrb[93].mxu1  ;;  %v4069_v29 = vpop.f32.mrb[94].mxu0 }
 0x1b5   : > { %v4108_v46 = vadd.f32 %v4107_v24, %v4106_v21  ;;  %v4109_v31 = vpop.f32.mrb[94].mxu1  ;;  %v4070_v48 = vpop.f32.mrb[95].mxu0 }
 0x1b6   : > { %v3096_v50 = vadd.f32 %v4068_v43, %v3031_v12  ;;  %v4071_v33 = vadd.f32 %v4070_v48, %v4069_v29  ;;  %v4110_v52 = vpop.f32.mrb[95].mxu1 }
 0x1b7   : > { %v4111_v54 = vadd.f32 %v4110_v52, %v4109_v31 }
 0x1b8   : > { %v3099_v16 = vadd.f32 %v4071_v33, %v3034_v53  ;;  %v3161_v35 = vadd.f32 %v4108_v46, %v3096_v50 }
 0x1ba   : > { %v3164_v55 = vadd.f32 %v4111_v54, %v3099_v16 }
 0x1d1   : > { %v4142_v56 = vpop.f32.mrb[96].mxu0 }
 0x1d2   : > { %v3210_v37 = vadd.f32 %v4142_v56, %v3145_v22  ;;  %v4146_v58 = vpop.f32.mrb[96].mxu1  ;;  %v3201_v42 = vpop.f32.mrb[97].mxu0 }
 0x1d3   : > { %v3226_v60 = vadd.f32 %v4146_v58, %v3161_v35  ;;  %v3202_v45 = vadd.f32 %v3201_v42, %v3137_v49  ;;  %v3217_v62 = vpop.f32.mrb[97].mxu1  ;;  %v4143_v0 = vpop.f32.mrb[98].mxu0 }
 0x1d4   : > { %v3234_v47 = vmax.f32 %v3210_v37, 0.0  ;;  %v3218_v2 = vadd.f32 %v3217_v62, %v3153_v18  ;;  %v3213_v19 = vadd.f32 %v4143_v0, %v3148_v3  ;;  %v4147_v4 = vpop.f32.mrb[98].mxu1  ;;  %v3204_v5 = vpop.f32.mrb[99].mxu0 }
 0x1d5   : > { %v3238_v12 = vmax.f32 %v3226_v60, 0.0  ;;  %v3232_v51 = vmax.f32 %v3202_v45, 0.0  ;;  %v3229_v7 = vadd.f32 %v4147_v4, %v3164_v55  ;;  %v3205_v53 = vadd.f32 %v3204_v5, %v5339_v6  ;;  %v3220_v8 = vpop.f32.mrb[99].mxu1 }
 0x1d6   : > { %v3236_v9 = vmax.f32 %v3218_v2, 0.0  ;;  %v3235_v57 = vmax.f32 %v3213_v19, 0.0  ;;  %v3221_v11 = vadd.f32 %v3220_v8, %v3156_v40 }
 0x1d7   : > { %v3240_v15 = vmax.f32 %v3232_v51, %v3234_v47  ;;  %v3239_v59 = vmax.f32 %v3229_v7, 0.0  ;;  %v3233_v49 = vmax.f32 %v3205_v53, 0.0 }
 0x1d8   : > { %v3242_v44 = vmax.f32 %v3236_v9, %v3238_v12  ;;  %v3237_v17 = vmax.f32 %v3221_v11, 0.0 }
 0x1d9   : > { %v3241_v20 = vmax.f32 %v3233_v49, %v3235_v57 }
 0x1da   : > { %v3244_v26 = vmax.f32 %v3240_v15, %v3242_v44  ;;  %v3243_v1 = vmax.f32 %v3237_v17, %v3239_v59 }
 0x1dc   : > { %v3245_v22 = vmax.f32 %v3241_v20, %v3243_v1 }
 0x1de   : > { %v3630_v23 = vpack.c.bf16 %v3245_v22, %v3244_v26 }
 0x1e0   : > { %3631 = vst [vmem:[%s170_s9] sm:$0xff] %v3630_v23  }
 0x1e1 PF: > { %s13_s12 = sadd.s32 1, %s4527_s12  }
 0x1e2   : > { %p10_p4 = scmp.ge.s32.totalorder %s13_s12, 4  }
 0x1e4   :  { %12 = sbr.rel (!%p10_p4) target bundleno = 1 (0x1), region = 62 }

// kernel: cnn_forward.5
= control target key start
LH: loop header
LB: loop body
LE: loop exit
PB: predicated region body
PF: predicated region fallthrough
CT: control target
= control target key end

     0   :  { %s2334_s1 = inlined_call_operand.vmem [shape: bf16[2048,128], index: 1, kind: input, shape index: {}]   ;;  %s2335_s0 = inlined_call_operand.vmem [shape: bf16[8,2048], index: 0, kind: input, shape index: {}]   ;;  %s2336_s2 = inlined_call_operand.vmem [shape: f32[1,128], index: 2, kind: input, shape index: {}]   ;;  %s2337_s3 = inlined_call_operand.vmem [shape: f32[8,128], index: 3, kind: output, shape index: {}]  }
   0x1   :  { %v1756_v0 = vld [vmem:[%s2334_s1 + $0x40] sm:$0xff]   ;;  %v1760_v4 = vld [vmem:[%s2334_s1 + $0x48] sm:$0xff]   ;;  %v1764_v8 = vld [vmem:[%s2334_s1 + $0x50] sm:$0xff]  }
   0x2   :  { %v1757_v1 = vld [vmem:[%s2334_s1 + $0xc0] sm:$0xff]   ;;  %1580 = vmatprep.subr.bf16.mxu0 %v1756_v0  ;;  %v1761_v5 = vld [vmem:[%s2334_s1 + $0xc8] sm:$0xff]   ;;  %v1765_v9 = vld [vmem:[%s2334_s1 + $0xd0] sm:$0xff]  }
   0x3   :  { %v1758_v2 = vld [vmem:[%s2334_s1] sm:$0xff]   ;;  %1602 = vmatprep.subr.bf16.mxu1 %v1757_v1  ;;  %v1762_v6 = vld [vmem:[%s2334_s1 + $0x8] sm:$0xff]   ;;  %v1766_v10 = vld [vmem:[%s2334_s1 + $0x10] sm:$0xff]  }
   0x4   :  { %v1759_v3 = vld [vmem:[%s2334_s1 + $0x80] sm:$0xff]   ;;  %1581 = vmatpush3.bf16.msra.mxu0 %v1758_v2  ;;  %v1763_v7 = vld [vmem:[%s2334_s1 + $0x88] sm:$0xff]   ;;  %v1767_v11 = vld [vmem:[%s2334_s1 + $0x90] sm:$0xff]  }
   0x5   :  { %1603 = vmatpush3.bf16.msra.mxu1 %v1759_v3  ;;  %1582 = vmatprep.subr.bf16.mxu0 %v1760_v4  ;;  %v1768_v12 = vld [vmem:[%s2334_s1 + $0x58] sm:$0xff]   ;;  %v1772_v16 = vld [vmem:[%s2334_s1 + $0x60] sm:$0xff]   ;;  %v1776_v20 = vld [vmem:[%s2334_s1 + $0x68] sm:$0xff]  }
   0x6   :  { %1604 = vmatprep.subr.bf16.mxu1 %v1761_v5  ;;  %v1769_v13 = vld [vmem:[%s2334_s1 + $0xd8] sm:$0xff]   ;;  %v1773_v17 = vld [vmem:[%s2334_s1 + $0xe0] sm:$0xff]   ;;  %v1777_v21 = vld [vmem:[%s2334_s1 + $0xe8] sm:$0xff]  }
   0x7   :  { %v1770_v14 = vld [vmem:[%s2334_s1 + $0x18] sm:$0xff]   ;;  %v1774_v18 = vld [vmem:[%s2334_s1 + $0x20] sm:$0xff]   ;;  %v1778_v22 = vld [vmem:[%s2334_s1 + $0x28] sm:$0xff]  }
   0x8   :  { %1583 = vmatpush3.bf16.msra.mxu0 %v1762_v6  ;;  %v1771_v15 = vld [vmem:[%s2334_s1 + $0x98] sm:$0xff]   ;;  %v1775_v19 = vld [vmem:[%s2334_s1 + $0xa0] sm:$0xff]   ;;  %v1779_v23 = vld [vmem:[%s2334_s1 + $0xa8] sm:$0xff]  }
   0x9   :  { %1605 = vmatpush3.bf16.msra.mxu1 %v1763_v7  ;;  %1584 = vmatprep.subr.bf16.mxu0 %v1764_v8  ;;  %v1780_v24 = vld [vmem:[%s2334_s1 + $0x70] sm:$0xff]   ;;  %v1784_v28 = vld [vmem:[%s2334_s1 + $0x78] sm:$0xff]   ;;  %v15_v32 = vld [vmem:[%s2335_s0] sm:$0xff] }
   0xa   :  { %1606 = vmatprep.subr.bf16.mxu1 %v1765_v9  ;;  %v1781_v25 = vld [vmem:[%s2334_s1 + $0xf0] sm:$0xff]   ;;  %v1785_v29 = vld [vmem:[%s2334_s1 + $0xf8] sm:$0xff]   ;;  %v16_v33 = vld [vmem:[%s2335_s0 + $0x8] sm:$0xff]  ;;  %v1436_v34 = vcombine.low %v15_v32, %v15_v32  ;;  %v1437_v35 = vcombine.high %v15_v32, %v15_v32 }
   0xb   :  { %v1782_v26 = vld [vmem:[%s2334_s1 + $0x30] sm:$0xff]   ;;  %v1786_v30 = vld [vmem:[%s2334_s1 + $0x38] sm:$0xff]   ;;  %v1438_v36 = vcombine.low %v16_v33, %v16_v33  ;;  %v1439_v37 = vcombine.high %v16_v33, %v16_v33  ;;  %v1792_v38 = vld [vmem:[%s2334_s1 + $0x140] sm:$0xff]  }
   0xc   :  { %1585 = vmatpush3.bf16.msra.mxu0 %v1766_v10  ;;  %v1783_v27 = vld [vmem:[%s2334_s1 + $0xb0] sm:$0xff]   ;;  %v1787_v31 = vld [vmem:[%s2334_s1 + $0xb8] sm:$0xff]   ;;  %v1793_v39 = vld [vmem:[%s2334_s1 + $0x1c0] sm:$0xff]   ;;  %1142 = vmatprep.mubr.bf16.mxu0 %v1437_v35 }
   0xd   :  { %1607 = vmatpush3.bf16.msra.mxu1 %v1767_v11  ;;  %1586 = vmatprep.subr.bf16.mxu0 %v1768_v12  ;;  %v1794_v40 = vld [vmem:[%s2334_s1 + $0x100] sm:$0xff]   ;;  %v1796_v42 = vld [vmem:[%s2334_s1 + $0x148] sm:$0xff]   ;;  %v1800_v46 = vld [vmem:[%s2334_s1 + $0x150] sm:$0xff]  }
   0xe   :  { %1608 = vmatprep.subr.bf16.mxu1 %v1769_v13  ;;  %1182 = vmatprep.mubr.bf16.mxu1 %v1439_v37  ;;  %v1795_v41 = vld [vmem:[%s2334_s1 + $0x180] sm:$0xff]   ;;  %v1797_v43 = vld [vmem:[%s2334_s1 + $0x1c8] sm:$0xff]   ;;  %v1801_v47 = vld [vmem:[%s2334_s1 + $0x1d0] sm:$0xff]  }
   0xf   :  { %v1798_v44 = vld [vmem:[%s2334_s1 + $0x108] sm:$0xff]   ;;  %v1802_v48 = vld [vmem:[%s2334_s1 + $0x110] sm:$0xff]   ;;  %v1804_v50 = vld [vmem:[%s2334_s1 + $0x158] sm:$0xff]  }
  0x10   :  { %1587 = vmatpush3.bf16.msra.mxu0 %v1770_v14  ;;  %v1799_v45 = vld [vmem:[%s2334_s1 + $0x188] sm:$0xff]   ;;  %v1803_v49 = vld [vmem:[%s2334_s1 + $0x190] sm:$0xff]   ;;  %v1805_v51 = vld [vmem:[%s2334_s1 + $0x1d8] sm:$0xff]  }
  0x11   :  { %1609 = vmatpush3.bf16.msra.mxu1 %v1771_v15  ;;  %1588 = vmatprep.subr.bf16.mxu0 %v1772_v16  ;;  %v1806_v52 = vld [vmem:[%s2334_s1 + $0x118] sm:$0xff]   ;;  %v1808_v54 = vld [vmem:[%s2334_s1 + $0x160] sm:$0xff]   ;;  %v1812_v58 = vld [vmem:[%s2334_s1 + $0x168] sm:$0xff]  }
  0x12   :  { %1610 = vmatprep.subr.bf16.mxu1 %v1773_v17  ;;  %v1807_v53 = vld [vmem:[%s2334_s1 + $0x198] sm:$0xff]   ;;  %v1809_v55 = vld [vmem:[%s2334_s1 + $0x1e0] sm:$0xff]   ;;  %v1813_v59 = vld [vmem:[%s2334_s1 + $0x1e8] sm:$0xff]  }
  0x13   :  { %v1810_v56 = vld [vmem:[%s2334_s1 + $0x120] sm:$0xff]   ;;  %v1814_v60 = vld [vmem:[%s2334_s1 + $0x128] sm:$0xff]   ;;  %v1816_v62 = vld [vmem:[%s2334_s1 + $0x170] sm:$0xff]  }
  0x14   :  { %1589 = vmatpush3.bf16.msra.mxu0 %v1774_v18  ;;  %v1811_v57 = vld [vmem:[%s2334_s1 + $0x1a0] sm:$0xff]   ;;  %v1815_v61 = vld [vmem:[%s2334_s1 + $0x1a8] sm:$0xff]   ;;  %v1817_v63 = vld [vmem:[%s2334_s1 + $0x1f0] sm:$0xff]  }
  0x15   :  { %1611 = vmatpush3.bf16.msra.mxu1 %v1775_v19  ;;  %1590 = vmatprep.subr.bf16.mxu0 %v1776_v20  ;;  %v1818_v0 = vld [vmem:[%s2334_s1 + $0x130] sm:$0xff]   ;;  %v1820_v2 = vld [vmem:[%s2334_s1 + $0x178] sm:$0xff]   ;;  %v1828_v12 = vld [vmem:[%s2334_s1 + $0x240] sm:$0xff]  }
  0x16   :  { %1612 = vmatprep.subr.bf16.mxu1 %v1777_v21  ;;  %v1819_v1 = vld [vmem:[%s2334_s1 + $0x1b0] sm:$0xff]   ;;  %v1821_v3 = vld [vmem:[%s2334_s1 + $0x1f8] sm:$0xff]   ;;  %v1829_v13 = vld [vmem:[%s2334_s1 + $0x2c0] sm:$0xff]  }
  0x17   :  { %v1822_v4 = vld [vmem:[%s2334_s1 + $0x138] sm:$0xff]   ;;  %v17_v6 = vld [vmem:[%s2335_s0 + $0x10] sm:$0xff]  ;;  %v1830_v14 = vld [vmem:[%s2334_s1 + $0x200] sm:$0xff]  }
  0x18   :  { %1591 = vmatpush3.bf16.msra.mxu0 %v1778_v22  ;;  %v1823_v5 = vld [vmem:[%s2334_s1 + $0x1b8] sm:$0xff]   ;;  %v1440_v7 = vcombine.low %v17_v6, %v17_v6  ;;  %v1441_v8 = vcombine.high %v17_v6, %v17_v6  ;;  %v1831_v15 = vld [vmem:[%s2334_s1 + $0x280] sm:$0xff]   ;;  %v1832_v16 = vld [vmem:[%s2334_s1 + $0x248] sm:$0xff]  }
  0x19   :  { %1613 = vmatpush3.bf16.msra.mxu1 %v1779_v23  ;;  %1592 = vmatprep.subr.bf16.mxu0 %v1780_v24  ;;  %v18_v9 = vld [vmem:[%s2335_s0 + $0x18] sm:$0xff]  ;;  %v1833_v17 = vld [vmem:[%s2334_s1 + $0x2c8] sm:$0xff]   ;;  %v1836_v20 = vld [vmem:[%s2334_s1 + $0x250] sm:$0xff]  }
  0x1a   :  { %1614 = vmatprep.subr.bf16.mxu1 %v1781_v25  ;;  %v1442_v10 = vcombine.low %v18_v9, %v18_v9  ;;  %v1443_v11 = vcombine.high %v18_v9, %v18_v9  ;;  %v1834_v18 = vld [vmem:[%s2334_s1 + $0x208] sm:$0xff]   ;;  %v1837_v21 = vld [vmem:[%s2334_s1 + $0x2d0] sm:$0xff]   ;;  %v1840_v24 = vld [vmem:[%s2334_s1 + $0x258] sm:$0xff]  }
  0x1b   :  { %v1835_v19 = vld [vmem:[%s2334_s1 + $0x288] sm:$0xff]   ;;  %v1838_v22 = vld [vmem:[%s2334_s1 + $0x210] sm:$0xff]   ;;  %v1841_v25 = vld [vmem:[%s2334_s1 + $0x2d8] sm:$0xff]  }
  0x1c   :  { %1593 = vmatpush3.bf16.msra.mxu0 %v1782_v26  ;;  %v1839_v23 = vld [vmem:[%s2334_s1 + $0x290] sm:$0xff]   ;;  %v1842_v26 = vld [vmem:[%s2334_s1 + $0x218] sm:$0xff]   ;;  %v1848_v32 = vld [vmem:[%s2334_s1 + $0x268] sm:$0xff]  }
  0x1d   :  { %1615 = vmatpush3.bf16.msra.mxu1 %v1783_v27  ;;  %1594 = vmatprep.subr.bf16.mxu0 %v1784_v28  ;;  %v1843_v27 = vld [vmem:[%s2334_s1 + $0x298] sm:$0xff]   ;;  %v1844_v28 = vld [vmem:[%s2334_s1 + $0x260] sm:$0xff]   ;;  %v1849_v33 = vld [vmem:[%s2334_s1 + $0x2e8] sm:$0xff]  }
  0x1e   :  { %1616 = vmatprep.subr.bf16.mxu1 %v1785_v29  ;;  %v1845_v29 = vld [vmem:[%s2334_s1 + $0x2e0] sm:$0xff]   ;;  %v1851_v35 = vld [vmem:[%s2334_s1 + $0x2a8] sm:$0xff]   ;;  %v1853_v37 = vld [vmem:[%s2334_s1 + $0x2f0] sm:$0xff]  }
  0x1f   :  { %v1884_v6 = vld [vmem:[%s2334_s1 + $0x368] sm:$0xff]  }
  0x20   :  { %1595 = vmatpush3.bf16.msra.mxu0 %v1786_v30  ;;  %v1846_v30 = vld [vmem:[%s2334_s1 + $0x220] sm:$0xff]   ;;  %v1887_v9 = vld [vmem:[%s2334_s1 + $0x3a8] sm:$0xff]  }
  0x21   :  { %1617 = vmatpush3.bf16.msra.mxu1 %v1787_v31  ;;  %1624 = vmatprep.subr.bf16.mxu0 %v1792_v38  ;;  %v1847_v31 = vld [vmem:[%s2334_s1 + $0x2a0] sm:$0xff]   ;;  %v1854_v38 = vld [vmem:[%s2334_s1 + $0x230] sm:$0xff]  }
  0x22   :  { %1646 = vmatprep.subr.bf16.mxu1 %v1793_v39  ;;  %v1855_v39 = vld [vmem:[%s2334_s1 + $0x2b0] sm:$0xff]  }
  0x23   :  { %1143 = vmatmul.mubr.bf16.vlgmr.msra.gmra.mrb[0].mxu0 %v1436_v34  ;;  %v1850_v34 = vld [vmem:[%s2334_s1 + $0x228] sm:$0xff]  }
  0x24   :  { %1183 = vmatmul.mubr.bf16.vlgmr.msra.gmra.mrb[0].mxu1 %v1438_v36  ;;  %1625 = vmatpush3.bf16.msra.mxu0 %v1794_v40  ;;  %v1852_v36 = vld [vmem:[%s2334_s1 + $0x270] sm:$0xff]   ;;  %v1856_v40 = vld [vmem:[%s2334_s1 + $0x278] sm:$0xff]  }
  0x25   :  { %1647 = vmatpush3.bf16.msra.mxu1 %v1795_v41  ;;  %1626 = vmatprep.subr.bf16.mxu0 %v1796_v42  ;;  %v1857_v41 = vld [vmem:[%s2334_s1 + $0x2f8] sm:$0xff]  }
  0x26   :  { %1648 = vmatprep.subr.bf16.mxu1 %v1797_v43  ;;  %1222 = vmatprep.mubr.bf16.mxu0 %v1441_v8  ;;  %v1858_v42 = vld [vmem:[%s2334_s1 + $0x238] sm:$0xff]   ;;  %v1886_v8 = vld [vmem:[%s2334_s1 + $0x328] sm:$0xff]  }
  0x27   :  { %1262 = vmatprep.mubr.bf16.mxu1 %v1443_v11  ;;  %v1859_v43 = vld [vmem:[%s2334_s1 + $0x2b8] sm:$0xff]   ;;  %v1889_v11 = vld [vmem:[%s2334_s1 + $0x3f0] sm:$0xff]  }
  0x28   :  { %1627 = vmatpush3.bf16.msra.mxu0 %v1798_v44  ;;  %v19_v44 = vld [vmem:[%s2335_s0 + $0x20] sm:$0xff] }
  0x29   :  { %1649 = vmatpush3.bf16.msra.mxu1 %v1799_v45  ;;  %1628 = vmatprep.subr.bf16.mxu0 %v1800_v46  ;;  %v20_v45 = vld [vmem:[%s2335_s0 + $0x28] sm:$0xff]  ;;  %v1444_v46 = vcombine.low %v19_v44, %v19_v44 }
  0x2a   :  { %1650 = vmatprep.subr.bf16.mxu1 %v1801_v47  ;;  %v1445_v47 = vcombine.high %v19_v44, %v19_v44 }
  0x2c   :  { %1629 = vmatpush3.bf16.msra.mxu0 %v1802_v48  ;;  %v1446_v48 = vcombine.low %v20_v45, %v20_v45 }
  0x2d   :  { %1651 = vmatpush3.bf16.msra.mxu1 %v1803_v49  ;;  %1630 = vmatprep.subr.bf16.mxu0 %v1804_v50  ;;  %v1447_v49 = vcombine.high %v20_v45, %v20_v45  ;;  %v1864_v50 = vld [vmem:[%s2334_s1 + $0x340] sm:$0xff]  }
  0x2e   :  { %1652 = vmatprep.subr.bf16.mxu1 %v1805_v51  ;;  %v1865_v51 = vld [vmem:[%s2334_s1 + $0x3c0] sm:$0xff]  }
  0x30   :  { %1631 = vmatpush3.bf16.msra.mxu0 %v1806_v52  ;;  %v1866_v52 = vld [vmem:[%s2334_s1 + $0x300] sm:$0xff]  }
  0x31   :  { %1653 = vmatpush3.bf16.msra.mxu1 %v1807_v53  ;;  %1632 = vmatprep.subr.bf16.mxu0 %v1808_v54  ;;  %v1867_v53 = vld [vmem:[%s2334_s1 + $0x380] sm:$0xff]   ;;  %v1868_v54 = vld [vmem:[%s2334_s1 + $0x348] sm:$0xff]  }
  0x32   :  { %1654 = vmatprep.subr.bf16.mxu1 %v1809_v55  ;;  %v1869_v55 = vld [vmem:[%s2334_s1 + $0x3c8] sm:$0xff]  }
  0x34   :  { %1633 = vmatpush3.bf16.msra.mxu0 %v1810_v56  ;;  %v1870_v56 = vld [vmem:[%s2334_s1 + $0x308] sm:$0xff]  }
  0x35   :  { %1655 = vmatpush3.bf16.msra.mxu1 %v1811_v57  ;;  %1634 = vmatprep.subr.bf16.mxu0 %v1812_v58  ;;  %v1871_v57 = vld [vmem:[%s2334_s1 + $0x388] sm:$0xff]   ;;  %v1872_v58 = vld [vmem:[%s2334_s1 + $0x350] sm:$0xff]  }
  0x36   :  { %1656 = vmatprep.subr.bf16.mxu1 %v1813_v59  ;;  %v1873_v59 = vld [vmem:[%s2334_s1 + $0x3d0] sm:$0xff]  }
  0x38   :  { %1635 = vmatpush3.bf16.msra.mxu0 %v1814_v60  ;;  %v1874_v60 = vld [vmem:[%s2334_s1 + $0x310] sm:$0xff]  }
  0x39   :  { %1657 = vmatpush3.bf16.msra.mxu1 %v1815_v61  ;;  %1636 = vmatprep.subr.bf16.mxu0 %v1816_v62  ;;  %v1875_v61 = vld [vmem:[%s2334_s1 + $0x390] sm:$0xff]   ;;  %v1876_v62 = vld [vmem:[%s2334_s1 + $0x358] sm:$0xff]  }
  0x3a   :  { %1658 = vmatprep.subr.bf16.mxu1 %v1817_v63  ;;  %v1877_v63 = vld [vmem:[%s2334_s1 + $0x3d8] sm:$0xff]  }
  0x3c   :  { %1637 = vmatpush3.bf16.msra.mxu0 %v1818_v0  ;;  %v1878_v0 = vld [vmem:[%s2334_s1 + $0x318] sm:$0xff]  }
  0x3d   :  { %1659 = vmatpush3.bf16.msra.mxu1 %v1819_v1  ;;  %1638 = vmatprep.subr.bf16.mxu0 %v1820_v2  ;;  %v1879_v1 = vld [vmem:[%s2334_s1 + $0x398] sm:$0xff]   ;;  %v1880_v2 = vld [vmem:[%s2334_s1 + $0x360] sm:$0xff]  }
  0x3e   :  { %1660 = vmatprep.subr.bf16.mxu1 %v1821_v3  ;;  %v1881_v3 = vld [vmem:[%s2334_s1 + $0x3e0] sm:$0xff]  }
  0x40   :  { %1639 = vmatpush3.bf16.msra.mxu0 %v1822_v4  ;;  %v1882_v4 = vld [vmem:[%s2334_s1 + $0x320] sm:$0xff]  }
  0x41   :  { %1661 = vmatpush3.bf16.msra.mxu1 %v1823_v5  ;;  %1668 = vmatprep.subr.bf16.mxu0 %v1828_v12  ;;  %v1883_v5 = vld [vmem:[%s2334_s1 + $0x3a0] sm:$0xff]   ;;  %v1890_v12 = vld [vmem:[%s2334_s1 + $0x330] sm:$0xff]  }
  0x42   :  { %1690 = vmatprep.subr.bf16.mxu1 %v1829_v13  ;;  %v1891_v13 = vld [vmem:[%s2334_s1 + $0x3b0] sm:$0xff]  }
  0x43   :  { %1223 = vmatmul.mubr.bf16.vlgmr.msra.gmra.mrb[4].mxu0 %v1440_v7  ;;  %v1885_v7 = vld [vmem:[%s2334_s1 + $0x3e8] sm:$0xff]  }
  0x44   :  { %1263 = vmatmul.mubr.bf16.vlgmr.msra.gmra.mrb[4].mxu1 %v1442_v10  ;;  %1669 = vmatpush3.bf16.msra.mxu0 %v1830_v14  ;;  %v1888_v10 = vld [vmem:[%s2334_s1 + $0x370] sm:$0xff]   ;;  %v1892_v14 = vld [vmem:[%s2334_s1 + $0x378] sm:$0xff]  }
  0x45   :  { %1691 = vmatpush3.bf16.msra.mxu1 %v1831_v15  ;;  %1670 = vmatprep.subr.bf16.mxu0 %v1832_v16  ;;  %v1893_v15 = vld [vmem:[%s2334_s1 + $0x3f8] sm:$0xff]  }
  0x46   :  { %1692 = vmatprep.subr.bf16.mxu1 %v1833_v17  ;;  %1302 = vmatprep.mubr.bf16.mxu0 %v1445_v47  ;;  %v1894_v16 = vld [vmem:[%s2334_s1 + $0x338] sm:$0xff]  }
  0x47   :  { %1342 = vmatprep.mubr.bf16.mxu1 %v1447_v49  ;;  %v1895_v17 = vld [vmem:[%s2334_s1 + $0x3b8] sm:$0xff]  }
  0x48   :  { %1671 = vmatpush3.bf16.msra.mxu0 %v1834_v18  ;;  %v21_v18 = vld [vmem:[%s2335_s0 + $0x30] sm:$0xff] }
  0x49   :  { %1693 = vmatpush3.bf16.msra.mxu1 %v1835_v19  ;;  %1672 = vmatprep.subr.bf16.mxu0 %v1836_v20  ;;  %v22_v19 = vld [vmem:[%s2335_s0 + $0x38] sm:$0xff]  ;;  %v1448_v20 = vcombine.low %v21_v18, %v21_v18 }
  0x4a   :  { %1694 = vmatprep.subr.bf16.mxu1 %v1837_v21  ;;  %v1449_v21 = vcombine.high %v21_v18, %v21_v18 }
  0x4c   :  { %1673 = vmatpush3.bf16.msra.mxu0 %v1838_v22  ;;  %v1450_v22 = vcombine.low %v22_v19, %v22_v19 }
  0x4d   :  { %1695 = vmatpush3.bf16.msra.mxu1 %v1839_v23  ;;  %1674 = vmatprep.subr.bf16.mxu0 %v1840_v24  ;;  %v1451_v23 = vcombine.high %v22_v19, %v22_v19 }
  0x4e   :  { %1696 = vmatprep.subr.bf16.mxu1 %v1841_v25 }
  0x50   :  { %1675 = vmatpush3.bf16.msra.mxu0 %v1842_v26  ;;  %v1435_v26 = vld [vmem:[%s2336_s2] ss:$0 sm:$0xff] }
  0x51   :  { %1697 = vmatpush3.bf16.msra.mxu1 %v1843_v27  ;;  %1676 = vmatprep.subr.bf16.mxu0 %v1844_v28 }
  0x52   :  { %1698 = vmatprep.subr.bf16.mxu1 %v1845_v29 }
  0x54   :  { %1677 = vmatpush3.bf16.msra.mxu0 %v1846_v30 }
  0x55   :  { %1699 = vmatpush3.bf16.msra.mxu1 %v1847_v31  ;;  %1678 = vmatprep.subr.bf16.mxu0 %v1848_v32 }
  0x56   :  { %1700 = vmatprep.subr.bf16.mxu1 %v1849_v33 }
  0x58   :  { %1679 = vmatpush3.bf16.msra.mxu0 %v1850_v34 }
  0x59   :  { %1701 = vmatpush3.bf16.msra.mxu1 %v1851_v35  ;;  %1680 = vmatprep.subr.bf16.mxu0 %v1852_v36 }
  0x5a   :  { %1702 = vmatprep.subr.bf16.mxu1 %v1853_v37 }
  0x5c   :  { %1681 = vmatpush3.bf16.msra.mxu0 %v1854_v38 }
  0x5d   :  { %1703 = vmatpush3.bf16.msra.mxu1 %v1855_v39  ;;  %1682 = vmatprep.subr.bf16.mxu0 %v1856_v40 }
  0x5e   :  { %1704 = vmatprep.subr.bf16.mxu1 %v1857_v41 }
  0x60   :  { %1683 = vmatpush3.bf16.msra.mxu0 %v1858_v42 }
  0x61   :  { %1705 = vmatpush3.bf16.msra.mxu1 %v1859_v43  ;;  %1712 = vmatprep.subr.bf16.mxu0 %v1864_v50 }
  0x62   :  { %1734 = vmatprep.subr.bf16.mxu1 %v1865_v51 }
  0x63   :  { %1303 = vmatmul.mubr.bf16.vlgmr.msra.gmra.mrb[8].mxu0 %v1444_v46 }
  0x64   :  { %1343 = vmatmul.mubr.bf16.vlgmr.msra.gmra.mrb[8].mxu1 %v1446_v48  ;;  %1713 = vmatpush3.bf16.msra.mxu0 %v1866_v52 }
  0x65   :  { %1735 = vmatpush3.bf16.msra.mxu1 %v1867_v53  ;;  %1714 = vmatprep.subr.bf16.mxu0 %v1868_v54 }
  0x66   :  { %1736 = vmatprep.subr.bf16.mxu1 %v1869_v55  ;;  %1382 = vmatprep.mubr.bf16.mxu0 %v1449_v21 }
  0x67   :  { %1422 = vmatprep.mubr.bf16.mxu1 %v1451_v23 }
  0x68   :  { %1715 = vmatpush3.bf16.msra.mxu0 %v1870_v56 }
  0x69   :  { %1737 = vmatpush3.bf16.msra.mxu1 %v1871_v57  ;;  %1716 = vmatprep.subr.bf16.mxu0 %v1872_v58 }
  0x6a   :  { %1738 = vmatprep.subr.bf16.mxu1 %v1873_v59 }
  0x6c   :  { %1717 = vmatpush3.bf16.msra.mxu0 %v1874_v60 }
  0x6d   :  { %1739 = vmatpush3.bf16.msra.mxu1 %v1875_v61  ;;  %1718 = vmatprep.subr.bf16.mxu0 %v1876_v62 }
  0x6e   :  { %1740 = vmatprep.subr.bf16.mxu1 %v1877_v63 }
  0x70   :  { %1719 = vmatpush3.bf16.msra.mxu0 %v1878_v0 }
  0x71   :  { %1741 = vmatpush3.bf16.msra.mxu1 %v1879_v1  ;;  %1720 = vmatprep.subr.bf16.mxu0 %v1880_v2 }
  0x72   :  { %1742 = vmatprep.subr.bf16.mxu1 %v1881_v3 }
  0x74   :  { %1721 = vmatpush3.bf16.msra.mxu0 %v1882_v4 }
  0x75   :  { %1743 = vmatpush3.bf16.msra.mxu1 %v1883_v5  ;;  %1722 = vmatprep.subr.bf16.mxu0 %v1884_v6 }
  0x76   :  { %1744 = vmatprep.subr.bf16.mxu1 %v1885_v7 }
  0x78   :  { %1723 = vmatpush3.bf16.msra.mxu0 %v1886_v8 }
  0x79   :  { %1745 = vmatpush3.bf16.msra.mxu1 %v1887_v9  ;;  %1724 = vmatprep.subr.bf16.mxu0 %v1888_v10 }
  0x7a   :  { %1746 = vmatprep.subr.bf16.mxu1 %v1889_v11 }
  0x7c   :  { %1725 = vmatpush3.bf16.msra.mxu0 %v1890_v12 }
  0x7d   :  { %1747 = vmatpush3.bf16.msra.mxu1 %v1891_v13  ;;  %1726 = vmatprep.subr.bf16.mxu0 %v1892_v14 }
  0x7e   :  { %1748 = vmatprep.subr.bf16.mxu1 %v1893_v15 }
  0x80   :  { %1727 = vmatpush3.bf16.msra.mxu0 %v1894_v16 }
  0x81   :  { %1749 = vmatpush3.bf16.msra.mxu1 %v1895_v17 }
  0x83   :  { %1383 = vmatmul.mubr.bf16.vlgmr.msra.gmra.mrb[12].mxu0 %v1448_v20 }
  0x84   :  { %1423 = vmatmul.mubr.bf16.vlgmr.msra.gmra.mrb[12].mxu1 %v1450_v22 }
  0xf6   :  { %v1596_v24 = vpop.f32.mrb[0].mxu0 }
  0xf7   :  { %v1618_v25 = vpop.f32.mrb[0].mxu1  ;;  %v1597_v27 = vpop.f32.mrb[1].mxu0 }
  0xf8   :  { %v1619_v28 = vpop.f32.mrb[1].mxu1  ;;  %v1598_v29 = vadd.f32 %v1597_v27, %v1596_v24  ;;  %v1599_v31 = vpop.f32.mrb[2].mxu0 }
  0xf9   :  { %v1620_v30 = vadd.f32 %v1619_v28, %v1618_v25  ;;  %v1621_v32 = vpop.f32.mrb[2].mxu1  ;;  %v1600_v33 = vpop.f32.mrb[3].mxu0 }
  0xfa   :  { %v1622_v34 = vpop.f32.mrb[3].mxu1  ;;  %v1145_v35 = vadd.f32 %v1598_v29, %v1435_v26 }
  0xfc   :  { %v1185_v36 = vadd.f32 %v1620_v30, %v1145_v35 }
 0x116   :  { %v1640_v37 = vpop.f32.mrb[4].mxu0 }
 0x117   :  { %v1662_v38 = vpop.f32.mrb[4].mxu1  ;;  %v1641_v39 = vpop.f32.mrb[5].mxu0 }
 0x118   :  { %v1663_v40 = vpop.f32.mrb[5].mxu1  ;;  %v1642_v41 = vadd.f32 %v1641_v39, %v1640_v37  ;;  %v1643_v43 = vpop.f32.mrb[6].mxu0 }
 0x119   :  { %v1664_v42 = vadd.f32 %v1663_v40, %v1662_v38  ;;  %v1665_v44 = vpop.f32.mrb[6].mxu1  ;;  %v1644_v45 = vpop.f32.mrb[7].mxu0 }
 0x11a   :  { %v1666_v46 = vpop.f32.mrb[7].mxu1  ;;  %v1225_v47 = vadd.f32 %v1642_v41, %v1185_v36 }
 0x11c   :  { %v1265_v48 = vadd.f32 %v1664_v42, %v1225_v47 }
 0x136   :  { %v1684_v49 = vpop.f32.mrb[8].mxu0 }
 0x137   :  { %v1706_v50 = vpop.f32.mrb[8].mxu1  ;;  %v1685_v51 = vpop.f32.mrb[9].mxu0 }
 0x138   :  { %v1686_v52 = vadd.f32 %v1685_v51, %v1684_v49  ;;  %v1707_v53 = vpop.f32.mrb[9].mxu1  ;;  %v1687_v54 = vpop.f32.mrb[10].mxu0 }
 0x139   :  { %v1708_v55 = vadd.f32 %v1707_v53, %v1706_v50  ;;  %v1709_v56 = vpop.f32.mrb[10].mxu1  ;;  %v1688_v57 = vpop.f32.mrb[11].mxu0 }
 0x13a   :  { %v1305_v58 = vadd.f32 %v1686_v52, %v1265_v48  ;;  %v1710_v59 = vpop.f32.mrb[11].mxu1 }
 0x13c   :  { %v1345_v60 = vadd.f32 %v1708_v55, %v1305_v58 }
 0x156   :  { %v1728_v61 = vpop.f32.mrb[12].mxu0 }
 0x157   :  { %v1750_v62 = vpop.f32.mrb[12].mxu1  ;;  %v1729_v63 = vpop.f32.mrb[13].mxu0 }
 0x158   :  { %v1730_v0 = vadd.f32 %v1729_v63, %v1728_v61  ;;  %v1751_v1 = vpop.f32.mrb[13].mxu1  ;;  %v1731_v2 = vpop.f32.mrb[14].mxu0 }
 0x159   :  { %v1752_v3 = vadd.f32 %v1751_v1, %v1750_v62  ;;  %v1753_v4 = vpop.f32.mrb[14].mxu1  ;;  %v1732_v5 = vpop.f32.mrb[15].mxu0 }
 0x15a   :  { %v1385_v6 = vadd.f32 %v1730_v0, %v1345_v60  ;;  %v1754_v7 = vpop.f32.mrb[15].mxu1 }
 0x15c   :  { %v1425_v8 = vadd.f32 %v1752_v3, %v1385_v6 }
 0x15e   :  { %1430 = vst [vmem:[%s2337_s3] sm:$0xff] %v1425_v8 }

</bundles_post_ra>
